<compile_context>
chip_gen: v6e
topology: v6e:2x2x1
jax: 0.10.0
libtpu: 0.0.40
codegen_flags: <defaults>
</compile_context>

<pallas_src>
import functools

import jax
import jax.numpy as jnp
from jax.experimental import pallas as pl
from jax.experimental.pallas import tpu as pltpu

LN_EPS = 1e-5          # torch.nn.LayerNorm default
_MASK_VALUE = -1e30    # large finite negative (avoids NaN for fully-masked rows)
# TODO(synk): PyTorch uses -inf in masked_fill; fully-masked rows would produce
# NaN there, here they produce a uniform distribution instead.


# ----------------------------------------------------------------------------
# Fused multi-head attention kernel (one batch element per grid step, all heads)
# ----------------------------------------------------------------------------
def mha_kernel(xq_ref, xkv_ref, mask_ref, npm_ref,
               wq_ref, bq_ref, wk_ref, bk_ref, wv_ref, bv_ref,
               wfc_ref, bfc_ref, g_ref, beta_ref,
               out_ref, attn_ref, *, n_head, temperature):
    xq = xq_ref[0].astype(jnp.float32)      # (Lq, D) -- also the residual
    xkv = xkv_ref[0].astype(jnp.float32)    # (Lk, D)
    mask = mask_ref[0]                      # (Lq, Lk)

    proj = jnp.zeros(xq.shape, jnp.float32)
    for h in range(n_head):                 # static unroll over heads
        qh = jnp.dot(xq, wq_ref[h], preferred_element_type=jnp.float32) + bq_ref[h]
        kh = jnp.dot(xkv, wk_ref[h], preferred_element_type=jnp.float32) + bk_ref[h]
        vh = jnp.dot(xkv, wv_ref[h], preferred_element_type=jnp.float32) + bv_ref[h]

        # q @ k^T via dot_general contracting last axes (no explicit transpose).
        s = jax.lax.dot_general(qh, kh, (((1,), (1,)), ((), ())),
                                preferred_element_type=jnp.float32) / temperature
        s = jnp.where(mask > 0, _MASK_VALUE, s)   # masked_fill(mask, -inf)
        s = s - jnp.max(s, axis=-1, keepdims=True)
        e = jnp.exp(s)
        p = e / jnp.sum(e, axis=-1, keepdims=True)
        attn_ref[h, 0] = p.astype(attn_ref.dtype)

        ctx = jnp.dot(p, vh, preferred_element_type=jnp.float32)          # (Lq, dv)
        # Output projection decomposed per head: sum_h ctx_h @ W_fc[h*dv:(h+1)*dv]
        proj = proj + jnp.dot(ctx, wfc_ref[h], preferred_element_type=jnp.float32)

    # TODO(synk): nn.Dropout is stochastic; treated as identity (eval mode).
    y = proj + bfc_ref[...] + xq                                          # residual
    mean = jnp.mean(y, axis=-1, keepdims=True)
    var = jnp.mean(jnp.square(y - mean), axis=-1, keepdims=True)
    y = (y - mean) * jax.lax.rsqrt(var + LN_EPS)
    y = y * g_ref[...] + beta_ref[...]
    out_ref[0] = (y * npm_ref[0]).astype(out_ref.dtype)


def fused_mha(q_in, kv_in, mask, non_pad_mask, p, *, n_head, d_k, d_v):
    """Returns (LayerNorm(fc(attn(q,k,v)) + q) * non_pad_mask, attn)."""
    B, Lq, D = q_in.shape
    Lk = kv_in.shape[1]
    H = n_head

    # Pre-arrange weights head-major (tiny one-time relayout on constants).
    wq = p["w_qs"].reshape(D, H, d_k).transpose(1, 0, 2)   # (H, D, dk)
    bq = p["b_qs"].reshape(H, 1, d_k)
    wk = p["w_ks"].reshape(D, H, d_k).transpose(1, 0, 2)
    bk = p["b_ks"].reshape(H, 1, d_k)
    wv = p["w_vs"].reshape(D, H, d_v).transpose(1, 0, 2)   # (H, D, dv)
    bv = p["b_vs"].reshape(H, 1, d_v)
    wfc = p["w_fc"].reshape(H, d_v, D)                      # (H, dv, D)
    bfc = p["b_fc"].reshape(1, D)
    g = p["ln_g"].reshape(1, D)
    b = p["ln_b"].reshape(1, D)

    proj_flops = 2 * B * (Lq * D * H * d_k + Lk * D * H * d_k + Lk * D * H * d_v)
    attn_flops = 2 * B * H * (Lq * Lk * d_k + Lq * Lk * d_v + Lq * d_v * D)
    bytes_acc = 4 * (B * Lq * D * 2 + B * Lk * D + B * Lq * Lk + B * Lq
                     + 2 * H * D * d_k + 2 * H * D * d_v + 3 * D
                     + H * B * Lq * Lk)
    cost = pl.CostEstimate(flops=proj_flops + attn_flops,
                           transcendentals=B * H * Lq * Lk,
                           bytes_accessed=bytes_acc)

    kern = functools.partial(mha_kernel, n_head=H, temperature=float(d_k) ** 0.5)

    out, attn = pl.pallas_call(
        kern,
        grid=(B,),
        in_specs=[
            pl.BlockSpec((1, Lq, D), lambda i: (i, 0, 0)),      # q input / residual
            pl.BlockSpec((1, Lk, D), lambda i: (i, 0, 0)),      # kv input
            pl.BlockSpec((1, Lq, Lk), lambda i: (i, 0, 0)),     # mask (no tiling over heads)
            pl.BlockSpec((1, Lq, 1), lambda i: (i, 0, 0)),      # non_pad_mask
            pl.BlockSpec((H, D, d_k), lambda i: (0, 0, 0)),     # Wq (resident)
            pl.BlockSpec((H, 1, d_k), lambda i: (0, 0, 0)),     # bq
            pl.BlockSpec((H, D, d_k), lambda i: (0, 0, 0)),     # Wk
            pl.BlockSpec((H, 1, d_k), lambda i: (0, 0, 0)),     # bk
            pl.BlockSpec((H, D, d_v), lambda i: (0, 0, 0)),     # Wv
            pl.BlockSpec((H, 1, d_v), lambda i: (0, 0, 0)),     # bv
            pl.BlockSpec((H, d_v, D), lambda i: (0, 0, 0)),     # W_fc (head-major rows)
            pl.BlockSpec((1, D), lambda i: (0, 0)),             # b_fc
            pl.BlockSpec((1, D), lambda i: (0, 0)),             # ln gamma
            pl.BlockSpec((1, D), lambda i: (0, 0)),             # ln beta
        ],
        out_specs=(
            pl.BlockSpec((1, Lq, D), lambda i: (i, 0, 0)),
            pl.BlockSpec((H, 1, Lq, Lk), lambda i: (0, i, 0, 0)),
        ),
        out_shape=(
            jax.ShapeDtypeStruct((B, Lq, D), jnp.float32),
            jax.ShapeDtypeStruct((H, B, Lq, Lk), jnp.float32),
        ),
        compiler_params=pltpu.CompilerParams(dimension_semantics=("parallel",)),
        cost_estimate=cost,
    )(q_in, kv_in, mask, non_pad_mask, wq, bq, wk, bk, wv, bv, wfc, bfc, g, b)

    # (H, B, Lq, Lk) -> (H*B, Lq, Lk): matches permute(2,0,1,3).view(-1, ...) ordering.
    return out, attn.reshape(H * B, Lq, Lk)


# ----------------------------------------------------------------------------
# Fused position-wise FFN + residual + LayerNorm + non_pad_mask kernel
# ----------------------------------------------------------------------------
def ffn_ln_kernel(x_ref, npm_ref, w1_ref, b1_ref, w2_ref, b2_ref, g_ref, beta_ref, o_ref):
    x = x_ref[...].astype(jnp.float32)                     # (bm, D) -- residual
    h = jnp.dot(x, w1_ref[...], preferred_element_type=jnp.float32) + b1_ref[...]
    h = jnp.maximum(h, 0.0)
    y = jnp.dot(h, w2_ref[...], preferred_element_type=jnp.float32) + b2_ref[...]
    y = y + x
    mean = jnp.mean(y, axis=-1, keepdims=True)
    var = jnp.mean(jnp.square(y - mean), axis=-1, keepdims=True)
    y = (y - mean) * jax.lax.rsqrt(var + LN_EPS)
    y = y * g_ref[...] + beta_ref[...]
    o_ref[...] = (y * npm_ref[...]).astype(o_ref.dtype)


def fused_ffn(x, non_pad_mask, p):
    B, L, D = x.shape
    M = B * L
    Hid = p["w1"].shape[1]
    xf = x.reshape(M, D)
    npm = non_pad_mask.reshape(M, 1)

    bm = M if M <= 256 else 256      # row tile; keeps VMEM bounded (v7x 64 MiB)
    grid = (pl.cdiv(M, bm),)
    cost = pl.CostEstimate(
        flops=4 * M * D * Hid, transcendentals=0,
        bytes_accessed=4 * (2 * M * D + 2 * D * Hid + M + Hid + 3 * D))

    out = pl.pallas_call(
        ffn_ln_kernel,
        grid=grid,
        in_specs=[
            pl.BlockSpec((bm, D), lambda i: (i, 0)),        # activations (tiled over rows)
            pl.BlockSpec((bm, 1), lambda i: (i, 0)),        # non_pad_mask
            pl.BlockSpec((D, Hid), lambda i: (0, 0)),       # W1 (resident)
            pl.BlockSpec((1, Hid), lambda i: (0, 0)),
            pl.BlockSpec((Hid, D), lambda i: (0, 0)),       # W2 (resident)
            pl.BlockSpec((1, D), lambda i: (0, 0)),
            pl.BlockSpec((1, D), lambda i: (0, 0)),
            pl.BlockSpec((1, D), lambda i: (0, 0)),
        ],
        out_specs=pl.BlockSpec((bm, D), lambda i: (i, 0)),
        out_shape=jax.ShapeDtypeStruct((M, D), jnp.float32),
        compiler_params=pltpu.CompilerParams(dimension_semantics=("parallel",)),
        cost_estimate=cost,
    )(xf, npm, p["w1"], p["b1"].reshape(1, Hid), p["w2"], p["b2"].reshape(1, D),
      p["ln_g"].reshape(1, D), p["ln_b"].reshape(1, D))
    return out.reshape(B, L, D)


# ----------------------------------------------------------------------------
# DecoderLayer forward
# ----------------------------------------------------------------------------
def decoder_layer(dec_input, enc_output, non_pad_mask, slf_attn_mask,
                  dec_enc_attn_mask, params, *, n_head, d_k, d_v):
    dec_out, dec_slf_attn = fused_mha(
        dec_input, dec_input, slf_attn_mask, non_pad_mask,
        params["slf_attn"], n_head=n_head, d_k=d_k, d_v=d_v)
    dec_out, dec_enc_attn = fused_mha(
        dec_out, enc_output, dec_enc_attn_mask, non_pad_mask,
        params["enc_attn"], n_head=n_head, d_k=d_k, d_v=d_v)
    dec_out = fused_ffn(dec_out, non_pad_mask, params["pos_ffn"])
    return dec_out, dec_slf_attn, dec_enc_attn


# ----------------------------------------------------------------------------
# Deterministic parameter initialization (shapes follow the module __init__)
# ----------------------------------------------------------------------------
def init_params(key, d_model, d_inner, n_head, d_k, d_v):
    def attn_params(k):
        ks = jax.random.split(k, 4)
        return {
            "w_qs": 0.05 * jax.random.normal(ks[0], (d_model, n_head * d_k), jnp.float32),
            "b_qs": jnp.zeros((n_head * d_k,), jnp.float32),
            "w_ks": 0.05 * jax.random.normal(ks[1], (d_model, n_head * d_k), jnp.float32),
            "b_ks": jnp.zeros((n_head * d_k,), jnp.float32),
            "w_vs": 0.05 * jax.random.normal(ks[2], (d_model, n_head * d_v), jnp.float32),
            "b_vs": jnp.zeros((n_head * d_v,), jnp.float32),
            "w_fc": 0.05 * jax.random.normal(ks[3], (n_head * d_v, d_model), jnp.float32),
            "b_fc": jnp.zeros((d_model,), jnp.float32),
            "ln_g": jnp.ones((d_model,), jnp.float32),
            "ln_b": jnp.zeros((d_model,), jnp.float32),
        }

    k_slf, k_enc, k_f1, k_f2 = jax.random.split(key, 4)
    return {
        "slf_attn": attn_params(k_slf),
        "enc_attn": attn_params(k_enc),
        "pos_ffn": {
            "w1": 0.05 * jax.random.normal(k_f1, (d_model, d_inner), jnp.float32),
            "b1": jnp.zeros((d_inner,), jnp.float32),
            "w2": 0.05 * jax.random.normal(k_f2, (d_inner, d_model), jnp.float32),
            "b2": jnp.zeros((d_model,), jnp.float32),
            "ln_g": jnp.ones((d_model,), jnp.float32),
            "ln_b": jnp.zeros((d_model,), jnp.float32),
        },
    }


if __name__ == "__main__":
    d_model, d_inner, n_head, d_k, d_v = 32, 64, 4, 8, 8
    batch, len_dec, len_enc = 2, 8, 16

    key = jax.random.PRNGKey(0)
    k_params, k_dec, k_enc = jax.random.split(key, 3)
    params = init_params(k_params, d_model, d_inner, n_head, d_k, d_v)

    dec_input = jax.random.normal(k_dec, (batch, len_dec, d_model), jnp.float32)
    enc_output = jax.random.normal(k_enc, (batch, len_enc, d_model), jnp.float32)

    # non_pad_mask: (B, L_dec, 1), 1.0 for real tokens, 0.0 for padding.
    non_pad_mask = jnp.ones((batch, len_dec, 1), jnp.float32)
    non_pad_mask = non_pad_mask.at[1, -2:, :].set(0.0)

    # slf_attn_mask: (B, L_dec, L_dec), 1 where attention is NOT allowed (causal).
    causal = jnp.triu(jnp.ones((len_dec, len_dec), jnp.float32), k=1)
    slf_attn_mask = jnp.broadcast_to(causal, (batch, len_dec, len_dec))

    # dec_enc_attn_mask: (B, L_dec, L_enc), 1 where encoder position is padded.
    dec_enc_attn_mask = jnp.zeros((batch, len_dec, len_enc), jnp.float32)
    dec_enc_attn_mask = dec_enc_attn_mask.at[1, :, -4:].set(1.0)

    fwd = jax.jit(functools.partial(decoder_layer, n_head=n_head, d_k=d_k, d_v=d_v))
    dec_out, slf_attn, enc_attn = fwd(dec_input, enc_output, non_pad_mask,
                                      slf_attn_mask, dec_enc_attn_mask, params)
    jax.block_until_ready((dec_out, slf_attn, enc_attn))

    assert dec_out.shape == (batch, len_dec, d_model)
    assert slf_attn.shape == (n_head * batch, len_dec, len_dec)
    assert enc_attn.shape == (n_head * batch, len_dec, len_enc)
    assert bool(jnp.all(jnp.isfinite(dec_out)))
    assert bool(jnp.all(jnp.isfinite(slf_attn)))
    assert bool(jnp.all(jnp.isfinite(enc_attn)))
    print("KERNEL_OK")
</pallas_src>

<mosaic_0001>
module attributes {stable_mosaic.version = 11 : i64} {
  func.func @mha_kernel(%arg0: i32, %arg1: memref<1x8x32xf32, #tpu.memory_space<vmem>>, %arg2: memref<1x8x32xf32, #tpu.memory_space<vmem>>, %arg3: memref<1x8x8xf32, #tpu.memory_space<vmem>>, %arg4: memref<1x8x1xf32, #tpu.memory_space<vmem>>, %arg5: memref<4x32x8xf32, #tpu.memory_space<vmem>>, %arg6: memref<4x1x8xf32, #tpu.memory_space<vmem>>, %arg7: memref<4x32x8xf32, #tpu.memory_space<vmem>>, %arg8: memref<4x1x8xf32, #tpu.memory_space<vmem>>, %arg9: memref<4x32x8xf32, #tpu.memory_space<vmem>>, %arg10: memref<4x1x8xf32, #tpu.memory_space<vmem>>, %arg11: memref<4x8x32xf32, #tpu.memory_space<vmem>>, %arg12: memref<1x32xf32, #tpu.memory_space<vmem>>, %arg13: memref<1x32xf32, #tpu.memory_space<vmem>>, %arg14: memref<1x32xf32, #tpu.memory_space<vmem>>, %arg15: memref<1x8x32xf32, #tpu.memory_space<vmem>>, %arg16: memref<4x1x8x8xf32, #tpu.memory_space<vmem>>) attributes {dimension_semantics = [#tpu.dimension_semantics<parallel>], iteration_bounds = array<i64: 2>, scalar_prefetch = 0 : i64, scratch_operands = 0 : i64, tpu.core_type = #tpu.core_type<tc>, window_params = [{transform_indices = @transform_0, window_bounds = array<i64: 1, 8, 32>}, {transform_indices = @transform_1, window_bounds = array<i64: 1, 8, 32>}, {transform_indices = @transform_2, window_bounds = array<i64: 1, 8, 8>}, {transform_indices = @transform_3, window_bounds = array<i64: 1, 8, 1>}, {pipeline_mode = #tpu.pipeline_mode<synchronous>, transform_indices = @transform_4, window_bounds = array<i64: 4, 32, 8>}, {pipeline_mode = #tpu.pipeline_mode<synchronous>, transform_indices = @transform_5, window_bounds = array<i64: 4, 1, 8>}, {pipeline_mode = #tpu.pipeline_mode<synchronous>, transform_indices = @transform_6, window_bounds = array<i64: 4, 32, 8>}, {pipeline_mode = #tpu.pipeline_mode<synchronous>, transform_indices = @transform_7, window_bounds = array<i64: 4, 1, 8>}, {pipeline_mode = #tpu.pipeline_mode<synchronous>, transform_indices = @transform_8, window_bounds = array<i64: 4, 32, 8>}, {pipeline_mode = #tpu.pipeline_mode<synchronous>, transform_indices = @transform_9, window_bounds = array<i64: 4, 1, 8>}, {pipeline_mode = #tpu.pipeline_mode<synchronous>, transform_indices = @transform_10, window_bounds = array<i64: 4, 8, 32>}, {pipeline_mode = #tpu.pipeline_mode<synchronous>, transform_indices = @transform_11, window_bounds = array<i64: 1, 32>}, {pipeline_mode = #tpu.pipeline_mode<synchronous>, transform_indices = @transform_12, window_bounds = array<i64: 1, 32>}, {pipeline_mode = #tpu.pipeline_mode<synchronous>, transform_indices = @transform_13, window_bounds = array<i64: 1, 32>}, {transform_indices = @transform_14, window_bounds = array<i64: 1, 8, 32>}, {transform_indices = @transform_15, window_bounds = array<i64: 4, 1, 8, 8>}]} {
    %c0 = arith.constant 0 : index
    %c0_0 = arith.constant 0 : index
    %c0_1 = arith.constant 0 : index
    %0 = vector.load %arg1[%c0, %c0_0, %c0_1] : memref<1x8x32xf32, #tpu.memory_space<vmem>>, vector<1x8x32xf32>
    %1 = vector.shape_cast %0 : vector<1x8x32xf32> to vector<8x32xf32>
    %c0_2 = arith.constant 0 : index
    %c0_3 = arith.constant 0 : index
    %c0_4 = arith.constant 0 : index
    %2 = vector.load %arg2[%c0_2, %c0_3, %c0_4] : memref<1x8x32xf32, #tpu.memory_space<vmem>>, vector<1x8x32xf32>
    %3 = vector.shape_cast %2 : vector<1x8x32xf32> to vector<8x32xf32>
    %c0_5 = arith.constant 0 : index
    %c0_6 = arith.constant 0 : index
    %c0_7 = arith.constant 0 : index
    %4 = vector.load %arg3[%c0_5, %c0_6, %c0_7] : memref<1x8x8xf32, #tpu.memory_space<vmem>>, vector<1x8x8xf32>
    %5 = vector.shape_cast %4 : vector<1x8x8xf32> to vector<8x8xf32>
    %cst = arith.constant 0.000000e+00 : f32
    %6 = vector.broadcast %cst : f32 to vector<8x32xf32>
    %c0_8 = arith.constant 0 : index
    %c0_9 = arith.constant 0 : index
    %c0_10 = arith.constant 0 : index
    %7 = vector.load %arg5[%c0_8, %c0_9, %c0_10] : memref<4x32x8xf32, #tpu.memory_space<vmem>>, vector<1x32x8xf32>
    %8 = vector.shape_cast %7 : vector<1x32x8xf32> to vector<32x8xf32>
    %cst_11 = arith.constant dense<0.000000e+00> : vector<8x8xf32>
    %9 = tpu.matmul %1, %8, %cst_11 {dimension_numbers = #tpu.dot_dimension_numbers<[1], [0], [0], [1], [0, 0, 1, 1], [], []>} : vector<8x32xf32>, vector<32x8xf32>, vector<8x8xf32> -> vector<8x8xf32>
    %c0_12 = arith.constant 0 : index
    %c0_13 = arith.constant 0 : index
    %c0_14 = arith.constant 0 : index
    %10 = vector.load %arg6[%c0_12, %c0_13, %c0_14] : memref<4x1x8xf32, #tpu.memory_space<vmem>>, vector<1x1x8xf32>
    %11 = vector.shape_cast %10 : vector<1x1x8xf32> to vector<1x8xf32>
    %12 = vector.broadcast %11 : vector<1x8xf32> to vector<8x8xf32>
    %13 = arith.addf %9, %12 : vector<8x8xf32>
    %c0_15 = arith.constant 0 : index
    %c0_16 = arith.constant 0 : index
    %c0_17 = arith.constant 0 : index
    %14 = vector.load %arg7[%c0_15, %c0_16, %c0_17] : memref<4x32x8xf32, #tpu.memory_space<vmem>>, vector<1x32x8xf32>
    %15 = vector.shape_cast %14 : vector<1x32x8xf32> to vector<32x8xf32>
    %cst_18 = arith.constant dense<0.000000e+00> : vector<8x8xf32>
    %16 = tpu.matmul %3, %15, %cst_18 {dimension_numbers = #tpu.dot_dimension_numbers<[1], [0], [0], [1], [0, 0, 1, 1], [], []>} : vector<8x32xf32>, vector<32x8xf32>, vector<8x8xf32> -> vector<8x8xf32>
    %c0_19 = arith.constant 0 : index
    %c0_20 = arith.constant 0 : index
    %c0_21 = arith.constant 0 : index
    %17 = vector.load %arg8[%c0_19, %c0_20, %c0_21] : memref<4x1x8xf32, #tpu.memory_space<vmem>>, vector<1x1x8xf32>
    %18 = vector.shape_cast %17 : vector<1x1x8xf32> to vector<1x8xf32>
    %19 = vector.broadcast %18 : vector<1x8xf32> to vector<8x8xf32>
    %20 = arith.addf %16, %19 : vector<8x8xf32>
    %c0_22 = arith.constant 0 : index
    %c0_23 = arith.constant 0 : index
    %c0_24 = arith.constant 0 : index
    %21 = vector.load %arg9[%c0_22, %c0_23, %c0_24] : memref<4x32x8xf32, #tpu.memory_space<vmem>>, vector<1x32x8xf32>
    %22 = vector.shape_cast %21 : vector<1x32x8xf32> to vector<32x8xf32>
    %cst_25 = arith.constant dense<0.000000e+00> : vector<8x8xf32>
    %23 = tpu.matmul %3, %22, %cst_25 {dimension_numbers = #tpu.dot_dimension_numbers<[1], [0], [0], [1], [0, 0, 1, 1], [], []>} : vector<8x32xf32>, vector<32x8xf32>, vector<8x8xf32> -> vector<8x8xf32>
    %c0_26 = arith.constant 0 : index
    %c0_27 = arith.constant 0 : index
    %c0_28 = arith.constant 0 : index
    %24 = vector.load %arg10[%c0_26, %c0_27, %c0_28] : memref<4x1x8xf32, #tpu.memory_space<vmem>>, vector<1x1x8xf32>
    %25 = vector.shape_cast %24 : vector<1x1x8xf32> to vector<1x8xf32>
    %26 = vector.broadcast %25 : vector<1x8xf32> to vector<8x8xf32>
    %27 = arith.addf %23, %26 : vector<8x8xf32>
    %cst_29 = arith.constant dense<0.000000e+00> : vector<8x8xf32>
    %28 = tpu.matmul %13, %20, %cst_29 {dimension_numbers = #tpu.dot_dimension_numbers<[1], [1], [0], [0], [0, 0, 1, 0], [], []>} : vector<8x8xf32>, vector<8x8xf32>, vector<8x8xf32> -> vector<8x8xf32>
    %cst_30 = arith.constant 2.82842708 : f32
    %29 = vector.broadcast %cst_30 : f32 to vector<8x8xf32>
    %30 = arith.divf %28, %29 : vector<8x8xf32>
    %cst_31 = arith.constant 0.000000e+00 : f32
    %31 = vector.broadcast %cst_31 : f32 to vector<8x8xf32>
    %32 = arith.cmpf ogt, %5, %31 : vector<8x8xf32>
    %cst_32 = arith.constant -1.000000e+30 : f32
    %33 = vector.broadcast %cst_32 : f32 to vector<8x8xf32>
    %34 = arith.select %32, %33, %30 : vector<8x8xi1>, vector<8x8xf32>
    %cst_33 = arith.constant dense<0xFF800000> : vector<8xf32>
    %35 = vector.multi_reduction <maximumf>, %34, %cst_33 [1] : vector<8x8xf32> to vector<8xf32>
    %36 = vector.shape_cast %35 : vector<8xf32> to vector<8x1xf32>
    %37 = vector.broadcast %36 : vector<8x1xf32> to vector<8x8xf32>
    %38 = arith.subf %34, %37 : vector<8x8xf32>
    %39 = math.exp %38 : vector<8x8xf32>
    %cst_34 = arith.constant dense<0.000000e+00> : vector<8xf32>
    %40 = vector.multi_reduction <add>, %39, %cst_34 [1] : vector<8x8xf32> to vector<8xf32>
    %41 = vector.shape_cast %40 : vector<8xf32> to vector<8x1xf32>
    %42 = vector.broadcast %41 : vector<8x1xf32> to vector<8x8xf32>
    %43 = arith.divf %39, %42 : vector<8x8xf32>
    %c0_35 = arith.constant 0 : index
    %c0_36 = arith.constant 0 : index
    %c0_37 = arith.constant 0 : index
    %c0_38 = arith.constant 0 : index
    %44 = vector.load %arg16[%c0_35, %c0_36, %c0_37, %c0_38] : memref<4x1x8x8xf32, #tpu.memory_space<vmem>>, vector<1x1x8x8xf32>
    %45 = vector.shape_cast %44 : vector<1x1x8x8xf32> to vector<8x8xf32>
    %46 = vector.shape_cast %43 : vector<8x8xf32> to vector<1x1x8x8xf32>
    tpu.vector_store %arg16[%c0_35, %c0_36, %c0_37, %c0_38], %46 {strides = array<i32>} : memref<4x1x8x8xf32, #tpu.memory_space<vmem>>, vector<1x1x8x8xf32>,
    %cst_39 = arith.constant dense<0.000000e+00> : vector<8x8xf32>
    %47 = tpu.matmul %43, %27, %cst_39 {dimension_numbers = #tpu.dot_dimension_numbers<[1], [0], [0], [1], [0, 0, 1, 1], [], []>} : vector<8x8xf32>, vector<8x8xf32>, vector<8x8xf32> -> vector<8x8xf32>
    %c0_40 = arith.constant 0 : index
    %c0_41 = arith.constant 0 : index
    %c0_42 = arith.constant 0 : index
    %48 = vector.load %arg11[%c0_40, %c0_41, %c0_42] : memref<4x8x32xf32, #tpu.memory_space<vmem>>, vector<1x8x32xf32>
    %49 = vector.shape_cast %48 : vector<1x8x32xf32> to vector<8x32xf32>
    %cst_43 = arith.constant dense<0.000000e+00> : vector<8x32xf32>
    %50 = tpu.matmul %47, %49, %cst_43 {dimension_numbers = #tpu.dot_dimension_numbers<[1], [0], [0], [1], [0, 0, 1, 1], [], []>} : vector<8x8xf32>, vector<8x32xf32>, vector<8x32xf32> -> vector<8x32xf32>
    %51 = arith.addf %6, %50 : vector<8x32xf32>
    %c1 = arith.constant 1 : index
    %c0_44 = arith.constant 0 : index
    %c0_45 = arith.constant 0 : index
    %52 = vector.load %arg5[%c1, %c0_44, %c0_45] : memref<4x32x8xf32, #tpu.memory_space<vmem>>, vector<1x32x8xf32>
    %53 = vector.shape_cast %52 : vector<1x32x8xf32> to vector<32x8xf32>
    %cst_46 = arith.constant dense<0.000000e+00> : vector<8x8xf32>
    %54 = tpu.matmul %1, %53, %cst_46 {dimension_numbers = #tpu.dot_dimension_numbers<[1], [0], [0], [1], [0, 0, 1, 1], [], []>} : vector<8x32xf32>, vector<32x8xf32>, vector<8x8xf32> -> vector<8x8xf32>
    %c1_47 = arith.constant 1 : index
    %c0_48 = arith.constant 0 : index
    %c0_49 = arith.constant 0 : index
    %55 = vector.load %arg6[%c1_47, %c0_48, %c0_49] : memref<4x1x8xf32, #tpu.memory_space<vmem>>, vector<1x1x8xf32>
    %56 = vector.shape_cast %55 : vector<1x1x8xf32> to vector<1x8xf32>
    %57 = vector.broadcast %56 : vector<1x8xf32> to vector<8x8xf32>
    %58 = arith.addf %54, %57 : vector<8x8xf32>
    %c1_50 = arith.constant 1 : index
    %c0_51 = arith.constant 0 : index
    %c0_52 = arith.constant 0 : index
    %59 = vector.load %arg7[%c1_50, %c0_51, %c0_52] : memref<4x32x8xf32, #tpu.memory_space<vmem>>, vector<1x32x8xf32>
    %60 = vector.shape_cast %59 : vector<1x32x8xf32> to vector<32x8xf32>
    %cst_53 = arith.constant dense<0.000000e+00> : vector<8x8xf32>
    %61 = tpu.matmul %3, %60, %cst_53 {dimension_numbers = #tpu.dot_dimension_numbers<[1], [0], [0], [1], [0, 0, 1, 1], [], []>} : vector<8x32xf32>, vector<32x8xf32>, vector<8x8xf32> -> vector<8x8xf32>
    %c1_54 = arith.constant 1 : index
    %c0_55 = arith.constant 0 : index
    %c0_56 = arith.constant 0 : index
    %62 = vector.load %arg8[%c1_54, %c0_55, %c0_56] : memref<4x1x8xf32, #tpu.memory_space<vmem>>, vector<1x1x8xf32>
    %63 = vector.shape_cast %62 : vector<1x1x8xf32> to vector<1x8xf32>
    %64 = vector.broadcast %63 : vector<1x8xf32> to vector<8x8xf32>
    %65 = arith.addf %61, %64 : vector<8x8xf32>
    %c1_57 = arith.constant 1 : index
    %c0_58 = arith.constant 0 : index
    %c0_59 = arith.constant 0 : index
    %66 = vector.load %arg9[%c1_57, %c0_58, %c0_59] : memref<4x32x8xf32, #tpu.memory_space<vmem>>, vector<1x32x8xf32>
    %67 = vector.shape_cast %66 : vector<1x32x8xf32> to vector<32x8xf32>
    %cst_60 = arith.constant dense<0.000000e+00> : vector<8x8xf32>
    %68 = tpu.matmul %3, %67, %cst_60 {dimension_numbers = #tpu.dot_dimension_numbers<[1], [0], [0], [1], [0, 0, 1, 1], [], []>} : vector<8x32xf32>, vector<32x8xf32>, vector<8x8xf32> -> vector<8x8xf32>
    %c1_61 = arith.constant 1 : index
    %c0_62 = arith.constant 0 : index
    %c0_63 = arith.constant 0 : index
    %69 = vector.load %arg10[%c1_61, %c0_62, %c0_63] : memref<4x1x8xf32, #tpu.memory_space<vmem>>, vector<1x1x8xf32>
    %70 = vector.shape_cast %69 : vector<1x1x8xf32> to vector<1x8xf32>
    %71 = vector.broadcast %70 : vector<1x8xf32> to vector<8x8xf32>
    %72 = arith.addf %68, %71 : vector<8x8xf32>
    %cst_64 = arith.constant dense<0.000000e+00> : vector<8x8xf32>
    %73 = tpu.matmul %58, %65, %cst_64 {dimension_numbers = #tpu.dot_dimension_numbers<[1], [1], [0], [0], [0, 0, 1, 0], [], []>} : vector<8x8xf32>, vector<8x8xf32>, vector<8x8xf32> -> vector<8x8xf32>
    %cst_65 = arith.constant 2.82842708 : f32
    %74 = vector.broadcast %cst_65 : f32 to vector<8x8xf32>
    %75 = arith.divf %73, %74 : vector<8x8xf32>
    %cst_66 = arith.constant 0.000000e+00 : f32
    %76 = vector.broadcast %cst_66 : f32 to vector<8x8xf32>
    %77 = arith.cmpf ogt, %5, %76 : vector<8x8xf32>
    %cst_67 = arith.constant -1.000000e+30 : f32
    %78 = vector.broadcast %cst_67 : f32 to vector<8x8xf32>
    %79 = arith.select %77, %78, %75 : vector<8x8xi1>, vector<8x8xf32>
    %cst_68 = arith.constant dense<0xFF800000> : vector<8xf32>
    %80 = vector.multi_reduction <maximumf>, %79, %cst_68 [1] : vector<8x8xf32> to vector<8xf32>
    %81 = vector.shape_cast %80 : vector<8xf32> to vector<8x1xf32>
    %82 = vector.broadcast %81 : vector<8x1xf32> to vector<8x8xf32>
    %83 = arith.subf %79, %82 : vector<8x8xf32>
    %84 = math.exp %83 : vector<8x8xf32>
    %cst_69 = arith.constant dense<0.000000e+00> : vector<8xf32>
    %85 = vector.multi_reduction <add>, %84, %cst_69 [1] : vector<8x8xf32> to vector<8xf32>
    %86 = vector.shape_cast %85 : vector<8xf32> to vector<8x1xf32>
    %87 = vector.broadcast %86 : vector<8x1xf32> to vector<8x8xf32>
    %88 = arith.divf %84, %87 : vector<8x8xf32>
    %c1_70 = arith.constant 1 : index
    %c0_71 = arith.constant 0 : index
    %c0_72 = arith.constant 0 : index
    %c0_73 = arith.constant 0 : index
    %89 = vector.load %arg16[%c1_70, %c0_71, %c0_72, %c0_73] : memref<4x1x8x8xf32, #tpu.memory_space<vmem>>, vector<1x1x8x8xf32>
    %90 = vector.shape_cast %89 : vector<1x1x8x8xf32> to vector<8x8xf32>
    %91 = vector.shape_cast %88 : vector<8x8xf32> to vector<1x1x8x8xf32>
    tpu.vector_store %arg16[%c1_70, %c0_71, %c0_72, %c0_73], %91 {strides = array<i32>} : memref<4x1x8x8xf32, #tpu.memory_space<vmem>>, vector<1x1x8x8xf32>,
    %cst_74 = arith.constant dense<0.000000e+00> : vector<8x8xf32>
    %92 = tpu.matmul %88, %72, %cst_74 {dimension_numbers = #tpu.dot_dimension_numbers<[1], [0], [0], [1], [0, 0, 1, 1], [], []>} : vector<8x8xf32>, vector<8x8xf32>, vector<8x8xf32> -> vector<8x8xf32>
    %c1_75 = arith.constant 1 : index
    %c0_76 = arith.constant 0 : index
    %c0_77 = arith.constant 0 : index
    %93 = vector.load %arg11[%c1_75, %c0_76, %c0_77] : memref<4x8x32xf32, #tpu.memory_space<vmem>>, vector<1x8x32xf32>
    %94 = vector.shape_cast %93 : vector<1x8x32xf32> to vector<8x32xf32>
    %cst_78 = arith.constant dense<0.000000e+00> : vector<8x32xf32>
    %95 = tpu.matmul %92, %94, %cst_78 {dimension_numbers = #tpu.dot_dimension_numbers<[1], [0], [0], [1], [0, 0, 1, 1], [], []>} : vector<8x8xf32>, vector<8x32xf32>, vector<8x32xf32> -> vector<8x32xf32>
    %96 = arith.addf %51, %95 : vector<8x32xf32>
    %c2 = arith.constant 2 : index
    %c0_79 = arith.constant 0 : index
    %c0_80 = arith.constant 0 : index
    %97 = vector.load %arg5[%c2, %c0_79, %c0_80] : memref<4x32x8xf32, #tpu.memory_space<vmem>>, vector<1x32x8xf32>
    %98 = vector.shape_cast %97 : vector<1x32x8xf32> to vector<32x8xf32>
    %cst_81 = arith.constant dense<0.000000e+00> : vector<8x8xf32>
    %99 = tpu.matmul %1, %98, %cst_81 {dimension_numbers = #tpu.dot_dimension_numbers<[1], [0], [0], [1], [0, 0, 1, 1], [], []>} : vector<8x32xf32>, vector<32x8xf32>, vector<8x8xf32> -> vector<8x8xf32>
    %c2_82 = arith.constant 2 : index
    %c0_83 = arith.constant 0 : index
    %c0_84 = arith.constant 0 : index
    %100 = vector.load %arg6[%c2_82, %c0_83, %c0_84] : memref<4x1x8xf32, #tpu.memory_space<vmem>>, vector<1x1x8xf32>
    %101 = vector.shape_cast %100 : vector<1x1x8xf32> to vector<1x8xf32>
    %102 = vector.broadcast %101 : vector<1x8xf32> to vector<8x8xf32>
    %103 = arith.addf %99, %102 : vector<8x8xf32>
    %c2_85 = arith.constant 2 : index
    %c0_86 = arith.constant 0 : index
    %c0_87 = arith.constant 0 : index
    %104 = vector.load %arg7[%c2_85, %c0_86, %c0_87] : memref<4x32x8xf32, #tpu.memory_space<vmem>>, vector<1x32x8xf32>
    %105 = vector.shape_cast %104 : vector<1x32x8xf32> to vector<32x8xf32>
    %cst_88 = arith.constant dense<0.000000e+00> : vector<8x8xf32>
    %106 = tpu.matmul %3, %105, %cst_88 {dimension_numbers = #tpu.dot_dimension_numbers<[1], [0], [0], [1], [0, 0, 1, 1], [], []>} : vector<8x32xf32>, vector<32x8xf32>, vector<8x8xf32> -> vector<8x8xf32>
    %c2_89 = arith.constant 2 : index
    %c0_90 = arith.constant 0 : index
    %c0_91 = arith.constant 0 : index
    %107 = vector.load %arg8[%c2_89, %c0_90, %c0_91] : memref<4x1x8xf32, #tpu.memory_space<vmem>>, vector<1x1x8xf32>
    %108 = vector.shape_cast %107 : vector<1x1x8xf32> to vector<1x8xf32>
    %109 = vector.broadcast %108 : vector<1x8xf32> to vector<8x8xf32>
    %110 = arith.addf %106, %109 : vector<8x8xf32>
    %c2_92 = arith.constant 2 : index
    %c0_93 = arith.constant 0 : index
    %c0_94 = arith.constant 0 : index
    %111 = vector.load %arg9[%c2_92, %c0_93, %c0_94] : memref<4x32x8xf32, #tpu.memory_space<vmem>>, vector<1x32x8xf32>
    %112 = vector.shape_cast %111 : vector<1x32x8xf32> to vector<32x8xf32>
    %cst_95 = arith.constant dense<0.000000e+00> : vector<8x8xf32>
    %113 = tpu.matmul %3, %112, %cst_95 {dimension_numbers = #tpu.dot_dimension_numbers<[1], [0], [0], [1], [0, 0, 1, 1], [], []>} : vector<8x32xf32>, vector<32x8xf32>, vector<8x8xf32> -> vector<8x8xf32>
    %c2_96 = arith.constant 2 : index
    %c0_97 = arith.constant 0 : index
    %c0_98 = arith.constant 0 : index
    %114 = vector.load %arg10[%c2_96, %c0_97, %c0_98] : memref<4x1x8xf32, #tpu.memory_space<vmem>>, vector<1x1x8xf32>
    %115 = vector.shape_cast %114 : vector<1x1x8xf32> to vector<1x8xf32>
    %116 = vector.broadcast %115 : vector<1x8xf32> to vector<8x8xf32>
    %117 = arith.addf %113, %116 : vector<8x8xf32>
    %cst_99 = arith.constant dense<0.000000e+00> : vector<8x8xf32>
    %118 = tpu.matmul %103, %110, %cst_99 {dimension_numbers = #tpu.dot_dimension_numbers<[1], [1], [0], [0], [0, 0, 1, 0], [], []>} : vector<8x8xf32>, vector<8x8xf32>, vector<8x8xf32> -> vector<8x8xf32>
    %cst_100 = arith.constant 2.82842708 : f32
    %119 = vector.broadcast %cst_100 : f32 to vector<8x8xf32>
    %120 = arith.divf %118, %119 : vector<8x8xf32>
    %cst_101 = arith.constant 0.000000e+00 : f32
    %121 = vector.broadcast %cst_101 : f32 to vector<8x8xf32>
    %122 = arith.cmpf ogt, %5, %121 : vector<8x8xf32>
    %cst_102 = arith.constant -1.000000e+30 : f32
    %123 = vector.broadcast %cst_102 : f32 to vector<8x8xf32>
    %124 = arith.select %122, %123, %120 : vector<8x8xi1>, vector<8x8xf32>
    %cst_103 = arith.constant dense<0xFF800000> : vector<8xf32>
    %125 = vector.multi_reduction <maximumf>, %124, %cst_103 [1] : vector<8x8xf32> to vector<8xf32>
    %126 = vector.shape_cast %125 : vector<8xf32> to vector<8x1xf32>
    %127 = vector.broadcast %126 : vector<8x1xf32> to vector<8x8xf32>
    %128 = arith.subf %124, %127 : vector<8x8xf32>
    %129 = math.exp %128 : vector<8x8xf32>
    %cst_104 = arith.constant dense<0.000000e+00> : vector<8xf32>
    %130 = vector.multi_reduction <add>, %129, %cst_104 [1] : vector<8x8xf32> to vector<8xf32>
    %131 = vector.shape_cast %130 : vector<8xf32> to vector<8x1xf32>
    %132 = vector.broadcast %131 : vector<8x1xf32> to vector<8x8xf32>
    %133 = arith.divf %129, %132 : vector<8x8xf32>
    %c2_105 = arith.constant 2 : index
    %c0_106 = arith.constant 0 : index
    %c0_107 = arith.constant 0 : index
    %c0_108 = arith.constant 0 : index
    %134 = vector.load %arg16[%c2_105, %c0_106, %c0_107, %c0_108] : memref<4x1x8x8xf32, #tpu.memory_space<vmem>>, vector<1x1x8x8xf32>
    %135 = vector.shape_cast %134 : vector<1x1x8x8xf32> to vector<8x8xf32>
    %136 = vector.shape_cast %133 : vector<8x8xf32> to vector<1x1x8x8xf32>
    tpu.vector_store %arg16[%c2_105, %c0_106, %c0_107, %c0_108], %136 {strides = array<i32>} : memref<4x1x8x8xf32, #tpu.memory_space<vmem>>, vector<1x1x8x8xf32>,
    %cst_109 = arith.constant dense<0.000000e+00> : vector<8x8xf32>
    %137 = tpu.matmul %133, %117, %cst_109 {dimension_numbers = #tpu.dot_dimension_numbers<[1], [0], [0], [1], [0, 0, 1, 1], [], []>} : vector<8x8xf32>, vector<8x8xf32>, vector<8x8xf32> -> vector<8x8xf32>
    %c2_110 = arith.constant 2 : index
    %c0_111 = arith.constant 0 : index
    %c0_112 = arith.constant 0 : index
    %138 = vector.load %arg11[%c2_110, %c0_111, %c0_112] : memref<4x8x32xf32, #tpu.memory_space<vmem>>, vector<1x8x32xf32>
    %139 = vector.shape_cast %138 : vector<1x8x32xf32> to vector<8x32xf32>
    %cst_113 = arith.constant dense<0.000000e+00> : vector<8x32xf32>
    %140 = tpu.matmul %137, %139, %cst_113 {dimension_numbers = #tpu.dot_dimension_numbers<[1], [0], [0], [1], [0, 0, 1, 1], [], []>} : vector<8x8xf32>, vector<8x32xf32>, vector<8x32xf32> -> vector<8x32xf32>
    %141 = arith.addf %96, %140 : vector<8x32xf32>
    %c3 = arith.constant 3 : index
    %c0_114 = arith.constant 0 : index
    %c0_115 = arith.constant 0 : index
    %142 = vector.load %arg5[%c3, %c0_114, %c0_115] : memref<4x32x8xf32, #tpu.memory_space<vmem>>, vector<1x32x8xf32>
    %143 = vector.shape_cast %142 : vector<1x32x8xf32> to vector<32x8xf32>
    %cst_116 = arith.constant dense<0.000000e+00> : vector<8x8xf32>
    %144 = tpu.matmul %1, %143, %cst_116 {dimension_numbers = #tpu.dot_dimension_numbers<[1], [0], [0], [1], [0, 0, 1, 1], [], []>} : vector<8x32xf32>, vector<32x8xf32>, vector<8x8xf32> -> vector<8x8xf32>
    %c3_117 = arith.constant 3 : index
    %c0_118 = arith.constant 0 : index
    %c0_119 = arith.constant 0 : index
    %145 = vector.load %arg6[%c3_117, %c0_118, %c0_119] : memref<4x1x8xf32, #tpu.memory_space<vmem>>, vector<1x1x8xf32>
    %146 = vector.shape_cast %145 : vector<1x1x8xf32> to vector<1x8xf32>
    %147 = vector.broadcast %146 : vector<1x8xf32> to vector<8x8xf32>
    %148 = arith.addf %144, %147 : vector<8x8xf32>
    %c3_120 = arith.constant 3 : index
    %c0_121 = arith.constant 0 : index
    %c0_122 = arith.constant 0 : index
    %149 = vector.load %arg7[%c3_120, %c0_121, %c0_122] : memref<4x32x8xf32, #tpu.memory_space<vmem>>, vector<1x32x8xf32>
    %150 = vector.shape_cast %149 : vector<1x32x8xf32> to vector<32x8xf32>
    %cst_123 = arith.constant dense<0.000000e+00> : vector<8x8xf32>
    %151 = tpu.matmul %3, %150, %cst_123 {dimension_numbers = #tpu.dot_dimension_numbers<[1], [0], [0], [1], [0, 0, 1, 1], [], []>} : vector<8x32xf32>, vector<32x8xf32>, vector<8x8xf32> -> vector<8x8xf32>
    %c3_124 = arith.constant 3 : index
    %c0_125 = arith.constant 0 : index
    %c0_126 = arith.constant 0 : index
    %152 = vector.load %arg8[%c3_124, %c0_125, %c0_126] : memref<4x1x8xf32, #tpu.memory_space<vmem>>, vector<1x1x8xf32>
    %153 = vector.shape_cast %152 : vector<1x1x8xf32> to vector<1x8xf32>
    %154 = vector.broadcast %153 : vector<1x8xf32> to vector<8x8xf32>
    %155 = arith.addf %151, %154 : vector<8x8xf32>
    %c3_127 = arith.constant 3 : index
    %c0_128 = arith.constant 0 : index
    %c0_129 = arith.constant 0 : index
    %156 = vector.load %arg9[%c3_127, %c0_128, %c0_129] : memref<4x32x8xf32, #tpu.memory_space<vmem>>, vector<1x32x8xf32>
    %157 = vector.shape_cast %156 : vector<1x32x8xf32> to vector<32x8xf32>
    %cst_130 = arith.constant dense<0.000000e+00> : vector<8x8xf32>
    %158 = tpu.matmul %3, %157, %cst_130 {dimension_numbers = #tpu.dot_dimension_numbers<[1], [0], [0], [1], [0, 0, 1, 1], [], []>} : vector<8x32xf32>, vector<32x8xf32>, vector<8x8xf32> -> vector<8x8xf32>
    %c3_131 = arith.constant 3 : index
    %c0_132 = arith.constant 0 : index
    %c0_133 = arith.constant 0 : index
    %159 = vector.load %arg10[%c3_131, %c0_132, %c0_133] : memref<4x1x8xf32, #tpu.memory_space<vmem>>, vector<1x1x8xf32>
    %160 = vector.shape_cast %159 : vector<1x1x8xf32> to vector<1x8xf32>
    %161 = vector.broadcast %160 : vector<1x8xf32> to vector<8x8xf32>
    %162 = arith.addf %158, %161 : vector<8x8xf32>
    %cst_134 = arith.constant dense<0.000000e+00> : vector<8x8xf32>
    %163 = tpu.matmul %148, %155, %cst_134 {dimension_numbers = #tpu.dot_dimension_numbers<[1], [1], [0], [0], [0, 0, 1, 0], [], []>} : vector<8x8xf32>, vector<8x8xf32>, vector<8x8xf32> -> vector<8x8xf32>
    %cst_135 = arith.constant 2.82842708 : f32
    %164 = vector.broadcast %cst_135 : f32 to vector<8x8xf32>
    %165 = arith.divf %163, %164 : vector<8x8xf32>
    %cst_136 = arith.constant 0.000000e+00 : f32
    %166 = vector.broadcast %cst_136 : f32 to vector<8x8xf32>
    %167 = arith.cmpf ogt, %5, %166 : vector<8x8xf32>
    %cst_137 = arith.constant -1.000000e+30 : f32
    %168 = vector.broadcast %cst_137 : f32 to vector<8x8xf32>
    %169 = arith.select %167, %168, %165 : vector<8x8xi1>, vector<8x8xf32>
    %cst_138 = arith.constant dense<0xFF800000> : vector<8xf32>
    %170 = vector.multi_reduction <maximumf>, %169, %cst_138 [1] : vector<8x8xf32> to vector<8xf32>
    %171 = vector.shape_cast %170 : vector<8xf32> to vector<8x1xf32>
    %172 = vector.broadcast %171 : vector<8x1xf32> to vector<8x8xf32>
    %173 = arith.subf %169, %172 : vector<8x8xf32>
    %174 = math.exp %173 : vector<8x8xf32>
    %cst_139 = arith.constant dense<0.000000e+00> : vector<8xf32>
    %175 = vector.multi_reduction <add>, %174, %cst_139 [1] : vector<8x8xf32> to vector<8xf32>
    %176 = vector.shape_cast %175 : vector<8xf32> to vector<8x1xf32>
    %177 = vector.broadcast %176 : vector<8x1xf32> to vector<8x8xf32>
    %178 = arith.divf %174, %177 : vector<8x8xf32>
    %c3_140 = arith.constant 3 : index
    %c0_141 = arith.constant 0 : index
    %c0_142 = arith.constant 0 : index
    %c0_143 = arith.constant 0 : index
    %179 = vector.load %arg16[%c3_140, %c0_141, %c0_142, %c0_143] : memref<4x1x8x8xf32, #tpu.memory_space<vmem>>, vector<1x1x8x8xf32>
    %180 = vector.shape_cast %179 : vector<1x1x8x8xf32> to vector<8x8xf32>
    %181 = vector.shape_cast %178 : vector<8x8xf32> to vector<1x1x8x8xf32>
    tpu.vector_store %arg16[%c3_140, %c0_141, %c0_142, %c0_143], %181 {strides = array<i32>} : memref<4x1x8x8xf32, #tpu.memory_space<vmem>>, vector<1x1x8x8xf32>,
    %cst_144 = arith.constant dense<0.000000e+00> : vector<8x8xf32>
    %182 = tpu.matmul %178, %162, %cst_144 {dimension_numbers = #tpu.dot_dimension_numbers<[1], [0], [0], [1], [0, 0, 1, 1], [], []>} : vector<8x8xf32>, vector<8x8xf32>, vector<8x8xf32> -> vector<8x8xf32>
    %c3_145 = arith.constant 3 : index
    %c0_146 = arith.constant 0 : index
    %c0_147 = arith.constant 0 : index
    %183 = vector.load %arg11[%c3_145, %c0_146, %c0_147] : memref<4x8x32xf32, #tpu.memory_space<vmem>>, vector<1x8x32xf32>
    %184 = vector.shape_cast %183 : vector<1x8x32xf32> to vector<8x32xf32>
    %cst_148 = arith.constant dense<0.000000e+00> : vector<8x32xf32>
    %185 = tpu.matmul %182, %184, %cst_148 {dimension_numbers = #tpu.dot_dimension_numbers<[1], [0], [0], [1], [0, 0, 1, 1], [], []>} : vector<8x8xf32>, vector<8x32xf32>, vector<8x32xf32> -> vector<8x32xf32>
    %186 = arith.addf %141, %185 : vector<8x32xf32>
    %c0_149 = arith.constant 0 : index
    %c0_150 = arith.constant 0 : index
    %187 = vector.load %arg12[%c0_149, %c0_150] : memref<1x32xf32, #tpu.memory_space<vmem>>, vector<1x32xf32>
    %188 = vector.broadcast %187 : vector<1x32xf32> to vector<8x32xf32>
    %189 = arith.addf %186, %188 : vector<8x32xf32>
    %190 = arith.addf %189, %1 : vector<8x32xf32>
    %cst_151 = arith.constant dense<0.000000e+00> : vector<8xf32>
    %191 = vector.multi_reduction <add>, %190, %cst_151 [1] : vector<8x32xf32> to vector<8xf32>
    %192 = vector.shape_cast %191 : vector<8xf32> to vector<8x1xf32>
    %cst_152 = arith.constant 3.200000e+01 : f32
    %193 = vector.broadcast %cst_152 : f32 to vector<8x1xf32>
    %194 = arith.divf %192, %193 : vector<8x1xf32>
    %195 = vector.broadcast %194 : vector<8x1xf32> to vector<8x32xf32>
    %196 = arith.subf %190, %195 : vector<8x32xf32>
    %197 = arith.mulf %196, %196 : vector<8x32xf32>
    %cst_153 = arith.constant dense<0.000000e+00> : vector<8xf32>
    %198 = vector.multi_reduction <add>, %197, %cst_153 [1] : vector<8x32xf32> to vector<8xf32>
    %199 = vector.shape_cast %198 : vector<8xf32> to vector<8x1xf32>
    %cst_154 = arith.constant 3.200000e+01 : f32
    %200 = vector.broadcast %cst_154 : f32 to vector<8x1xf32>
    %201 = arith.divf %199, %200 : vector<8x1xf32>
    %202 = vector.broadcast %194 : vector<8x1xf32> to vector<8x32xf32>
    %203 = arith.subf %190, %202 : vector<8x32xf32>
    %cst_155 = arith.constant 9.99999974E-6 : f32
    %204 = vector.broadcast %cst_155 : f32 to vector<8x1xf32>
    %205 = arith.addf %201, %204 : vector<8x1xf32>
    %206 = math.rsqrt %205 : vector<8x1xf32>
    %207 = vector.broadcast %206 : vector<8x1xf32> to vector<8x32xf32>
    %208 = arith.mulf %203, %207 : vector<8x32xf32>
    %c0_156 = arith.constant 0 : index
    %c0_157 = arith.constant 0 : index
    %209 = vector.load %arg13[%c0_156, %c0_157] : memref<1x32xf32, #tpu.memory_space<vmem>>, vector<1x32xf32>
    %210 = vector.broadcast %209 : vector<1x32xf32> to vector<8x32xf32>
    %211 = arith.mulf %208, %210 : vector<8x32xf32>
    %c0_158 = arith.constant 0 : index
    %c0_159 = arith.constant 0 : index
    %212 = vector.load %arg14[%c0_158, %c0_159] : memref<1x32xf32, #tpu.memory_space<vmem>>, vector<1x32xf32>
    %213 = vector.broadcast %212 : vector<1x32xf32> to vector<8x32xf32>
    %214 = arith.addf %211, %213 : vector<8x32xf32>
    %c0_160 = arith.constant 0 : index
    %c0_161 = arith.constant 0 : index
    %c0_162 = arith.constant 0 : index
    %215 = vector.load %arg4[%c0_160, %c0_161, %c0_162] : memref<1x8x1xf32, #tpu.memory_space<vmem>>, vector<1x8x1xf32>
    %216 = vector.shape_cast %215 : vector<1x8x1xf32> to vector<8x1xf32>
    %217 = vector.broadcast %216 : vector<8x1xf32> to vector<8x32xf32>
    %218 = arith.mulf %214, %217 : vector<8x32xf32>
    %c0_163 = arith.constant 0 : index
    %c0_164 = arith.constant 0 : index
    %c0_165 = arith.constant 0 : index
    %219 = vector.load %arg15[%c0_163, %c0_164, %c0_165] : memref<1x8x32xf32, #tpu.memory_space<vmem>>, vector<1x8x32xf32>
    %220 = vector.shape_cast %219 : vector<1x8x32xf32> to vector<8x32xf32>
    %221 = vector.shape_cast %218 : vector<8x32xf32> to vector<1x8x32xf32>
    tpu.vector_store %arg15[%c0_163, %c0_164, %c0_165], %221 {strides = array<i32>} : memref<1x8x32xf32, #tpu.memory_space<vmem>>, vector<1x8x32xf32>,
    return
  }
  func.func @transform_0(%arg0: i32) -> (i32, i32, i32) {
    %c0_i32 = arith.constant 0 : i32
    %c0_i32_0 = arith.constant 0 : i32
    %c0_i32_1 = arith.constant 0 : i32
    return %arg0, %c0_i32, %c0_i32_0 : i32, i32, i32
  }
  func.func @transform_1(%arg0: i32) -> (i32, i32, i32) {
    %c0_i32 = arith.constant 0 : i32
    %c0_i32_0 = arith.constant 0 : i32
    %c0_i32_1 = arith.constant 0 : i32
    return %arg0, %c0_i32, %c0_i32_0 : i32, i32, i32
  }
  func.func @transform_2(%arg0: i32) -> (i32, i32, i32) {
    %c0_i32 = arith.constant 0 : i32
    %c0_i32_0 = arith.constant 0 : i32
    %c0_i32_1 = arith.constant 0 : i32
    return %arg0, %c0_i32, %c0_i32_0 : i32, i32, i32
  }
  func.func @transform_3(%arg0: i32) -> (i32, i32, i32) {
    %c0_i32 = arith.constant 0 : i32
    %c0_i32_0 = arith.constant 0 : i32
    %c0_i32_1 = arith.constant 0 : i32
    return %arg0, %c0_i32, %c0_i32_0 : i32, i32, i32
  }
  func.func @transform_4(%arg0: i32) -> (i32, i32, i32) {
    %c0_i32 = arith.constant 0 : i32
    %c0_i32_0 = arith.constant 0 : i32
    %c0_i32_1 = arith.constant 0 : i32
    %c0_i32_2 = arith.constant 0 : i32
    return %c0_i32, %c0_i32_0, %c0_i32_1 : i32, i32, i32
  }
  func.func @transform_5(%arg0: i32) -> (i32, i32, i32) {
    %c0_i32 = arith.constant 0 : i32
    %c0_i32_0 = arith.constant 0 : i32
    %c0_i32_1 = arith.constant 0 : i32
    %c0_i32_2 = arith.constant 0 : i32
    return %c0_i32, %c0_i32_0, %c0_i32_1 : i32, i32, i32
  }
  func.func @transform_6(%arg0: i32) -> (i32, i32, i32) {
    %c0_i32 = arith.constant 0 : i32
    %c0_i32_0 = arith.constant 0 : i32
    %c0_i32_1 = arith.constant 0 : i32
    %c0_i32_2 = arith.constant 0 : i32
    return %c0_i32, %c0_i32_0, %c0_i32_1 : i32, i32, i32
  }
  func.func @transform_7(%arg0: i32) -> (i32, i32, i32) {
    %c0_i32 = arith.constant 0 : i32
    %c0_i32_0 = arith.constant 0 : i32
    %c0_i32_1 = arith.constant 0 : i32
    %c0_i32_2 = arith.constant 0 : i32
    return %c0_i32, %c0_i32_0, %c0_i32_1 : i32, i32, i32
  }
  func.func @transform_8(%arg0: i32) -> (i32, i32, i32) {
    %c0_i32 = arith.constant 0 : i32
    %c0_i32_0 = arith.constant 0 : i32
    %c0_i32_1 = arith.constant 0 : i32
    %c0_i32_2 = arith.constant 0 : i32
    return %c0_i32, %c0_i32_0, %c0_i32_1 : i32, i32, i32
  }
  func.func @transform_9(%arg0: i32) -> (i32, i32, i32) {
    %c0_i32 = arith.constant 0 : i32
    %c0_i32_0 = arith.constant 0 : i32
    %c0_i32_1 = arith.constant 0 : i32
    %c0_i32_2 = arith.constant 0 : i32
    return %c0_i32, %c0_i32_0, %c0_i32_1 : i32, i32, i32
  }
  func.func @transform_10(%arg0: i32) -> (i32, i32, i32) {
    %c0_i32 = arith.constant 0 : i32
    %c0_i32_0 = arith.constant 0 : i32
    %c0_i32_1 = arith.constant 0 : i32
    %c0_i32_2 = arith.constant 0 : i32
    return %c0_i32, %c0_i32_0, %c0_i32_1 : i32, i32, i32
  }
  func.func @transform_11(%arg0: i32) -> (i32, i32) {
    %c0_i32 = arith.constant 0 : i32
    %c0_i32_0 = arith.constant 0 : i32
    %c0_i32_1 = arith.constant 0 : i32
    return %c0_i32, %c0_i32_0 : i32, i32
  }
  func.func @transform_12(%arg0: i32) -> (i32, i32) {
    %c0_i32 = arith.constant 0 : i32
    %c0_i32_0 = arith.constant 0 : i32
    %c0_i32_1 = arith.constant 0 : i32
    return %c0_i32, %c0_i32_0 : i32, i32
  }
  func.func @transform_13(%arg0: i32) -> (i32, i32) {
    %c0_i32 = arith.constant 0 : i32
    %c0_i32_0 = arith.constant 0 : i32
    %c0_i32_1 = arith.constant 0 : i32
    return %c0_i32, %c0_i32_0 : i32, i32
  }
  func.func @transform_14(%arg0: i32) -> (i32, i32, i32) {
    %c0_i32 = arith.constant 0 : i32
    %c0_i32_0 = arith.constant 0 : i32
    %c0_i32_1 = arith.constant 0 : i32
    return %arg0, %c0_i32, %c0_i32_0 : i32, i32, i32
  }
  func.func @transform_15(%arg0: i32) -> (i32, i32, i32, i32) {
    %c0_i32 = arith.constant 0 : i32
    %c0_i32_0 = arith.constant 0 : i32
    %c0_i32_1 = arith.constant 0 : i32
    %c0_i32_2 = arith.constant 0 : i32
    return %c0_i32, %arg0, %c0_i32_0, %c0_i32_1 : i32, i32, i32, i32
  }
}

module attributes {stable_mosaic.version = 11 : i64} {
  func.func @mha_kernel(%arg0: i32, %arg1: memref<1x8x32xf32, #tpu.memory_space<vmem>>, %arg2: memref<1x16x32xf32, #tpu.memory_space<vmem>>, %arg3: memref<1x8x16xf32, #tpu.memory_space<vmem>>, %arg4: memref<1x8x1xf32, #tpu.memory_space<vmem>>, %arg5: memref<4x32x8xf32, #tpu.memory_space<vmem>>, %arg6: memref<4x1x8xf32, #tpu.memory_space<vmem>>, %arg7: memref<4x32x8xf32, #tpu.memory_space<vmem>>, %arg8: memref<4x1x8xf32, #tpu.memory_space<vmem>>, %arg9: memref<4x32x8xf32, #tpu.memory_space<vmem>>, %arg10: memref<4x1x8xf32, #tpu.memory_space<vmem>>, %arg11: memref<4x8x32xf32, #tpu.memory_space<vmem>>, %arg12: memref<1x32xf32, #tpu.memory_space<vmem>>, %arg13: memref<1x32xf32, #tpu.memory_space<vmem>>, %arg14: memref<1x32xf32, #tpu.memory_space<vmem>>, %arg15: memref<1x8x32xf32, #tpu.memory_space<vmem>>, %arg16: memref<4x1x8x16xf32, #tpu.memory_space<vmem>>) attributes {dimension_semantics = [#tpu.dimension_semantics<parallel>], iteration_bounds = array<i64: 2>, scalar_prefetch = 0 : i64, scratch_operands = 0 : i64, tpu.core_type = #tpu.core_type<tc>, window_params = [{transform_indices = @transform_0, window_bounds = array<i64: 1, 8, 32>}, {transform_indices = @transform_1, window_bounds = array<i64: 1, 16, 32>}, {transform_indices = @transform_2, window_bounds = array<i64: 1, 8, 16>}, {transform_indices = @transform_3, window_bounds = array<i64: 1, 8, 1>}, {pipeline_mode = #tpu.pipeline_mode<synchronous>, transform_indices = @transform_4, window_bounds = array<i64: 4, 32, 8>}, {pipeline_mode = #tpu.pipeline_mode<synchronous>, transform_indices = @transform_5, window_bounds = array<i64: 4, 1, 8>}, {pipeline_mode = #tpu.pipeline_mode<synchronous>, transform_indices = @transform_6, window_bounds = array<i64: 4, 32, 8>}, {pipeline_mode = #tpu.pipeline_mode<synchronous>, transform_indices = @transform_7, window_bounds = array<i64: 4, 1, 8>}, {pipeline_mode = #tpu.pipeline_mode<synchronous>, transform_indices = @transform_8, window_bounds = array<i64: 4, 32, 8>}, {pipeline_mode = #tpu.pipeline_mode<synchronous>, transform_indices = @transform_9, window_bounds = array<i64: 4, 1, 8>}, {pipeline_mode = #tpu.pipeline_mode<synchronous>, transform_indices = @transform_10, window_bounds = array<i64: 4, 8, 32>}, {pipeline_mode = #tpu.pipeline_mode<synchronous>, transform_indices = @transform_11, window_bounds = array<i64: 1, 32>}, {pipeline_mode = #tpu.pipeline_mode<synchronous>, transform_indices = @transform_12, window_bounds = array<i64: 1, 32>}, {pipeline_mode = #tpu.pipeline_mode<synchronous>, transform_indices = @transform_13, window_bounds = array<i64: 1, 32>}, {transform_indices = @transform_14, window_bounds = array<i64: 1, 8, 32>}, {transform_indices = @transform_15, window_bounds = array<i64: 4, 1, 8, 16>}]} {
    %c0 = arith.constant 0 : index
    %c0_0 = arith.constant 0 : index
    %c0_1 = arith.constant 0 : index
    %0 = vector.load %arg1[%c0, %c0_0, %c0_1] : memref<1x8x32xf32, #tpu.memory_space<vmem>>, vector<1x8x32xf32>
    %1 = vector.shape_cast %0 : vector<1x8x32xf32> to vector<8x32xf32>
    %c0_2 = arith.constant 0 : index
    %c0_3 = arith.constant 0 : index
    %c0_4 = arith.constant 0 : index
    %2 = vector.load %arg2[%c0_2, %c0_3, %c0_4] : memref<1x16x32xf32, #tpu.memory_space<vmem>>, vector<1x16x32xf32>
    %3 = vector.shape_cast %2 : vector<1x16x32xf32> to vector<16x32xf32>
    %c0_5 = arith.constant 0 : index
    %c0_6 = arith.constant 0 : index
    %c0_7 = arith.constant 0 : index
    %4 = vector.load %arg3[%c0_5, %c0_6, %c0_7] : memref<1x8x16xf32, #tpu.memory_space<vmem>>, vector<1x8x16xf32>
    %5 = vector.shape_cast %4 : vector<1x8x16xf32> to vector<8x16xf32>
    %cst = arith.constant 0.000000e+00 : f32
    %6 = vector.broadcast %cst : f32 to vector<8x32xf32>
    %c0_8 = arith.constant 0 : index
    %c0_9 = arith.constant 0 : index
    %c0_10 = arith.constant 0 : index
    %7 = vector.load %arg5[%c0_8, %c0_9, %c0_10] : memref<4x32x8xf32, #tpu.memory_space<vmem>>, vector<1x32x8xf32>
    %8 = vector.shape_cast %7 : vector<1x32x8xf32> to vector<32x8xf32>
    %cst_11 = arith.constant dense<0.000000e+00> : vector<8x8xf32>
    %9 = tpu.matmul %1, %8, %cst_11 {dimension_numbers = #tpu.dot_dimension_numbers<[1], [0], [0], [1], [0, 0, 1, 1], [], []>} : vector<8x32xf32>, vector<32x8xf32>, vector<8x8xf32> -> vector<8x8xf32>
    %c0_12 = arith.constant 0 : index
    %c0_13 = arith.constant 0 : index
    %c0_14 = arith.constant 0 : index
    %10 = vector.load %arg6[%c0_12, %c0_13, %c0_14] : memref<4x1x8xf32, #tpu.memory_space<vmem>>, vector<1x1x8xf32>
    %11 = vector.shape_cast %10 : vector<1x1x8xf32> to vector<1x8xf32>
    %12 = vector.broadcast %11 : vector<1x8xf32> to vector<8x8xf32>
    %13 = arith.addf %9, %12 : vector<8x8xf32>
    %c0_15 = arith.constant 0 : index
    %c0_16 = arith.constant 0 : index
    %c0_17 = arith.constant 0 : index
    %14 = vector.load %arg7[%c0_15, %c0_16, %c0_17] : memref<4x32x8xf32, #tpu.memory_space<vmem>>, vector<1x32x8xf32>
    %15 = vector.shape_cast %14 : vector<1x32x8xf32> to vector<32x8xf32>
    %cst_18 = arith.constant dense<0.000000e+00> : vector<16x8xf32>
    %16 = tpu.matmul %3, %15, %cst_18 {dimension_numbers = #tpu.dot_dimension_numbers<[1], [0], [0], [1], [0, 0, 1, 1], [], []>} : vector<16x32xf32>, vector<32x8xf32>, vector<16x8xf32> -> vector<16x8xf32>
    %c0_19 = arith.constant 0 : index
    %c0_20 = arith.constant 0 : index
    %c0_21 = arith.constant 0 : index
    %17 = vector.load %arg8[%c0_19, %c0_20, %c0_21] : memref<4x1x8xf32, #tpu.memory_space<vmem>>, vector<1x1x8xf32>
    %18 = vector.shape_cast %17 : vector<1x1x8xf32> to vector<1x8xf32>
    %19 = vector.broadcast %18 : vector<1x8xf32> to vector<16x8xf32>
    %20 = arith.addf %16, %19 : vector<16x8xf32>
    %c0_22 = arith.constant 0 : index
    %c0_23 = arith.constant 0 : index
    %c0_24 = arith.constant 0 : index
    %21 = vector.load %arg9[%c0_22, %c0_23, %c0_24] : memref<4x32x8xf32, #tpu.memory_space<vmem>>, vector<1x32x8xf32>
    %22 = vector.shape_cast %21 : vector<1x32x8xf32> to vector<32x8xf32>
    %cst_25 = arith.constant dense<0.000000e+00> : vector<16x8xf32>
    %23 = tpu.matmul %3, %22, %cst_25 {dimension_numbers = #tpu.dot_dimension_numbers<[1], [0], [0], [1], [0, 0, 1, 1], [], []>} : vector<16x32xf32>, vector<32x8xf32>, vector<16x8xf32> -> vector<16x8xf32>
    %c0_26 = arith.constant 0 : index
    %c0_27 = arith.constant 0 : index
    %c0_28 = arith.constant 0 : index
    %24 = vector.load %arg10[%c0_26, %c0_27, %c0_28] : memref<4x1x8xf32, #tpu.memory_space<vmem>>, vector<1x1x8xf32>
    %25 = vector.shape_cast %24 : vector<1x1x8xf32> to vector<1x8xf32>
    %26 = vector.broadcast %25 : vector<1x8xf32> to vector<16x8xf32>
    %27 = arith.addf %23, %26 : vector<16x8xf32>
    %cst_29 = arith.constant dense<0.000000e+00> : vector<8x16xf32>
    %28 = tpu.matmul %13, %20, %cst_29 {dimension_numbers = #tpu.dot_dimension_numbers<[1], [1], [0], [0], [0, 0, 1, 0], [], []>} : vector<8x8xf32>, vector<16x8xf32>, vector<8x16xf32> -> vector<8x16xf32>
    %cst_30 = arith.constant 2.82842708 : f32
    %29 = vector.broadcast %cst_30 : f32 to vector<8x16xf32>
    %30 = arith.divf %28, %29 : vector<8x16xf32>
    %cst_31 = arith.constant 0.000000e+00 : f32
    %31 = vector.broadcast %cst_31 : f32 to vector<8x16xf32>
    %32 = arith.cmpf ogt, %5, %31 : vector<8x16xf32>
    %cst_32 = arith.constant -1.000000e+30 : f32
    %33 = vector.broadcast %cst_32 : f32 to vector<8x16xf32>
    %34 = arith.select %32, %33, %30 : vector<8x16xi1>, vector<8x16xf32>
    %cst_33 = arith.constant dense<0xFF800000> : vector<8xf32>
    %35 = vector.multi_reduction <maximumf>, %34, %cst_33 [1] : vector<8x16xf32> to vector<8xf32>
    %36 = vector.shape_cast %35 : vector<8xf32> to vector<8x1xf32>
    %37 = vector.broadcast %36 : vector<8x1xf32> to vector<8x16xf32>
    %38 = arith.subf %34, %37 : vector<8x16xf32>
    %39 = math.exp %38 : vector<8x16xf32>
    %cst_34 = arith.constant dense<0.000000e+00> : vector<8xf32>
    %40 = vector.multi_reduction <add>, %39, %cst_34 [1] : vector<8x16xf32> to vector<8xf32>
    %41 = vector.shape_cast %40 : vector<8xf32> to vector<8x1xf32>
    %42 = vector.broadcast %41 : vector<8x1xf32> to vector<8x16xf32>
    %43 = arith.divf %39, %42 : vector<8x16xf32>
    %c0_35 = arith.constant 0 : index
    %c0_36 = arith.constant 0 : index
    %c0_37 = arith.constant 0 : index
    %c0_38 = arith.constant 0 : index
    %44 = vector.load %arg16[%c0_35, %c0_36, %c0_37, %c0_38] : memref<4x1x8x16xf32, #tpu.memory_space<vmem>>, vector<1x1x8x16xf32>
    %45 = vector.shape_cast %44 : vector<1x1x8x16xf32> to vector<8x16xf32>
    %46 = vector.shape_cast %43 : vector<8x16xf32> to vector<1x1x8x16xf32>
    tpu.vector_store %arg16[%c0_35, %c0_36, %c0_37, %c0_38], %46 {strides = array<i32>} : memref<4x1x8x16xf32, #tpu.memory_space<vmem>>, vector<1x1x8x16xf32>,
    %cst_39 = arith.constant dense<0.000000e+00> : vector<8x8xf32>
    %47 = tpu.matmul %43, %27, %cst_39 {dimension_numbers = #tpu.dot_dimension_numbers<[1], [0], [0], [1], [0, 0, 1, 1], [], []>} : vector<8x16xf32>, vector<16x8xf32>, vector<8x8xf32> -> vector<8x8xf32>
    %c0_40 = arith.constant 0 : index
    %c0_41 = arith.constant 0 : index
    %c0_42 = arith.constant 0 : index
    %48 = vector.load %arg11[%c0_40, %c0_41, %c0_42] : memref<4x8x32xf32, #tpu.memory_space<vmem>>, vector<1x8x32xf32>
    %49 = vector.shape_cast %48 : vector<1x8x32xf32> to vector<8x32xf32>
    %cst_43 = arith.constant dense<0.000000e+00> : vector<8x32xf32>
    %50 = tpu.matmul %47, %49, %cst_43 {dimension_numbers = #tpu.dot_dimension_numbers<[1], [0], [0], [1], [0, 0, 1, 1], [], []>} : vector<8x8xf32>, vector<8x32xf32>, vector<8x32xf32> -> vector<8x32xf32>
    %51 = arith.addf %6, %50 : vector<8x32xf32>
    %c1 = arith.constant 1 : index
    %c0_44 = arith.constant 0 : index
    %c0_45 = arith.constant 0 : index
    %52 = vector.load %arg5[%c1, %c0_44, %c0_45] : memref<4x32x8xf32, #tpu.memory_space<vmem>>, vector<1x32x8xf32>
    %53 = vector.shape_cast %52 : vector<1x32x8xf32> to vector<32x8xf32>
    %cst_46 = arith.constant dense<0.000000e+00> : vector<8x8xf32>
    %54 = tpu.matmul %1, %53, %cst_46 {dimension_numbers = #tpu.dot_dimension_numbers<[1], [0], [0], [1], [0, 0, 1, 1], [], []>} : vector<8x32xf32>, vector<32x8xf32>, vector<8x8xf32> -> vector<8x8xf32>
    %c1_47 = arith.constant 1 : index
    %c0_48 = arith.constant 0 : index
    %c0_49 = arith.constant 0 : index
    %55 = vector.load %arg6[%c1_47, %c0_48, %c0_49] : memref<4x1x8xf32, #tpu.memory_space<vmem>>, vector<1x1x8xf32>
    %56 = vector.shape_cast %55 : vector<1x1x8xf32> to vector<1x8xf32>
    %57 = vector.broadcast %56 : vector<1x8xf32> to vector<8x8xf32>
    %58 = arith.addf %54, %57 : vector<8x8xf32>
    %c1_50 = arith.constant 1 : index
    %c0_51 = arith.constant 0 : index
    %c0_52 = arith.constant 0 : index
    %59 = vector.load %arg7[%c1_50, %c0_51, %c0_52] : memref<4x32x8xf32, #tpu.memory_space<vmem>>, vector<1x32x8xf32>
    %60 = vector.shape_cast %59 : vector<1x32x8xf32> to vector<32x8xf32>
    %cst_53 = arith.constant dense<0.000000e+00> : vector<16x8xf32>
    %61 = tpu.matmul %3, %60, %cst_53 {dimension_numbers = #tpu.dot_dimension_numbers<[1], [0], [0], [1], [0, 0, 1, 1], [], []>} : vector<16x32xf32>, vector<32x8xf32>, vector<16x8xf32> -> vector<16x8xf32>
    %c1_54 = arith.constant 1 : index
    %c0_55 = arith.constant 0 : index
    %c0_56 = arith.constant 0 : index
    %62 = vector.load %arg8[%c1_54, %c0_55, %c0_56] : memref<4x1x8xf32, #tpu.memory_space<vmem>>, vector<1x1x8xf32>
    %63 = vector.shape_cast %62 : vector<1x1x8xf32> to vector<1x8xf32>
    %64 = vector.broadcast %63 : vector<1x8xf32> to vector<16x8xf32>
    %65 = arith.addf %61, %64 : vector<16x8xf32>
    %c1_57 = arith.constant 1 : index
    %c0_58 = arith.constant 0 : index
    %c0_59 = arith.constant 0 : index
    %66 = vector.load %arg9[%c1_57, %c0_58, %c0_59] : memref<4x32x8xf32, #tpu.memory_space<vmem>>, vector<1x32x8xf32>
    %67 = vector.shape_cast %66 : vector<1x32x8xf32> to vector<32x8xf32>
    %cst_60 = arith.constant dense<0.000000e+00> : vector<16x8xf32>
    %68 = tpu.matmul %3, %67, %cst_60 {dimension_numbers = #tpu.dot_dimension_numbers<[1], [0], [0], [1], [0, 0, 1, 1], [], []>} : vector<16x32xf32>, vector<32x8xf32>, vector<16x8xf32> -> vector<16x8xf32>
    %c1_61 = arith.constant 1 : index
    %c0_62 = arith.constant 0 : index
    %c0_63 = arith.constant 0 : index
    %69 = vector.load %arg10[%c1_61, %c0_62, %c0_63] : memref<4x1x8xf32, #tpu.memory_space<vmem>>, vector<1x1x8xf32>
    %70 = vector.shape_cast %69 : vector<1x1x8xf32> to vector<1x8xf32>
    %71 = vector.broadcast %70 : vector<1x8xf32> to vector<16x8xf32>
    %72 = arith.addf %68, %71 : vector<16x8xf32>
    %cst_64 = arith.constant dense<0.000000e+00> : vector<8x16xf32>
    %73 = tpu.matmul %58, %65, %cst_64 {dimension_numbers = #tpu.dot_dimension_numbers<[1], [1], [0], [0], [0, 0, 1, 0], [], []>} : vector<8x8xf32>, vector<16x8xf32>, vector<8x16xf32> -> vector<8x16xf32>
    %cst_65 = arith.constant 2.82842708 : f32
    %74 = vector.broadcast %cst_65 : f32 to vector<8x16xf32>
    %75 = arith.divf %73, %74 : vector<8x16xf32>
    %cst_66 = arith.constant 0.000000e+00 : f32
    %76 = vector.broadcast %cst_66 : f32 to vector<8x16xf32>
    %77 = arith.cmpf ogt, %5, %76 : vector<8x16xf32>
    %cst_67 = arith.constant -1.000000e+30 : f32
    %78 = vector.broadcast %cst_67 : f32 to vector<8x16xf32>
    %79 = arith.select %77, %78, %75 : vector<8x16xi1>, vector<8x16xf32>
    %cst_68 = arith.constant dense<0xFF800000> : vector<8xf32>
    %80 = vector.multi_reduction <maximumf>, %79, %cst_68 [1] : vector<8x16xf32> to vector<8xf32>
    %81 = vector.shape_cast %80 : vector<8xf32> to vector<8x1xf32>
    %82 = vector.broadcast %81 : vector<8x1xf32> to vector<8x16xf32>
    %83 = arith.subf %79, %82 : vector<8x16xf32>
    %84 = math.exp %83 : vector<8x16xf32>
    %cst_69 = arith.constant dense<0.000000e+00> : vector<8xf32>
    %85 = vector.multi_reduction <add>, %84, %cst_69 [1] : vector<8x16xf32> to vector<8xf32>
    %86 = vector.shape_cast %85 : vector<8xf32> to vector<8x1xf32>
    %87 = vector.broadcast %86 : vector<8x1xf32> to vector<8x16xf32>
    %88 = arith.divf %84, %87 : vector<8x16xf32>
    %c1_70 = arith.constant 1 : index
    %c0_71 = arith.constant 0 : index
    %c0_72 = arith.constant 0 : index
    %c0_73 = arith.constant 0 : index
    %89 = vector.load %arg16[%c1_70, %c0_71, %c0_72, %c0_73] : memref<4x1x8x16xf32, #tpu.memory_space<vmem>>, vector<1x1x8x16xf32>
    %90 = vector.shape_cast %89 : vector<1x1x8x16xf32> to vector<8x16xf32>
    %91 = vector.shape_cast %88 : vector<8x16xf32> to vector<1x1x8x16xf32>
    tpu.vector_store %arg16[%c1_70, %c0_71, %c0_72, %c0_73], %91 {strides = array<i32>} : memref<4x1x8x16xf32, #tpu.memory_space<vmem>>, vector<1x1x8x16xf32>,
    %cst_74 = arith.constant dense<0.000000e+00> : vector<8x8xf32>
    %92 = tpu.matmul %88, %72, %cst_74 {dimension_numbers = #tpu.dot_dimension_numbers<[1], [0], [0], [1], [0, 0, 1, 1], [], []>} : vector<8x16xf32>, vector<16x8xf32>, vector<8x8xf32> -> vector<8x8xf32>
    %c1_75 = arith.constant 1 : index
    %c0_76 = arith.constant 0 : index
    %c0_77 = arith.constant 0 : index
    %93 = vector.load %arg11[%c1_75, %c0_76, %c0_77] : memref<4x8x32xf32, #tpu.memory_space<vmem>>, vector<1x8x32xf32>
    %94 = vector.shape_cast %93 : vector<1x8x32xf32> to vector<8x32xf32>
    %cst_78 = arith.constant dense<0.000000e+00> : vector<8x32xf32>
    %95 = tpu.matmul %92, %94, %cst_78 {dimension_numbers = #tpu.dot_dimension_numbers<[1], [0], [0], [1], [0, 0, 1, 1], [], []>} : vector<8x8xf32>, vector<8x32xf32>, vector<8x32xf32> -> vector<8x32xf32>
    %96 = arith.addf %51, %95 : vector<8x32xf32>
    %c2 = arith.constant 2 : index
    %c0_79 = arith.constant 0 : index
    %c0_80 = arith.constant 0 : index
    %97 = vector.load %arg5[%c2, %c0_79, %c0_80] : memref<4x32x8xf32, #tpu.memory_space<vmem>>, vector<1x32x8xf32>
    %98 = vector.shape_cast %97 : vector<1x32x8xf32> to vector<32x8xf32>
    %cst_81 = arith.constant dense<0.000000e+00> : vector<8x8xf32>
    %99 = tpu.matmul %1, %98, %cst_81 {dimension_numbers = #tpu.dot_dimension_numbers<[1], [0], [0], [1], [0, 0, 1, 1], [], []>} : vector<8x32xf32>, vector<32x8xf32>, vector<8x8xf32> -> vector<8x8xf32>
    %c2_82 = arith.constant 2 : index
    %c0_83 = arith.constant 0 : index
    %c0_84 = arith.constant 0 : index
    %100 = vector.load %arg6[%c2_82, %c0_83, %c0_84] : memref<4x1x8xf32, #tpu.memory_space<vmem>>, vector<1x1x8xf32>
    %101 = vector.shape_cast %100 : vector<1x1x8xf32> to vector<1x8xf32>
    %102 = vector.broadcast %101 : vector<1x8xf32> to vector<8x8xf32>
    %103 = arith.addf %99, %102 : vector<8x8xf32>
    %c2_85 = arith.constant 2 : index
    %c0_86 = arith.constant 0 : index
    %c0_87 = arith.constant 0 : index
    %104 = vector.load %arg7[%c2_85, %c0_86, %c0_87] : memref<4x32x8xf32, #tpu.memory_space<vmem>>, vector<1x32x8xf32>
    %105 = vector.shape_cast %104 : vector<1x32x8xf32> to vector<32x8xf32>
    %cst_88 = arith.constant dense<0.000000e+00> : vector<16x8xf32>
    %106 = tpu.matmul %3, %105, %cst_88 {dimension_numbers = #tpu.dot_dimension_numbers<[1], [0], [0], [1], [0, 0, 1, 1], [], []>} : vector<16x32xf32>, vector<32x8xf32>, vector<16x8xf32> -> vector<16x8xf32>
    %c2_89 = arith.constant 2 : index
    %c0_90 = arith.constant 0 : index
    %c0_91 = arith.constant 0 : index
    %107 = vector.load %arg8[%c2_89, %c0_90, %c0_91] : memref<4x1x8xf32, #tpu.memory_space<vmem>>, vector<1x1x8xf32>
    %108 = vector.shape_cast %107 : vector<1x1x8xf32> to vector<1x8xf32>
    %109 = vector.broadcast %108 : vector<1x8xf32> to vector<16x8xf32>
    %110 = arith.addf %106, %109 : vector<16x8xf32>
    %c2_92 = arith.constant 2 : index
    %c0_93 = arith.constant 0 : index
    %c0_94 = arith.constant 0 : index
    %111 = vector.load %arg9[%c2_92, %c0_93, %c0_94] : memref<4x32x8xf32, #tpu.memory_space<vmem>>, vector<1x32x8xf32>
    %112 = vector.shape_cast %111 : vector<1x32x8xf32> to vector<32x8xf32>
    %cst_95 = arith.constant dense<0.000000e+00> : vector<16x8xf32>
    %113 = tpu.matmul %3, %112, %cst_95 {dimension_numbers = #tpu.dot_dimension_numbers<[1], [0], [0], [1], [0, 0, 1, 1], [], []>} : vector<16x32xf32>, vector<32x8xf32>, vector<16x8xf32> -> vector<16x8xf32>
    %c2_96 = arith.constant 2 : index
    %c0_97 = arith.constant 0 : index
    %c0_98 = arith.constant 0 : index
    %114 = vector.load %arg10[%c2_96, %c0_97, %c0_98] : memref<4x1x8xf32, #tpu.memory_space<vmem>>, vector<1x1x8xf32>
    %115 = vector.shape_cast %114 : vector<1x1x8xf32> to vector<1x8xf32>
    %116 = vector.broadcast %115 : vector<1x8xf32> to vector<16x8xf32>
    %117 = arith.addf %113, %116 : vector<16x8xf32>
    %cst_99 = arith.constant dense<0.000000e+00> : vector<8x16xf32>
    %118 = tpu.matmul %103, %110, %cst_99 {dimension_numbers = #tpu.dot_dimension_numbers<[1], [1], [0], [0], [0, 0, 1, 0], [], []>} : vector<8x8xf32>, vector<16x8xf32>, vector<8x16xf32> -> vector<8x16xf32>
    %cst_100 = arith.constant 2.82842708 : f32
    %119 = vector.broadcast %cst_100 : f32 to vector<8x16xf32>
    %120 = arith.divf %118, %119 : vector<8x16xf32>
    %cst_101 = arith.constant 0.000000e+00 : f32
    %121 = vector.broadcast %cst_101 : f32 to vector<8x16xf32>
    %122 = arith.cmpf ogt, %5, %121 : vector<8x16xf32>
    %cst_102 = arith.constant -1.000000e+30 : f32
    %123 = vector.broadcast %cst_102 : f32 to vector<8x16xf32>
    %124 = arith.select %122, %123, %120 : vector<8x16xi1>, vector<8x16xf32>
    %cst_103 = arith.constant dense<0xFF800000> : vector<8xf32>
    %125 = vector.multi_reduction <maximumf>, %124, %cst_103 [1] : vector<8x16xf32> to vector<8xf32>
    %126 = vector.shape_cast %125 : vector<8xf32> to vector<8x1xf32>
    %127 = vector.broadcast %126 : vector<8x1xf32> to vector<8x16xf32>
    %128 = arith.subf %124, %127 : vector<8x16xf32>
    %129 = math.exp %128 : vector<8x16xf32>
    %cst_104 = arith.constant dense<0.000000e+00> : vector<8xf32>
    %130 = vector.multi_reduction <add>, %129, %cst_104 [1] : vector<8x16xf32> to vector<8xf32>
    %131 = vector.shape_cast %130 : vector<8xf32> to vector<8x1xf32>
    %132 = vector.broadcast %131 : vector<8x1xf32> to vector<8x16xf32>
    %133 = arith.divf %129, %132 : vector<8x16xf32>
    %c2_105 = arith.constant 2 : index
    %c0_106 = arith.constant 0 : index
    %c0_107 = arith.constant 0 : index
    %c0_108 = arith.constant 0 : index
    %134 = vector.load %arg16[%c2_105, %c0_106, %c0_107, %c0_108] : memref<4x1x8x16xf32, #tpu.memory_space<vmem>>, vector<1x1x8x16xf32>
    %135 = vector.shape_cast %134 : vector<1x1x8x16xf32> to vector<8x16xf32>
    %136 = vector.shape_cast %133 : vector<8x16xf32> to vector<1x1x8x16xf32>
    tpu.vector_store %arg16[%c2_105, %c0_106, %c0_107, %c0_108], %136 {strides = array<i32>} : memref<4x1x8x16xf32, #tpu.memory_space<vmem>>, vector<1x1x8x16xf32>,
    %cst_109 = arith.constant dense<0.000000e+00> : vector<8x8xf32>
    %137 = tpu.matmul %133, %117, %cst_109 {dimension_numbers = #tpu.dot_dimension_numbers<[1], [0], [0], [1], [0, 0, 1, 1], [], []>} : vector<8x16xf32>, vector<16x8xf32>, vector<8x8xf32> -> vector<8x8xf32>
    %c2_110 = arith.constant 2 : index
    %c0_111 = arith.constant 0 : index
    %c0_112 = arith.constant 0 : index
    %138 = vector.load %arg11[%c2_110, %c0_111, %c0_112] : memref<4x8x32xf32, #tpu.memory_space<vmem>>, vector<1x8x32xf32>
    %139 = vector.shape_cast %138 : vector<1x8x32xf32> to vector<8x32xf32>
    %cst_113 = arith.constant dense<0.000000e+00> : vector<8x32xf32>
    %140 = tpu.matmul %137, %139, %cst_113 {dimension_numbers = #tpu.dot_dimension_numbers<[1], [0], [0], [1], [0, 0, 1, 1], [], []>} : vector<8x8xf32>, vector<8x32xf32>, vector<8x32xf32> -> vector<8x32xf32>
    %141 = arith.addf %96, %140 : vector<8x32xf32>
    %c3 = arith.constant 3 : index
    %c0_114 = arith.constant 0 : index
    %c0_115 = arith.constant 0 : index
    %142 = vector.load %arg5[%c3, %c0_114, %c0_115] : memref<4x32x8xf32, #tpu.memory_space<vmem>>, vector<1x32x8xf32>
    %143 = vector.shape_cast %142 : vector<1x32x8xf32> to vector<32x8xf32>
    %cst_116 = arith.constant dense<0.000000e+00> : vector<8x8xf32>
    %144 = tpu.matmul %1, %143, %cst_116 {dimension_numbers = #tpu.dot_dimension_numbers<[1], [0], [0], [1], [0, 0, 1, 1], [], []>} : vector<8x32xf32>, vector<32x8xf32>, vector<8x8xf32> -> vector<8x8xf32>
    %c3_117 = arith.constant 3 : index
    %c0_118 = arith.constant 0 : index
    %c0_119 = arith.constant 0 : index
    %145 = vector.load %arg6[%c3_117, %c0_118, %c0_119] : memref<4x1x8xf32, #tpu.memory_space<vmem>>, vector<1x1x8xf32>
    %146 = vector.shape_cast %145 : vector<1x1x8xf32> to vector<1x8xf32>
    %147 = vector.broadcast %146 : vector<1x8xf32> to vector<8x8xf32>
    %148 = arith.addf %144, %147 : vector<8x8xf32>
    %c3_120 = arith.constant 3 : index
    %c0_121 = arith.constant 0 : index
    %c0_122 = arith.constant 0 : index
    %149 = vector.load %arg7[%c3_120, %c0_121, %c0_122] : memref<4x32x8xf32, #tpu.memory_space<vmem>>, vector<1x32x8xf32>
    %150 = vector.shape_cast %149 : vector<1x32x8xf32> to vector<32x8xf32>
    %cst_123 = arith.constant dense<0.000000e+00> : vector<16x8xf32>
    %151 = tpu.matmul %3, %150, %cst_123 {dimension_numbers = #tpu.dot_dimension_numbers<[1], [0], [0], [1], [0, 0, 1, 1], [], []>} : vector<16x32xf32>, vector<32x8xf32>, vector<16x8xf32> -> vector<16x8xf32>
    %c3_124 = arith.constant 3 : index
    %c0_125 = arith.constant 0 : index
    %c0_126 = arith.constant 0 : index
    %152 = vector.load %arg8[%c3_124, %c0_125, %c0_126] : memref<4x1x8xf32, #tpu.memory_space<vmem>>, vector<1x1x8xf32>
    %153 = vector.shape_cast %152 : vector<1x1x8xf32> to vector<1x8xf32>
    %154 = vector.broadcast %153 : vector<1x8xf32> to vector<16x8xf32>
    %155 = arith.addf %151, %154 : vector<16x8xf32>
    %c3_127 = arith.constant 3 : index
    %c0_128 = arith.constant 0 : index
    %c0_129 = arith.constant 0 : index
    %156 = vector.load %arg9[%c3_127, %c0_128, %c0_129] : memref<4x32x8xf32, #tpu.memory_space<vmem>>, vector<1x32x8xf32>
    %157 = vector.shape_cast %156 : vector<1x32x8xf32> to vector<32x8xf32>
    %cst_130 = arith.constant dense<0.000000e+00> : vector<16x8xf32>
    %158 = tpu.matmul %3, %157, %cst_130 {dimension_numbers = #tpu.dot_dimension_numbers<[1], [0], [0], [1], [0, 0, 1, 1], [], []>} : vector<16x32xf32>, vector<32x8xf32>, vector<16x8xf32> -> vector<16x8xf32>
    %c3_131 = arith.constant 3 : index
    %c0_132 = arith.constant 0 : index
    %c0_133 = arith.constant 0 : index
    %159 = vector.load %arg10[%c3_131, %c0_132, %c0_133] : memref<4x1x8xf32, #tpu.memory_space<vmem>>, vector<1x1x8xf32>
    %160 = vector.shape_cast %159 : vector<1x1x8xf32> to vector<1x8xf32>
    %161 = vector.broadcast %160 : vector<1x8xf32> to vector<16x8xf32>
    %162 = arith.addf %158, %161 : vector<16x8xf32>
    %cst_134 = arith.constant dense<0.000000e+00> : vector<8x16xf32>
    %163 = tpu.matmul %148, %155, %cst_134 {dimension_numbers = #tpu.dot_dimension_numbers<[1], [1], [0], [0], [0, 0, 1, 0], [], []>} : vector<8x8xf32>, vector<16x8xf32>, vector<8x16xf32> -> vector<8x16xf32>
    %cst_135 = arith.constant 2.82842708 : f32
    %164 = vector.broadcast %cst_135 : f32 to vector<8x16xf32>
    %165 = arith.divf %163, %164 : vector<8x16xf32>
    %cst_136 = arith.constant 0.000000e+00 : f32
    %166 = vector.broadcast %cst_136 : f32 to vector<8x16xf32>
    %167 = arith.cmpf ogt, %5, %166 : vector<8x16xf32>
    %cst_137 = arith.constant -1.000000e+30 : f32
    %168 = vector.broadcast %cst_137 : f32 to vector<8x16xf32>
    %169 = arith.select %167, %168, %165 : vector<8x16xi1>, vector<8x16xf32>
    %cst_138 = arith.constant dense<0xFF800000> : vector<8xf32>
    %170 = vector.multi_reduction <maximumf>, %169, %cst_138 [1] : vector<8x16xf32> to vector<8xf32>
    %171 = vector.shape_cast %170 : vector<8xf32> to vector<8x1xf32>
    %172 = vector.broadcast %171 : vector<8x1xf32> to vector<8x16xf32>
    %173 = arith.subf %169, %172 : vector<8x16xf32>
    %174 = math.exp %173 : vector<8x16xf32>
    %cst_139 = arith.constant dense<0.000000e+00> : vector<8xf32>
    %175 = vector.multi_reduction <add>, %174, %cst_139 [1] : vector<8x16xf32> to vector<8xf32>
    %176 = vector.shape_cast %175 : vector<8xf32> to vector<8x1xf32>
    %177 = vector.broadcast %176 : vector<8x1xf32> to vector<8x16xf32>
    %178 = arith.divf %174, %177 : vector<8x16xf32>
    %c3_140 = arith.constant 3 : index
    %c0_141 = arith.constant 0 : index
    %c0_142 = arith.constant 0 : index
    %c0_143 = arith.constant 0 : index
    %179 = vector.load %arg16[%c3_140, %c0_141, %c0_142, %c0_143] : memref<4x1x8x16xf32, #tpu.memory_space<vmem>>, vector<1x1x8x16xf32>
    %180 = vector.shape_cast %179 : vector<1x1x8x16xf32> to vector<8x16xf32>
    %181 = vector.shape_cast %178 : vector<8x16xf32> to vector<1x1x8x16xf32>
    tpu.vector_store %arg16[%c3_140, %c0_141, %c0_142, %c0_143], %181 {strides = array<i32>} : memref<4x1x8x16xf32, #tpu.memory_space<vmem>>, vector<1x1x8x16xf32>,
    %cst_144 = arith.constant dense<0.000000e+00> : vector<8x8xf32>
    %182 = tpu.matmul %178, %162, %cst_144 {dimension_numbers = #tpu.dot_dimension_numbers<[1], [0], [0], [1], [0, 0, 1, 1], [], []>} : vector<8x16xf32>, vector<16x8xf32>, vector<8x8xf32> -> vector<8x8xf32>
    %c3_145 = arith.constant 3 : index
    %c0_146 = arith.constant 0 : index
    %c0_147 = arith.constant 0 : index
    %183 = vector.load %arg11[%c3_145, %c0_146, %c0_147] : memref<4x8x32xf32, #tpu.memory_space<vmem>>, vector<1x8x32xf32>
    %184 = vector.shape_cast %183 : vector<1x8x32xf32> to vector<8x32xf32>
    %cst_148 = arith.constant dense<0.000000e+00> : vector<8x32xf32>
    %185 = tpu.matmul %182, %184, %cst_148 {dimension_numbers = #tpu.dot_dimension_numbers<[1], [0], [0], [1], [0, 0, 1, 1], [], []>} : vector<8x8xf32>, vector<8x32xf32>, vector<8x32xf32> -> vector<8x32xf32>
    %186 = arith.addf %141, %185 : vector<8x32xf32>
    %c0_149 = arith.constant 0 : index
    %c0_150 = arith.constant 0 : index
    %187 = vector.load %arg12[%c0_149, %c0_150] : memref<1x32xf32, #tpu.memory_space<vmem>>, vector<1x32xf32>
    %188 = vector.broadcast %187 : vector<1x32xf32> to vector<8x32xf32>
    %189 = arith.addf %186, %188 : vector<8x32xf32>
    %190 = arith.addf %189, %1 : vector<8x32xf32>
    %cst_151 = arith.constant dense<0.000000e+00> : vector<8xf32>
    %191 = vector.multi_reduction <add>, %190, %cst_151 [1] : vector<8x32xf32> to vector<8xf32>
    %192 = vector.shape_cast %191 : vector<8xf32> to vector<8x1xf32>
    %cst_152 = arith.constant 3.200000e+01 : f32
    %193 = vector.broadcast %cst_152 : f32 to vector<8x1xf32>
    %194 = arith.divf %192, %193 : vector<8x1xf32>
    %195 = vector.broadcast %194 : vector<8x1xf32> to vector<8x32xf32>
    %196 = arith.subf %190, %195 : vector<8x32xf32>
    %197 = arith.mulf %196, %196 : vector<8x32xf32>
    %cst_153 = arith.constant dense<0.000000e+00> : vector<8xf32>
    %198 = vector.multi_reduction <add>, %197, %cst_153 [1] : vector<8x32xf32> to vector<8xf32>
    %199 = vector.shape_cast %198 : vector<8xf32> to vector<8x1xf32>
    %cst_154 = arith.constant 3.200000e+01 : f32
    %200 = vector.broadcast %cst_154 : f32 to vector<8x1xf32>
    %201 = arith.divf %199, %200 : vector<8x1xf32>
    %202 = vector.broadcast %194 : vector<8x1xf32> to vector<8x32xf32>
    %203 = arith.subf %190, %202 : vector<8x32xf32>
    %cst_155 = arith.constant 9.99999974E-6 : f32
    %204 = vector.broadcast %cst_155 : f32 to vector<8x1xf32>
    %205 = arith.addf %201, %204 : vector<8x1xf32>
    %206 = math.rsqrt %205 : vector<8x1xf32>
    %207 = vector.broadcast %206 : vector<8x1xf32> to vector<8x32xf32>
    %208 = arith.mulf %203, %207 : vector<8x32xf32>
    %c0_156 = arith.constant 0 : index
    %c0_157 = arith.constant 0 : index
    %209 = vector.load %arg13[%c0_156, %c0_157] : memref<1x32xf32, #tpu.memory_space<vmem>>, vector<1x32xf32>
    %210 = vector.broadcast %209 : vector<1x32xf32> to vector<8x32xf32>
    %211 = arith.mulf %208, %210 : vector<8x32xf32>
    %c0_158 = arith.constant 0 : index
    %c0_159 = arith.constant 0 : index
    %212 = vector.load %arg14[%c0_158, %c0_159] : memref<1x32xf32, #tpu.memory_space<vmem>>, vector<1x32xf32>
    %213 = vector.broadcast %212 : vector<1x32xf32> to vector<8x32xf32>
    %214 = arith.addf %211, %213 : vector<8x32xf32>
    %c0_160 = arith.constant 0 : index
    %c0_161 = arith.constant 0 : index
    %c0_162 = arith.constant 0 : index
    %215 = vector.load %arg4[%c0_160, %c0_161, %c0_162] : memref<1x8x1xf32, #tpu.memory_space<vmem>>, vector<1x8x1xf32>
    %216 = vector.shape_cast %215 : vector<1x8x1xf32> to vector<8x1xf32>
    %217 = vector.broadcast %216 : vector<8x1xf32> to vector<8x32xf32>
    %218 = arith.mulf %214, %217 : vector<8x32xf32>
    %c0_163 = arith.constant 0 : index
    %c0_164 = arith.constant 0 : index
    %c0_165 = arith.constant 0 : index
    %219 = vector.load %arg15[%c0_163, %c0_164, %c0_165] : memref<1x8x32xf32, #tpu.memory_space<vmem>>, vector<1x8x32xf32>
    %220 = vector.shape_cast %219 : vector<1x8x32xf32> to vector<8x32xf32>
    %221 = vector.shape_cast %218 : vector<8x32xf32> to vector<1x8x32xf32>
    tpu.vector_store %arg15[%c0_163, %c0_164, %c0_165], %221 {strides = array<i32>} : memref<1x8x32xf32, #tpu.memory_space<vmem>>, vector<1x8x32xf32>,
    return
  }
  func.func @transform_0(%arg0: i32) -> (i32, i32, i32) {
    %c0_i32 = arith.constant 0 : i32
    %c0_i32_0 = arith.constant 0 : i32
    %c0_i32_1 = arith.constant 0 : i32
    return %arg0, %c0_i32, %c0_i32_0 : i32, i32, i32
  }
  func.func @transform_1(%arg0: i32) -> (i32, i32, i32) {
    %c0_i32 = arith.constant 0 : i32
    %c0_i32_0 = arith.constant 0 : i32
    %c0_i32_1 = arith.constant 0 : i32
    return %arg0, %c0_i32, %c0_i32_0 : i32, i32, i32
  }
  func.func @transform_2(%arg0: i32) -> (i32, i32, i32) {
    %c0_i32 = arith.constant 0 : i32
    %c0_i32_0 = arith.constant 0 : i32
    %c0_i32_1 = arith.constant 0 : i32
    return %arg0, %c0_i32, %c0_i32_0 : i32, i32, i32
  }
  func.func @transform_3(%arg0: i32) -> (i32, i32, i32) {
    %c0_i32 = arith.constant 0 : i32
    %c0_i32_0 = arith.constant 0 : i32
    %c0_i32_1 = arith.constant 0 : i32
    return %arg0, %c0_i32, %c0_i32_0 : i32, i32, i32
  }
  func.func @transform_4(%arg0: i32) -> (i32, i32, i32) {
    %c0_i32 = arith.constant 0 : i32
    %c0_i32_0 = arith.constant 0 : i32
    %c0_i32_1 = arith.constant 0 : i32
    %c0_i32_2 = arith.constant 0 : i32
    return %c0_i32, %c0_i32_0, %c0_i32_1 : i32, i32, i32
  }
  func.func @transform_5(%arg0: i32) -> (i32, i32, i32) {
    %c0_i32 = arith.constant 0 : i32
    %c0_i32_0 = arith.constant 0 : i32
    %c0_i32_1 = arith.constant 0 : i32
    %c0_i32_2 = arith.constant 0 : i32
    return %c0_i32, %c0_i32_0, %c0_i32_1 : i32, i32, i32
  }
  func.func @transform_6(%arg0: i32) -> (i32, i32, i32) {
    %c0_i32 = arith.constant 0 : i32
    %c0_i32_0 = arith.constant 0 : i32
    %c0_i32_1 = arith.constant 0 : i32
    %c0_i32_2 = arith.constant 0 : i32
    return %c0_i32, %c0_i32_0, %c0_i32_1 : i32, i32, i32
  }
  func.func @transform_7(%arg0: i32) -> (i32, i32, i32) {
    %c0_i32 = arith.constant 0 : i32
    %c0_i32_0 = arith.constant 0 : i32
    %c0_i32_1 = arith.constant 0 : i32
    %c0_i32_2 = arith.constant 0 : i32
    return %c0_i32, %c0_i32_0, %c0_i32_1 : i32, i32, i32
  }
  func.func @transform_8(%arg0: i32) -> (i32, i32, i32) {
    %c0_i32 = arith.constant 0 : i32
    %c0_i32_0 = arith.constant 0 : i32
    %c0_i32_1 = arith.constant 0 : i32
    %c0_i32_2 = arith.constant 0 : i32
    return %c0_i32, %c0_i32_0, %c0_i32_1 : i32, i32, i32
  }
  func.func @transform_9(%arg0: i32) -> (i32, i32, i32) {
    %c0_i32 = arith.constant 0 : i32
    %c0_i32_0 = arith.constant 0 : i32
    %c0_i32_1 = arith.constant 0 : i32
    %c0_i32_2 = arith.constant 0 : i32
    return %c0_i32, %c0_i32_0, %c0_i32_1 : i32, i32, i32
  }
  func.func @transform_10(%arg0: i32) -> (i32, i32, i32) {
    %c0_i32 = arith.constant 0 : i32
    %c0_i32_0 = arith.constant 0 : i32
    %c0_i32_1 = arith.constant 0 : i32
    %c0_i32_2 = arith.constant 0 : i32
    return %c0_i32, %c0_i32_0, %c0_i32_1 : i32, i32, i32
  }
  func.func @transform_11(%arg0: i32) -> (i32, i32) {
    %c0_i32 = arith.constant 0 : i32
    %c0_i32_0 = arith.constant 0 : i32
    %c0_i32_1 = arith.constant 0 : i32
    return %c0_i32, %c0_i32_0 : i32, i32
  }
  func.func @transform_12(%arg0: i32) -> (i32, i32) {
    %c0_i32 = arith.constant 0 : i32
    %c0_i32_0 = arith.constant 0 : i32
    %c0_i32_1 = arith.constant 0 : i32
    return %c0_i32, %c0_i32_0 : i32, i32
  }
  func.func @transform_13(%arg0: i32) -> (i32, i32) {
    %c0_i32 = arith.constant 0 : i32
    %c0_i32_0 = arith.constant 0 : i32
    %c0_i32_1 = arith.constant 0 : i32
    return %c0_i32, %c0_i32_0 : i32, i32
  }
  func.func @transform_14(%arg0: i32) -> (i32, i32, i32) {
    %c0_i32 = arith.constant 0 : i32
    %c0_i32_0 = arith.constant 0 : i32
    %c0_i32_1 = arith.constant 0 : i32
    return %arg0, %c0_i32, %c0_i32_0 : i32, i32, i32
  }
  func.func @transform_15(%arg0: i32) -> (i32, i32, i32, i32) {
    %c0_i32 = arith.constant 0 : i32
    %c0_i32_0 = arith.constant 0 : i32
    %c0_i32_1 = arith.constant 0 : i32
    %c0_i32_2 = arith.constant 0 : i32
    return %c0_i32, %arg0, %c0_i32_0, %c0_i32_1 : i32, i32, i32, i32
  }
}

module attributes {stable_mosaic.version = 11 : i64} {
  func.func @ffn_ln_kernel(%arg0: i32, %arg1: memref<16x32xf32, #tpu.memory_space<vmem>>, %arg2: memref<16x1xf32, #tpu.memory_space<vmem>>, %arg3: memref<32x64xf32, #tpu.memory_space<vmem>>, %arg4: memref<1x64xf32, #tpu.memory_space<vmem>>, %arg5: memref<64x32xf32, #tpu.memory_space<vmem>>, %arg6: memref<1x32xf32, #tpu.memory_space<vmem>>, %arg7: memref<1x32xf32, #tpu.memory_space<vmem>>, %arg8: memref<1x32xf32, #tpu.memory_space<vmem>>, %arg9: memref<16x32xf32, #tpu.memory_space<vmem>>) attributes {dimension_semantics = [#tpu.dimension_semantics<parallel>], iteration_bounds = array<i64: 1>, scalar_prefetch = 0 : i64, scratch_operands = 0 : i64, tpu.core_type = #tpu.core_type<tc>, window_params = [{transform_indices = @transform_0, window_bounds = array<i64: 16, 32>}, {transform_indices = @transform_1, window_bounds = array<i64: 16, 1>}, {pipeline_mode = #tpu.pipeline_mode<synchronous>, transform_indices = @transform_2, window_bounds = array<i64: 32, 64>}, {pipeline_mode = #tpu.pipeline_mode<synchronous>, transform_indices = @transform_3, window_bounds = array<i64: 1, 64>}, {pipeline_mode = #tpu.pipeline_mode<synchronous>, transform_indices = @transform_4, window_bounds = array<i64: 64, 32>}, {pipeline_mode = #tpu.pipeline_mode<synchronous>, transform_indices = @transform_5, window_bounds = array<i64: 1, 32>}, {pipeline_mode = #tpu.pipeline_mode<synchronous>, transform_indices = @transform_6, window_bounds = array<i64: 1, 32>}, {pipeline_mode = #tpu.pipeline_mode<synchronous>, transform_indices = @transform_7, window_bounds = array<i64: 1, 32>}, {transform_indices = @transform_8, window_bounds = array<i64: 16, 32>}]} {
    %c0 = arith.constant 0 : index
    %c0_0 = arith.constant 0 : index
    %0 = vector.load %arg1[%c0, %c0_0] : memref<16x32xf32, #tpu.memory_space<vmem>>, vector<16x32xf32>
    %c0_1 = arith.constant 0 : index
    %c0_2 = arith.constant 0 : index
    %1 = vector.load %arg3[%c0_1, %c0_2] : memref<32x64xf32, #tpu.memory_space<vmem>>, vector<32x64xf32>
    %cst = arith.constant dense<0.000000e+00> : vector<16x64xf32>
    %2 = tpu.matmul %0, %1, %cst {dimension_numbers = #tpu.dot_dimension_numbers<[1], [0], [0], [1], [0, 0, 1, 1], [], []>} : vector<16x32xf32>, vector<32x64xf32>, vector<16x64xf32> -> vector<16x64xf32>
    %c0_3 = arith.constant 0 : index
    %c0_4 = arith.constant 0 : index
    %3 = vector.load %arg4[%c0_3, %c0_4] : memref<1x64xf32, #tpu.memory_space<vmem>>, vector<1x64xf32>
    %4 = vector.broadcast %3 : vector<1x64xf32> to vector<16x64xf32>
    %5 = arith.addf %2, %4 : vector<16x64xf32>
    %cst_5 = arith.constant 0.000000e+00 : f32
    %6 = vector.broadcast %cst_5 : f32 to vector<16x64xf32>
    %7 = arith.maximumf %5, %6 : vector<16x64xf32>
    %c0_6 = arith.constant 0 : index
    %c0_7 = arith.constant 0 : index
    %8 = vector.load %arg5[%c0_6, %c0_7] : memref<64x32xf32, #tpu.memory_space<vmem>>, vector<64x32xf32>
    %cst_8 = arith.constant dense<0.000000e+00> : vector<16x32xf32>
    %9 = tpu.matmul %7, %8, %cst_8 {dimension_numbers = #tpu.dot_dimension_numbers<[1], [0], [0], [1], [0, 0, 1, 1], [], []>} : vector<16x64xf32>, vector<64x32xf32>, vector<16x32xf32> -> vector<16x32xf32>
    %c0_9 = arith.constant 0 : index
    %c0_10 = arith.constant 0 : index
    %10 = vector.load %arg6[%c0_9, %c0_10] : memref<1x32xf32, #tpu.memory_space<vmem>>, vector<1x32xf32>
    %11 = vector.broadcast %10 : vector<1x32xf32> to vector<16x32xf32>
    %12 = arith.addf %9, %11 : vector<16x32xf32>
    %13 = arith.addf %12, %0 : vector<16x32xf32>
    %cst_11 = arith.constant dense<0.000000e+00> : vector<16xf32>
    %14 = vector.multi_reduction <add>, %13, %cst_11 [1] : vector<16x32xf32> to vector<16xf32>
    %15 = vector.shape_cast %14 : vector<16xf32> to vector<16x1xf32>
    %cst_12 = arith.constant 3.200000e+01 : f32
    %16 = vector.broadcast %cst_12 : f32 to vector<16x1xf32>
    %17 = arith.divf %15, %16 : vector<16x1xf32>
    %18 = vector.broadcast %17 : vector<16x1xf32> to vector<16x32xf32>
    %19 = arith.subf %13, %18 : vector<16x32xf32>
    %20 = arith.mulf %19, %19 : vector<16x32xf32>
    %cst_13 = arith.constant dense<0.000000e+00> : vector<16xf32>
    %21 = vector.multi_reduction <add>, %20, %cst_13 [1] : vector<16x32xf32> to vector<16xf32>
    %22 = vector.shape_cast %21 : vector<16xf32> to vector<16x1xf32>
    %cst_14 = arith.constant 3.200000e+01 : f32
    %23 = vector.broadcast %cst_14 : f32 to vector<16x1xf32>
    %24 = arith.divf %22, %23 : vector<16x1xf32>
    %25 = vector.broadcast %17 : vector<16x1xf32> to vector<16x32xf32>
    %26 = arith.subf %13, %25 : vector<16x32xf32>
    %cst_15 = arith.constant 9.99999974E-6 : f32
    %27 = vector.broadcast %cst_15 : f32 to vector<16x1xf32>
    %28 = arith.addf %24, %27 : vector<16x1xf32>
    %29 = math.rsqrt %28 : vector<16x1xf32>
    %30 = vector.broadcast %29 : vector<16x1xf32> to vector<16x32xf32>
    %31 = arith.mulf %26, %30 : vector<16x32xf32>
    %c0_16 = arith.constant 0 : index
    %c0_17 = arith.constant 0 : index
    %32 = vector.load %arg7[%c0_16, %c0_17] : memref<1x32xf32, #tpu.memory_space<vmem>>, vector<1x32xf32>
    %33 = vector.broadcast %32 : vector<1x32xf32> to vector<16x32xf32>
    %34 = arith.mulf %31, %33 : vector<16x32xf32>
    %c0_18 = arith.constant 0 : index
    %c0_19 = arith.constant 0 : index
    %35 = vector.load %arg8[%c0_18, %c0_19] : memref<1x32xf32, #tpu.memory_space<vmem>>, vector<1x32xf32>
    %36 = vector.broadcast %35 : vector<1x32xf32> to vector<16x32xf32>
    %37 = arith.addf %34, %36 : vector<16x32xf32>
    %c0_20 = arith.constant 0 : index
    %c0_21 = arith.constant 0 : index
    %38 = vector.load %arg2[%c0_20, %c0_21] : memref<16x1xf32, #tpu.memory_space<vmem>>, vector<16x1xf32>
    %39 = vector.broadcast %38 : vector<16x1xf32> to vector<16x32xf32>
    %40 = arith.mulf %37, %39 : vector<16x32xf32>
    %c0_22 = arith.constant 0 : index
    %c0_23 = arith.constant 0 : index
    %41 = vector.load %arg9[%c0_22, %c0_23] : memref<16x32xf32, #tpu.memory_space<vmem>>, vector<16x32xf32>
    tpu.vector_store %arg9[%c0_22, %c0_23], %40 {strides = array<i32>} : memref<16x32xf32, #tpu.memory_space<vmem>>, vector<16x32xf32>,
    return
  }
  func.func @transform_0(%arg0: i32) -> (i32, i32) {
    %c0_i32 = arith.constant 0 : i32
    %c0_i32_0 = arith.constant 0 : i32
    return %arg0, %c0_i32 : i32, i32
  }
  func.func @transform_1(%arg0: i32) -> (i32, i32) {
    %c0_i32 = arith.constant 0 : i32
    %c0_i32_0 = arith.constant 0 : i32
    return %arg0, %c0_i32 : i32, i32
  }
  func.func @transform_2(%arg0: i32) -> (i32, i32) {
    %c0_i32 = arith.constant 0 : i32
    %c0_i32_0 = arith.constant 0 : i32
    %c0_i32_1 = arith.constant 0 : i32
    return %c0_i32, %c0_i32_0 : i32, i32
  }
  func.func @transform_3(%arg0: i32) -> (i32, i32) {
    %c0_i32 = arith.constant 0 : i32
    %c0_i32_0 = arith.constant 0 : i32
    %c0_i32_1 = arith.constant 0 : i32
    return %c0_i32, %c0_i32_0 : i32, i32
  }
  func.func @transform_4(%arg0: i32) -> (i32, i32) {
    %c0_i32 = arith.constant 0 : i32
    %c0_i32_0 = arith.constant 0 : i32
    %c0_i32_1 = arith.constant 0 : i32
    return %c0_i32, %c0_i32_0 : i32, i32
  }
  func.func @transform_5(%arg0: i32) -> (i32, i32) {
    %c0_i32 = arith.constant 0 : i32
    %c0_i32_0 = arith.constant 0 : i32
    %c0_i32_1 = arith.constant 0 : i32
    return %c0_i32, %c0_i32_0 : i32, i32
  }
  func.func @transform_6(%arg0: i32) -> (i32, i32) {
    %c0_i32 = arith.constant 0 : i32
    %c0_i32_0 = arith.constant 0 : i32
    %c0_i32_1 = arith.constant 0 : i32
    return %c0_i32, %c0_i32_0 : i32, i32
  }
  func.func @transform_7(%arg0: i32) -> (i32, i32) {
    %c0_i32 = arith.constant 0 : i32
    %c0_i32_0 = arith.constant 0 : i32
    %c0_i32_1 = arith.constant 0 : i32
    return %c0_i32, %c0_i32_0 : i32, i32
  }
  func.func @transform_8(%arg0: i32) -> (i32, i32) {
    %c0_i32 = arith.constant 0 : i32
    %c0_i32_0 = arith.constant 0 : i32
    return %arg0, %c0_i32 : i32, i32
  }
}

</mosaic_0001>

<bundles_post_ra>
// kernel: decoder_layer.5
= control target key start
LH: loop header
LB: loop body
LE: loop exit
PB: predicated region body
PF: predicated region fallthrough
CT: control target
= control target key end

     0   :  { %vm43_vm0 = vcmask 261120   ;;  %s509_s0 = inlined_call_operand.vmem [shape: f32[16,32], index: 0, kind: input, shape index: {}]   ;;  %s510_s1 = inlined_call_operand.vmem [shape: f32[16,1], index: 1, kind: input, shape index: {}]   ;;  %s511_s2 = inlined_call_operand.vmem [shape: f32[32,64], index: 2, kind: input, shape index: {}]   ;;  %s512_s3 = inlined_call_operand.vmem [shape: f32[1,64], index: 3, kind: input, shape index: {}]   ;;  %s513_s4 = inlined_call_operand.vmem [shape: f32[64,32], index: 4, kind: input, shape index: {}]   ;;  %s514_s5 = inlined_call_operand.vmem [shape: f32[1,32], index: 5, kind: input, shape index: {}]   ;;  %s515_s6 = inlined_call_operand.vmem [shape: f32[1,32], index: 6, kind: input, shape index: {}]   ;;  %s516_s7 = inlined_call_operand.vmem [shape: f32[1,32], index: 7, kind: input, shape index: {}]   ;;  %s517_s8 = inlined_call_operand.hbm [shape: f32[16,32], index: 8, kind: output, shape index: {}]  }
   0x1   :  { %v35_v0 = vld [vmem:[%s511_s2 + $0x18] sm:$0xff]  ;;  %v34_v1 = vld [vmem:[%s511_s2 + $0x10] sm:$0xff]  ;;  %v30_v2 = vld [vmem:[%s509_s0] sm:$0xff] }
   0x2   :  { %327 = vmatprep.subr.mxu0 %v35_v0  ;;  %v33_v3 = vld [vmem:[%s511_s2 + $0x8] sm:$0xff]  ;;  %335 = vmatprep.mubr.msk.f32.mxu0 %vm43_vm0, %v30_v2  ;;  %v134_v4 = vld [vmem:[%s513_s4 + $0x38] sm:$0xff]  ;;  %v133_v5 = vld [vmem:[%s513_s4 + $0x30] sm:$0xff] }
   0x3   :  { %328 = vmatpush3.msra.mxu0 %v35_v0  ;;  %338 = vmatprep.subr.mxu1 %v134_v4 }
   0x4   :  { %329 = vmatprep.subr.mxu0 %v34_v1 }
   0x5   :  { %13 = vsyncpa [#allocation3], 0  ;;  %330 = vmatpush3.msra.mxu0 %v34_v1  ;;  %v32_v6 = vld [vmem:[%s511_s2] sm:$0xff]  ;;  %339 = vmatpush3.msra.mxu1 %v134_v4  ;;  %v132_v7 = vld [vmem:[%s513_s4 + $0x28] sm:$0xff]  ;;  %vm142_vm1 = vcmask 523264   ;;  %v389_v30 = vmov 0  }
   0x6   :  { %331 = vmatprep.subr.mxu0 %v33_v3  ;;  %340 = vmatprep.subr.mxu1 %v133_v5  ;;  %v31_v8 = vld [vmem:[%s509_s0 + $0x8] sm:$0xff]  ;;  %v131_v9 = vld [vmem:[%s513_s4 + $0x20] sm:$0xff]  ;;  %v130_v10 = vld [vmem:[%s513_s4 + $0x18] sm:$0xff] }
   0x7   :  { %332 = vmatpush3.msra.mxu0 %v33_v3  ;;  %341 = vmatpush3.msra.mxu1 %v133_v5  ;;  %v129_v11 = vld [vmem:[%s513_s4 + $0x10] sm:$0xff]  ;;  %v128_v12 = vld [vmem:[%s513_s4 + $0x8] sm:$0xff]  ;;  %v127_v13 = vld [vmem:[%s513_s4] sm:$0xff] }
   0x8   :  { %333 = vmatprep.subr.mxu0 %v32_v6  ;;  %342 = vmatprep.subr.mxu1 %v132_v7  ;;  %v303_v14 = vld [vmem:[%s512_s3] ss:$0 sm:$0xff]  ;;  %v272_v42 = vld [vmem:[%s510_s1 + $0x8] sm:$0xff] }
   0x9   :  { %334 = vmatpush3.msra.mxu0 %v32_v6  ;;  %343 = vmatpush3.msra.mxu1 %v132_v7  ;;  %v306_v22 = vld [vmem:[%s514_s5] ss:$0 sm:$0xff] }
   0xa   :  { %336 = vmatmul.mubr.msk.f32.vlgmr.msra.gmra.mxu0 %vm43_vm0, %v31_v8  ;;  %344 = vmatprep.subr.mxu1 %v131_v9  ;;  %v271_v31 = vld [vmem:[%s510_s1] sm:$0xff]  ;;  %s390_s1 = smov [#allocation2]  }
   0xb   :  { %345 = vmatpush3.msra.mxu1 %v131_v9  ;;  %362 = vset.pattern.permute.xlu1 %v389_v30  ;;  %v309_v50 = vld [vmem:[%s515_s6] ss:$0 sm:$0xff]  ;;  %s292_s18 = sshll.u32 %s390_s1, 4  ;;  %s293_s18 = int_to_ptr.vmem [resolvable:$true] %s292_s18 }
   0xc   :  { %346 = vmatprep.subr.mxu1 %v130_v10  ;;  %361 = vset.pattern.permute.xlu0 %v389_v30  ;;  %v310_v52 = vld [vmem:[%s516_s7] ss:$0 sm:$0xff]  ;;  %s367_s6 = scalar_lea.vmem %s293_s18, 256  ;;  %p372_p1 = scmp.lt.s32.totalorder %s293_s18, %s293_s18 }
   0xd   :  { %347 = vmatpush3.msra.mxu1 %v130_v10  ;;  %p368_p0 = scmp.ne.s32.totalorder %s293_s18, %s367_s6  ;;  %p373_p2 = scmp.lt.s32.totalorder %s367_s6, %s367_s6 }
   0xe   :  { %348 = vmatprep.subr.mxu1 %v129_v11 }
   0xf   :  { %349 = vmatpush3.msra.mxu1 %v129_v11  ;;  %p374_p3 = por %p373_p2, %p372_p1 }
  0x10   :  { %350 = vmatprep.subr.mxu1 %v128_v12 }
  0x11   :  { %351 = vmatpush3.msra.mxu1 %v128_v12  ;;  %p375_p4 = pnand %p374_p3, %p368_p0 }
  0x12   :  { %352 = vmatprep.subr.mxu1 %v127_v13 }
  0x13   :  { %353 = vmatpush3.msra.mxu1 %v127_v13 }
  0xca   :  { %v337_v15 = vpop.f32.mrf.mxu0 }
  0xcb   :  { %v122_v16 = vadd.f32 %v337_v15, %v303_v14 }
  0xcc   :  { %v116_v17 = vpop.f32.mrf.mxu0 }
  0xcd   :  { %v117_v18 = vadd.f32 %v303_v14, %v116_v17  ;;  %v126_v20 = vmax.f32 %v122_v16, 0.0 }
  0xcf   :  { %v125_v19 = vmax.f32 %v117_v18, 0.0 }
  0xd1   :  { %354 = vmatprep.mubr.msk.f32.mxu1 %vm142_vm1, %v125_v19 }
  0xd2   :  { %355 = vmatmul.mubr.msk.f32.vlgmr.msra.gmra.mxu1 %vm142_vm1, %v126_v20 }
 0x192   :  { %v356_v21 = vpop.f32.mrf.mxu1 }
 0x193   :  { %v221_v24 = vadd.f32 %v356_v21, %v306_v22 }
 0x194   :  { %v215_v23 = vpop.f32.mrf.mxu1 }
 0x195   :  { %v216_v25 = vadd.f32 %v306_v22, %v215_v23  ;;  %v225_v28 = vadd.f32 %v221_v24, %v31_v8 }
 0x197   :  { %v224_v26 = vadd.f32 %v216_v25, %v30_v2  ;;  %v229_v29 = vsel %vm43_vm0, %v225_v28, 0.0 }
 0x199   :  { %v226_v27 = vsel %vm43_vm0, %v224_v26, 0.0 }
 0x19a   :  { %227 = vadd.xlane.f32.xlu0 %v226_v27 }
 0x19e   :  { %230 = vadd.xlane.f32.xlu0 %v229_v29 }
 0x1b4   :  { %275 = vperm.xlu0 %361, %v271_v31  }
 0x223   :  { %v228_v32 = vpop.xlane.xlu0 %227 }
 0x224   :  { %v233_v33 = vmul.f32 0.03125, %v228_v32 }
 0x226   :  { %v235_v36 = vsub.f32 %v224_v26, %v233_v33 }
 0x227   :  { %v231_v34 = vpop.xlane.xlu0 %230 }
 0x228   :  { %v234_v35 = vmul.f32 0.03125, %v231_v34  ;;  %v237_v40 = vmul.f32 %v235_v36, %v235_v36 }
 0x22a   :  { %v236_v37 = vsub.f32 %v225_v28, %v234_v35  ;;  %v239_v41 = vsel %vm43_vm0, %v237_v40, 0.0 }
 0x22c   :  { %v238_v38 = vmul.f32 %v236_v37, %v236_v37 }
 0x22e   :  { %v242_v39 = vsel %vm43_vm0, %v238_v38, 0.0 }
 0x22f   :  { %243 = vadd.xlane.f32.xlu1 %v242_v39  ;;  %v276_v60 = vpop.permute.xlu0 %275 }
 0x233   :  { %240 = vadd.xlane.f32.xlu1 %v239_v41 }
 0x244   :  { %280 = vperm.xlu1 %362, %v272_v42  }
 0x2b8   :  { %v244_v43 = vpop.xlane.xlu1 %243 }
 0x2b9   :  { %v246_v44 = vmul.f32 0.03125, %v244_v43 }
 0x2bb   :  { %v248_v45 = vadd.f32 1e-05, %v246_v44 }
 0x2bc   :  { %v241_v46 = vpop.xlane.xlu1 %240 }
 0x2bd   :  { %363 = vrsqrt.f32 %v248_v45  ;;  %v245_v47 = vmul.f32 0.03125, %v241_v46 }
 0x2bf   :  { %v247_v48 = vadd.f32 1e-05, %v245_v47 }
 0x2c0   :  { %v281_v55 = vpop.permute.xlu1 %280 }
 0x2c1   :  { %365 = vrsqrt.f32 %v247_v48 }
 0x2ca   :  { %v364_v49 = vpop.eup %363 }
 0x2cb   :  { %v252_v51 = vmul.f32 %v364_v49, %v236_v37 }
 0x2cd   :  { %v261_v53 = vmul.f32 %v309_v50, %v252_v51 }
 0x2ce   :  { %v366_v54 = vpop.eup %365 }
 0x2cf   :  { %v270_v56 = vadd.f32 %v310_v52, %v261_v53  ;;  %v251_v57 = vmul.f32 %v366_v54, %v235_v36 }
 0x2d1   :  { %v284_v58 = vmul.f32 %v281_v55, %v270_v56  ;;  %v260_v59 = vmul.f32 %v309_v50, %v251_v57 }
 0x2d3   :  { %286 = vst.msk [vmem:[#allocation2 + $0x8] sm:$0xff] %vm43_vm0, %v284_v58  ;;  %v269_v61 = vadd.f32 %v310_v52, %v260_v59 }
 0x2d5   :  { %v283_v62 = vmul.f32 %v276_v60, %v269_v61 }
 0x2d7   :  { %285 = vst.msk [vmem:[#allocation2] sm:$0xff] %vm43_vm0, %v283_v62 }
 0x2d8   :  { %378 = shalt.err (!%p375_p4)
}
 0x2d9   :  { %s391_s7 = smov 128   ;;  %s392_s19 = smov 8  }
 0x2da   :  { %298 = dma.vmem_to_hbm [thread:$0]  %s293_s18, 256, %s517_s8, [#allocation3], %s391_s7, %s391_s7, %s392_s19  }
 0x2db   :  { %387 = dma.done.wait [#allocation3], 256  }
 0x2dc   :  { %388 = vsyncadd [#allocation3], 4294967040 }
 0x2dd   :  { %302 = vsyncpa [#allocation3], 1 }

// kernel: decoder_layer.3
= control target key start
LH: loop header
LB: loop body
LE: loop exit
PB: predicated region body
PF: predicated region fallthrough
CT: control target
= control target key end

     0   :  { %s3815_s0 = inlined_call_operand.vmem [shape: f32[2,8,32], index: 0, kind: input, shape index: {}, may-alias: {0,1}]   ;;  %s3816_s1 = inlined_call_operand.vmem [shape: f32[2,8,32], index: 1, kind: input, shape index: {}, may-alias: {0,1}]   ;;  %s3817_s2 = inlined_call_operand.vmem [shape: f32[2,8,8], index: 2, kind: input, shape index: {}]   ;;  %s3818_s3 = inlined_call_operand.vmem [shape: f32[2,8,1], index: 3, kind: input, shape index: {}]   ;;  %s3819_s4 = inlined_call_operand.vmem [shape: f32[4,32,8], index: 4, kind: input, shape index: {}]   ;;  %s3820_s5 = inlined_call_operand.vmem [shape: f32[4,1,8], index: 5, kind: input, shape index: {}]   ;;  %s3821_s6 = inlined_call_operand.vmem [shape: f32[4,32,8], index: 6, kind: input, shape index: {}]   ;;  %s3822_s7 = inlined_call_operand.vmem [shape: f32[4,1,8], index: 7, kind: input, shape index: {}]   ;;  %s3823_s8 = inlined_call_operand.vmem [shape: f32[4,32,8], index: 8, kind: input, shape index: {}]   ;;  %s3824_s9 = inlined_call_operand.vmem [shape: f32[4,1,8], index: 9, kind: input, shape index: {}]   ;;  %s3825_s10 = inlined_call_operand.vmem [shape: f32[4,8,32], index: 10, kind: input, shape index: {}]   ;;  %s3826_s11 = inlined_call_operand.vmem [shape: f32[1,32], index: 11, kind: input, shape index: {}]   ;;  %s3827_s12 = inlined_call_operand.vmem [shape: f32[1,32], index: 12, kind: input, shape index: {}]   ;;  %s3828_s13 = inlined_call_operand.vmem [shape: f32[1,32], index: 13, kind: input, shape index: {}]   ;;  %s3829_s14 = inlined_call_operand.vmem [shape: f32[2,8,32], index: 14, kind: output, shape index: {0}]   ;;  %s3830_s15 = inlined_call_operand.hbm [shape: f32[4,2,8,8], index: 15, kind: output, shape index: {1}]  }
   0x1   :  { %3836 = sst [smem:[#allocation10_spill]] %s3815_s0 }
   0x2   :  { %21 = vsyncpa [#allocation3], 0 }
   0x3   :  { %23 = vsyncpa [#allocation3 + $0x1], 0  ;;  %s3297_s18 = smov 0   ;;  %s3299_s19 = smov 0  }
   0x4   :  { %s3301_s20 = smov 0   ;;  %s3303_s21 = smov 0  }
   0x5 LB: > { %3837 = sst [smem:[#allocation5_spill]] %s3196_s18  ;;  %s3318_s22 = sadd.s32 4294967295, %s3208_s21   ;;  %s3208_s21 = sphi %s3303_s21, %s3847_s21   ;;  %s3204_s20 = sphi %s3301_s20, %s3849_s20   ;;  %s3200_s19 = sphi %s3299_s19, %s3851_s19   ;;  %s3196_s18 = sphi %s3297_s18, %s3850_s18  }
   0x6   : > { %3838 = sst [smem:[#allocation6_spill]] %s3204_s20  ;;  %s2700_s23 = sadd.s32 4294967294, %s3208_s21  }
   0x7   : > { %s3322_s24 = sadd.s32 1, %s3208_s21   ;;  %s376_s25 = sadd.s32 1, %s3204_s20 }
   0x8   : > { %3839 = sst [smem:[#allocation7_spill]] %s3322_s24  ;;  %s373_s26 = ssub.s32 %s3208_s21, %s3322_s24 }
   0x9   : > { %p386_p0 = scmp.ne.s32.totalorder %s3204_s20, %s3200_s19  ;;  %p374_p1 = scmp.eq.s32.totalorder %s373_s26, 0 }
   0xa   : > { %p387_p2 = scmp.eq.s32.totalorder %s3318_s22, 1  ;;  %p392_p3 = scmp.ne.s32.totalorder %s3200_s19, %s3196_s18 }
   0xb   : > { %p393_p4 = scmp.eq.s32.totalorder %s2700_s23, 1  ;;  %p2703_p7 = scmp.ge.s32.totalorder %s3208_s21, 1 }
   0xc   : > { %s3333_s27 = scalar_select %p374_p1, %s3204_s20, %s376_s25  }
   0xd   : > { %p3335_p5 = por %p387_p2, %p386_p0  ;;  %p3339_p6 = por %p393_p4, %p392_p3 }
   0xe   : > { %3840 = sst [smem:[#allocation8_spill]] %s3333_s27  ;;  %p469_p8 = scmp.lt.s32.totalorder %s3208_s21, 3 }
   0xf   : > { %s3842_s29 = scalar_select %p3339_p6, 1, 0 }
  0x10   : > { %p470_p9 = pnand %p2703_p7, %p469_p8 }
  0x11   : > { %3843 = sst [smem:[#allocation9_spill]] %s3842_s29  ;;  %p532_p10 = scmp.lt.s32.totalorder (!%p470_p9), %s3318_s22, 1 }
  0x12   : > { %473 = sbr.rel (%p470_p9) target bundleno = 3967 (0xf7f), region = 76  ;;  %s3844_s0 = sld [smem:[#allocation10_spill]] (!%p470_p9) }
  0x13   : > { %s529_s16 = sand.u32 (!%p470_p9), 1, %s3200_s19  }
  0x14   : > { %s3764_s20 = scalar_lea.sflag (!%p470_p9), [#allocation3], %s529_s16 }
  0x17   : > { %v643_v0 = vld [vmem:[%s3821_s6 + $0x18] sm:$0xff]  ;;  %v3210_v2 = vmov 0.0   ;;  %v642_v3 = vld [vmem:[%s3821_s6 + $0x10] sm:$0xff]  ;;  %s533_s30 = scalar_select %p532_p10, %s3318_s22, 1  ;;  %v641_v5 = vld [vmem:[%s3821_s6 + $0x8] sm:$0xff]  ;;  %vm566_vm0 = vcmask 261120  }
  0x18   : > { %v558_v1 = vld [vmem:[%s3819_s4 + $0x18] sm:$0xff]  ;;  %2903 = vmatprep.subr.mxu1 %v3210_v2  ;;  %2892 = vmatprep.subr.mxu0 %v3210_v2  ;;  %v557_v4 = vld [vmem:[%s3819_s4 + $0x10] sm:$0xff]  ;;  %v556_v6 = vld [vmem:[%s3819_s4 + $0x8] sm:$0xff]  ;;  %vm3211_vm1 = vmmov 0   ;;  %vm805_vm2 = vcmask 64512  }
  0x19   : > { %2904 = vmatpush3.msra.mxu1 %v643_v0  ;;  %2893 = vmatpush3.msra.mxu0 %v558_v1  ;;  %s3369_s25 = sshll.u32 %s533_s30, 3  ;;  %v640_v7 = vld [vmem:[%s3821_s6] sm:$0xff]  ;;  %v727_v19 = vld [vmem:[%s3823_s8 + $0x18] sm:$0xff]  ;;  %v726_v20 = vld [vmem:[%s3823_s8 + $0x10] sm:$0xff] }
  0x1a   : > { %2905 = vmatprep.subr.mxu1 %v3210_v2  ;;  %2894 = vmatprep.subr.mxu0 %v3210_v2  ;;  %s539_s17 = scalar_lea.vmem %s3816_s1, %s3369_s25  ;;  %s535_s29 = scalar_lea.vmem %s3844_s0, %s3369_s25  ;;  %v555_v8 = vld [vmem:[%s3819_s4] sm:$0xff]  ;;  %v725_v21 = vld [vmem:[%s3823_s8 + $0x8] sm:$0xff]  ;;  %v2722_v38 = vld [vmem:[%s3819_s4 + $0x38] sm:$0xff] }
  0x1b   : > { %2906 = vmatpush3.msra.mxu1 %v642_v3  ;;  %2895 = vmatpush3.msra.mxu0 %v557_v4  ;;  %v3389_v9 = vld [vmem:[%s539_s17] sm:$0xff]  ;;  %s543_s26 = scalar_lea.vmem %s3817_s2, %s3369_s25  ;;  %v2721_v39 = vld [vmem:[%s3819_s4 + $0x30] sm:$0xff]  ;;  %v2720_v40 = vld [vmem:[%s3819_s4 + $0x28] sm:$0xff]  ;;  %s2704_s17 = sshll.u32 %s529_s16, 5 }
  0x1c   : > { %2907 = vmatprep.subr.mxu1 %v3210_v2  ;;  %2896 = vmatprep.subr.mxu0 %v3210_v2  ;;  %v3391_v10 = vld [vmem:[%s535_s29] sm:$0xff]  ;;  %v2729_v45 = vld [vmem:[%s3821_s6 + $0x38] sm:$0xff]  ;;  %s3479_s30 = scalar_lea.vmem [#allocation2], %s2704_s17  ;;  %v2728_v46 = vld [vmem:[%s3821_s6 + $0x30] sm:$0xff]  ;;  %s2805_s17 = sshll.u32 %s3318_s22, 7 }
  0x1d   : > { %2908 = vmatpush3.msra.mxu1 %v641_v5  ;;  %2897 = vmatpush3.msra.mxu0 %v556_v6  ;;  %v2712_v11 = vld [vmem:[%s3822_s7] ss:$0 sm:$0xff]  ;;  %v2727_v47 = vld [vmem:[%s3821_s6 + $0x28] sm:$0xff]  ;;  %v2731_v53 = vld [vmem:[%s3822_s7 + $0x1] ss:$0 sm:$0xff]  ;;  %s2578_s24 = sshll.u32 %s3479_s30, 4  ;;  %s3758_s29 = scalar_lea.hbm %s3830_s15, %s2805_s17  ;;  %s3760_s24 = int_to_ptr.vmem [resolvable:$true] %s2578_s24 }
  0x1e   : > { %2909 = vmatprep.subr.mxu1 %v3210_v2  ;;  %2898 = vmatprep.subr.mxu0 %v3210_v2  ;;  %v2710_v12 = vld [vmem:[%s3820_s5] ss:$0 sm:$0xff]  ;;  %v2724_v54 = vld [vmem:[%s3820_s5 + $0x1] ss:$0 sm:$0xff]  ;;  %v2736_v59 = vld [vmem:[%s3823_s8 + $0x38] sm:$0xff]  ;;  %s3148_s27 = scalar_lea.vmem %s3760_s24, 512 }
  0x1f   : > { %2910 = vmatpush3.msra.mxu1 %v640_v7  ;;  %2911 = vmatprep.mubr.msk.f32.mxu1 %vm3211_vm1, %v3210_v2  ;;  %v724_v22 = vld [vmem:[%s3823_s8] sm:$0xff]  ;;  %v2735_v60 = vld [vmem:[%s3823_s8 + $0x30] sm:$0xff]  ;;  %v2734_v61 = vld [vmem:[%s3823_s8 + $0x28] sm:$0xff]  ;;  %p3149_p11 = scmp.ne.s32.totalorder %s3760_s24, %s3148_s27  ;;  %s3213_s22 = smov [#allocation2]  }
  0x20   : > { %2899 = vmatpush3.msra.mxu0 %v555_v8  ;;  %2900 = vmatprep.mubr.msk.f32.mxu0 %vm3211_vm1, %v3210_v2  ;;  %v3442_v23 = vld [vmem:[%s543_s26] sm:$0xff]  ;;  %s547_s26 = scalar_lea.vmem %s3818_s3, %s3369_s25 }
  0x21   : > { %2912 = vmatmul.mubr.msk.f32.vlgmr.msra.gmra.mxu1 %vm566_vm0, %v3389_v9  ;;  %2901 = vmatmul.mubr.msk.f32.vlgmr.msra.gmra.mxu0 %vm566_vm0, %v3391_v10  ;;  %vm884_vm3 = vcmp.gt.f32.partialorder %v3442_v23, 0.0  ;;  %v2714_v34 = vld [vmem:[%s3824_s9] ss:$0 sm:$0xff]  ;;  %p3150_p12 = pnand %p3149_p11, %p3335_p5 }
  0x22   : > { %2925 = vmatprep.subr.mxu1 %v3210_v2  ;;  %2927 = vmatprep.mubr.msk.f32.mxu1 %vm3211_vm1, %v3210_v2  ;;  %v2719_v41 = vld [vmem:[%s3819_s4 + $0x20] sm:$0xff] }
  0x23   : > { %2914 = vmatprep.subr.mxu0 %v3210_v2  ;;  %2922 = vmatprep.mubr.msk.f32.mxu0 %vm3211_vm1, %v3210_v2  ;;  %v2726_v48 = vld [vmem:[%s3821_s6 + $0x20] sm:$0xff]  ;;  %p3151_p13 = pneg %p3150_p12 }
  0x24   : > { %2915 = vmatpush3.msra.mxu0 %v727_v19  ;;  %v2733_v62 = vld [vmem:[%s3823_s8 + $0x20] sm:$0xff] }
  0x25   : > { %2916 = vmatprep.subr.mxu0 %v3210_v2 }
  0x26   : > { %2917 = vmatpush3.msra.mxu0 %v726_v20  ;;  %v971_v20 = vld [vmem:[%s3825_s10] sm:$0xff] }
  0x27   : > { %2918 = vmatprep.subr.mxu0 %v3210_v2 }
  0x28   : > { %2919 = vmatpush3.msra.mxu0 %v725_v21  ;;  %v2757_v21 = vld [vmem:[%s3821_s6 + $0x58] sm:$0xff] }
  0x29   : > { %2920 = vmatprep.subr.mxu0 %v3210_v2 }
  0x2a   : > { %2921 = vmatpush3.msra.mxu0 %v724_v22  ;;  %v2756_v22 = vld [vmem:[%s3821_s6 + $0x50] sm:$0xff] }
  0x2b   : > { %2923 = vmatmul.mubr.msk.f32.vlgmr.msra.gmra.mxu0 %vm566_vm0, %v3389_v9  ;;  %2935 = vmatprep.subr.mxu0 %v3210_v2 }
  0x2c   : > { %2943 = vmatprep.mubr.msk.f32.mxu0 %vm3211_vm1, %v3210_v2  ;;  %2936 = vmatpush3.msra.mxu0 %v2722_v38 }
  0x2d   : > { %2937 = vmatprep.subr.mxu0 %v3210_v2 }
  0x2e   : > { %2938 = vmatpush3.msra.mxu0 %v2721_v39 }
  0x2f   : > { %2939 = vmatprep.subr.mxu0 %v3210_v2 }
  0x30   : > { %2940 = vmatpush3.msra.mxu0 %v2720_v40  ;;  %v2752_v40 = vld [vmem:[%s3820_s5 + $0x2] ss:$0 sm:$0xff] }
  0x31   : > { %2941 = vmatprep.subr.mxu0 %v3210_v2 }
  0x32   : > { %2942 = vmatpush3.msra.mxu0 %v2719_v41 }
  0x33   : > { %2944 = vmatmul.mubr.msk.f32.vlgmr.msra.gmra.mxu0 %vm566_vm0, %v3391_v10  ;;  %2957 = vmatprep.subr.mxu0 %v3210_v2 }
  0x34   : > { %2965 = vmatprep.mubr.msk.f32.mxu0 %vm3211_vm1, %v3210_v2  ;;  %2958 = vmatpush3.msra.mxu0 %v2736_v59 }
  0x35   : > { %2959 = vmatprep.subr.mxu0 %v3210_v2 }
  0x36   : > { %2960 = vmatpush3.msra.mxu0 %v2735_v60 }
  0x37   : > { %2961 = vmatprep.subr.mxu0 %v3210_v2 }
  0x38   : > { %2962 = vmatpush3.msra.mxu0 %v2734_v61 }
  0x39   : > { %2963 = vmatprep.subr.mxu0 %v3210_v2 }
  0x3a   : > { %2964 = vmatpush3.msra.mxu0 %v2733_v62  ;;  %v2772_v62 = vld [vmem:[%s3825_s10 + $0x10] sm:$0xff] }
  0x3b   : > { %2966 = vmatmul.mubr.msk.f32.vlgmr.msra.gmra.mxu0 %vm566_vm0, %v3389_v9  ;;  %2978 = vmatprep.subr.mxu0 %v3210_v2 }
  0x3c   : > { %2980 = vmatprep.mubr.msk.f32.mxu0 %vm3211_vm1, %v3210_v2 }
  0xe1   : > { %v720_v13 = vpop.f32.mrf.mxu1  ;;  %v636_v14 = vpop.f32.mrf.mxu0 }
  0xe2   : > { %v721_v15 = vadd.f32 %v2712_v11, %v720_v13  ;;  %v637_v16 = vadd.f32 %v2710_v12, %v636_v14  ;;  %v2738_v12 = vld [vmem:[%s3824_s9 + $0x1] ss:$0 sm:$0xff] }
  0xe3   : > { %v2913_v17 = vpop.f32.mrf.mxu1  ;;  %v2902_v18 = vpop.f32.mrf.mxu0 }
  0xe4   : > { %2926 = vmatpush3.xpose.msk.msra.mxu1 %vm805_vm2, %v721_v15 }
  0xe5   : > { %2930 = vmatprep.subr.mxu1 %v3210_v2 }
  0xe7   : > { %2928 = vmatmul.mubr.msk.f32.vlgmr.msra.gmra.mxu1 %vm805_vm2, %v637_v16  ;;  %v2744_v16 = vld [vmem:[%s3825_s10 + $0x8] sm:$0xff] }
  0xe8   : > { %2932 = vmatprep.mubr.msk.f32.mxu1 %vm3211_vm1, %v3210_v2  ;;  %2979 = vmatpush3.msra.mxu0 %v2744_v16 }
  0xe9   : > { %2988 = vmatprep.subr.mxu0 %v3210_v2 }
  0xeb   : > { %v801_v35 = vpop.f32.mrf.mxu0 }
  0xec   : > { %v802_v36 = vadd.f32 %v2714_v34, %v801_v35  ;;  %v2759_v34 = vld [vmem:[%s3822_s7 + $0x2] ss:$0 sm:$0xff] }
  0xed   : > { %v2924_v37 = vpop.f32.mrf.mxu0 }
  0xee   : > { %2931 = vmatpush3.msra.mxu1 %v802_v36 }
  0xef   : > { %2946 = vmatprep.subr.mxu1 %v3210_v2 }
  0xf3   : > { %v1051_v49 = vpop.f32.mrf.mxu0 }
  0xf4   : > { %v1052_v57 = vadd.f32 %v2724_v54, %v1051_v49 }
  0xf5   : > { %v2945_v50 = vpop.f32.mrf.mxu0 }
  0xfb   : > { %v1217_v13 = vpop.f32.mrf.mxu0 }
  0xfc   : > { %v1218_v14 = vadd.f32 %v2738_v12, %v1217_v13  ;;  %v2782_v13 = vld [vmem:[%s3821_s6 + $0x68] sm:$0xff] }
  0xfd   : > { %v2967_v15 = vpop.f32.mrf.mxu0 }
 0x1a7   : > { %v878_v24 = vpop.f32.mrf.mxu1 }
 0x1a8   : > { %v883_v25 = vmul.f32 0.35355338, %v878_v24  ;;  %v2755_v24 = vld [vmem:[%s3821_s6 + $0x48] sm:$0xff] }
 0x1a9   : > { %v2929_v26 = vpop.f32.mrf.mxu1 }
 0x1aa   : > { %v885_v27 = vsel %vm884_vm3, -1e+30, %v883_v25  ;;  %v2754_v25 = vld [vmem:[%s3821_s6 + $0x40] sm:$0xff]  ;;  %v2750_v26 = vld [vmem:[%s3819_s4 + $0x58] sm:$0xff] }
 0x1ab   : > { %v886_v28 = vsel %vm805_vm2, %v885_v27, -inf }
 0x1ac   : > { %887 = vmax.xlane.f32.xlu0 %v886_v28  ;;  %v2749_v28 = vld [vmem:[%s3819_s4 + $0x50] sm:$0xff] }
 0x235   : > { %v888_v29 = vpop.xlane.xlu0 %887 }
 0x236   : > { %v889_v30 = vsub.f32 %v885_v27, %v888_v29 }
 0x238   : > { %v890_v31 = vmul.f32 1.442695, %v889_v30  ;;  %v2748_v30 = vld [vmem:[%s3819_s4 + $0x48] sm:$0xff] }
 0x23a   : > { %3130 = vpow2.f32 %v890_v31 }
 0x247   : > { %v3131_v32 = vpop.eup %3130 }
 0x248   : > { %v892_v33 = vsel %vm805_vm2, %v3131_v32, 0.0 }
 0x249   : > { %893 = vadd.xlane.f32.xlu0 %v892_v33 }
 0x2d2   : > { %v894_v42 = vpop.xlane.xlu0 %893 }
 0x2d3   : > { %3132 = vrcp.f32 %v894_v42 }
 0x2e0   : > { %v3133_v43 = vpop.eup %3132 }
 0x2e1   : > { %v896_v44 = vmul.f32 %v3133_v43, %v3131_v32  ;;  %v2747_v32 = vld [vmem:[%s3819_s4 + $0x40] sm:$0xff] }
 0x2e3   : > { %897 = vst.msk [vmem:[%s3479_s30] sm:$0xff] %vm805_vm2, %v896_v44  ;;  %2933 = vmatmul.mubr.msk.f32.vlgmr.msra.gmra.mxu1 %vm805_vm2, %v896_v44  ;;  %v2764_v44 = vld [vmem:[%s3823_s8 + $0x58] sm:$0xff] }
 0x2e4   : > { %2947 = vmatpush3.msra.mxu1 %v2729_v45  ;;  %2954 = vmatprep.mubr.msk.f32.mxu1 %vm3211_vm1, %v3210_v2  ;;  %v2763_v45 = vld [vmem:[%s3823_s8 + $0x50] sm:$0xff] }
 0x2e5   : > { %2948 = vmatprep.subr.mxu1 %v3210_v2 }
 0x2e6   : > { %2949 = vmatpush3.msra.mxu1 %v2728_v46  ;;  %v2762_v46 = vld [vmem:[%s3823_s8 + $0x48] sm:$0xff] }
 0x2e7   : > { %2950 = vmatprep.subr.mxu1 %v3210_v2 }
 0x2e8   : > { %2951 = vmatpush3.msra.mxu1 %v2727_v47  ;;  %v2761_v47 = vld [vmem:[%s3823_s8 + $0x40] sm:$0xff] }
 0x2e9   : > { %2952 = vmatprep.subr.mxu1 %v3210_v2 }
 0x2ea   : > { %2953 = vmatpush3.msra.mxu1 %v2726_v48 }
 0x2eb   : > { %2955 = vmatmul.mubr.msk.f32.vlgmr.msra.gmra.mxu1 %vm566_vm0, %v3389_v9  ;;  %2968 = vmatprep.subr.mxu1 %v3210_v2 }
 0x2ec   : > { %2970 = vmatprep.mubr.msk.f32.mxu1 %vm3211_vm1, %v3210_v2 }
 0x3a3   : > { %v967_v51 = vpop.f32.mrf.mxu1 }
 0x3a5   : > { %v2934_v52 = vpop.f32.mrf.mxu1 }
 0x3ab   : > { %v1134_v55 = vpop.f32.mrf.mxu1 }
 0x3ac   : > { %v1135_v56 = vadd.f32 %v2731_v53, %v1134_v55 }
 0x3ad   : > { %v2956_v58 = vpop.f32.mrf.mxu1 }
 0x3ae   : > { %2969 = vmatpush3.xpose.msk.msra.mxu1 %vm805_vm2, %v1135_v56  ;;  %v2766_v58 = vld [vmem:[%s3824_s9 + $0x2] ss:$0 sm:$0xff] }
 0x3af   : > { %2973 = vmatprep.subr.mxu1 %v3210_v2 }
 0x3b1   : > { %2971 = vmatmul.mubr.msk.f32.vlgmr.msra.gmra.mxu1 %vm805_vm2, %v1052_v57 }
 0x3b2   : > { %2975 = vmatprep.mubr.msk.f32.mxu1 %vm3211_vm1, %v3210_v2  ;;  %2974 = vmatpush3.msra.mxu1 %v1218_v14  ;;  %v2781_v14 = vld [vmem:[%s3821_s6 + $0x60] sm:$0xff] }
 0x3b3   : > { %2983 = vmatprep.subr.mxu1 %v3210_v2 }
 0x471   : > { %v1293_v63 = vpop.f32.mrf.mxu1 }
 0x472   : > { %v1297_v0 = vmul.f32 0.35355338, %v1293_v63 }
 0x473   : > { %v2972_v1 = vpop.f32.mrf.mxu1 }
 0x474   : > { %v1298_v3 = vsel %vm884_vm3, -1e+30, %v1297_v0 }
 0x475   : > { %v1299_v4 = vsel %vm805_vm2, %v1298_v3, -inf }
 0x476   : > { %1300 = vmax.xlane.f32.xlu1 %v1299_v4  ;;  %v2776_v4 = vld [vmem:[%s3819_s4 + $0x70] sm:$0xff] }
 0x4ff   : > { %v1301_v5 = vpop.xlane.xlu1 %1300 }
 0x500   : > { %v1302_v6 = vsub.f32 %v1298_v3, %v1301_v5  ;;  %v2777_v3 = vld [vmem:[%s3819_s4 + $0x78] sm:$0xff]  ;;  %v2775_v5 = vld [vmem:[%s3819_s4 + $0x68] sm:$0xff] }
 0x502   : > { %v1303_v7 = vmul.f32 1.442695, %v1302_v6  ;;  %v2774_v6 = vld [vmem:[%s3819_s4 + $0x60] sm:$0xff] }
 0x504   : > { %3134 = vpow2.f32 %v1303_v7  ;;  %v2784_v7 = vld [vmem:[%s3821_s6 + $0x78] sm:$0xff] }
 0x511   : > { %v3135_v8 = vpop.eup %3134 }
 0x512   : > { %v1305_v11 = vsel %vm805_vm2, %v3135_v8, 0.0 }
 0x513   : > { %1306 = vadd.xlane.f32.xlu1 %v1305_v11  ;;  %v2783_v11 = vld [vmem:[%s3821_s6 + $0x70] sm:$0xff] }
 0x59c   : > { %v1307_v17 = vpop.xlane.xlu1 %1306 }
 0x59d   : > { %3136 = vrcp.f32 %v1307_v17 }
 0x5aa   : > { %v3137_v18 = vpop.eup %3136 }
 0x5ab   : > { %v1309_v19 = vmul.f32 %v3137_v18, %v3135_v8 }
 0x5ad   : > { %2742 = vst.msk [vmem:[%s3479_s30 + $0x8] sm:$0xff] %vm805_vm2, %v1309_v19  ;;  %2976 = vmatmul.mubr.msk.f32.vlgmr.msra.gmra.mxu1 %vm805_vm2, %v1309_v19 }
 0x5ae   : > { %2984 = vmatpush3.msra.mxu1 %v971_v20  ;;  %2985 = vmatprep.mubr.msk.f32.mxu1 %vm3211_vm1, %v3210_v2 }
 0x5af   : > { %2999 = vmatprep.subr.mxu1 %v3210_v2 }
 0x5b1   : > { %2986 = vmatmul.mubr.msk.f32.vlgmr.msra.gmra.mxu1 %vm805_vm2, %v967_v51 }
 0x5b2   : > { %3000 = vmatpush3.msra.mxu1 %v2757_v21  ;;  %3007 = vmatprep.mubr.msk.f32.mxu1 %vm3211_vm1, %v3210_v2  ;;  %v2786_v21 = vld [vmem:[%s3822_s7 + $0x3] ss:$0 sm:$0xff] }
 0x5b3   : > { %3001 = vmatprep.subr.mxu1 %v3210_v2 }
 0x5b4   : > { %3002 = vmatpush3.msra.mxu1 %v2756_v22  ;;  %v2779_v22 = vld [vmem:[%s3820_s5 + $0x3] ss:$0 sm:$0xff] }
 0x5b5   : > { %3003 = vmatprep.subr.mxu1 %v3210_v2 }
 0x5b6   : > { %3004 = vmatpush3.msra.mxu1 %v2755_v24 }
 0x5b7   : > { %3005 = vmatprep.subr.mxu1 %v3210_v2 }
 0x5b8   : > { %3006 = vmatpush3.msra.mxu1 %v2754_v25 }
 0x5b9   : > { %3008 = vmatmul.mubr.msk.f32.vlgmr.msra.gmra.mxu1 %vm566_vm0, %v3389_v9  ;;  %3021 = vmatprep.subr.mxu1 %v3210_v2 }
 0x5ba   : > { %3023 = vmatprep.mubr.msk.f32.mxu1 %vm3211_vm1, %v3210_v2 }
 0x66d   : > { %v1381_v27 = vpop.f32.mrf.mxu1 }
 0x66e   : > { %2981 = vmatmul.mubr.msk.f32.vlgmr.msra.gmra.mxu0 %vm805_vm2, %v1381_v27 }
 0x66f   : > { %2989 = vmatpush3.msra.mxu0 %v2750_v26  ;;  %v2977_v29 = vpop.f32.mrf.mxu1  ;;  %2996 = vmatprep.mubr.msk.f32.mxu0 %vm3211_vm1, %v3210_v2 }
 0x670   : > { %2990 = vmatprep.subr.mxu0 %v3210_v2  ;;  %v2790_v29 = vld [vmem:[%s3823_s8 + $0x70] sm:$0xff] }
 0x671   : > { %2991 = vmatpush3.msra.mxu0 %v2749_v28  ;;  %v3591_v31 = vpop.f32.mrf.mxu1  ;;  %v2791_v28 = vld [vmem:[%s3823_s8 + $0x78] sm:$0xff] }
 0x672   : > { %2992 = vmatprep.subr.mxu0 %v3210_v2 }
 0x673   : > { %2993 = vmatpush3.msra.mxu0 %v2748_v30  ;;  %v2987_v33 = vpop.f32.mrf.mxu1  ;;  %v2789_v30 = vld [vmem:[%s3823_s8 + $0x68] sm:$0xff] }
 0x674   : > { %2994 = vmatprep.subr.mxu0 %v3210_v2 }
 0x675   : > { %2995 = vmatpush3.msra.mxu0 %v2747_v32 }
 0x676   : > { %2997 = vmatmul.mubr.msk.f32.vlgmr.msra.gmra.mxu0 %vm566_vm0, %v3391_v10  ;;  %3010 = vmatprep.subr.mxu0 %v3210_v2 }
 0x677   : > { %3018 = vmatprep.mubr.msk.f32.mxu0 %vm3211_vm1, %v3210_v2  ;;  %3011 = vmatpush3.msra.mxu0 %v2764_v44 }
 0x678   : > { %3012 = vmatprep.subr.mxu0 %v3210_v2 }
 0x679   : > { %v1695_v35 = vpop.f32.mrf.mxu1  ;;  %3013 = vmatpush3.msra.mxu0 %v2763_v45 }
 0x67a   : > { %v1696_v36 = vadd.f32 %v2759_v34, %v1695_v35  ;;  %3014 = vmatprep.subr.mxu0 %v3210_v2 }
 0x67b   : > { %v3009_v37 = vpop.f32.mrf.mxu1  ;;  %3015 = vmatpush3.msra.mxu0 %v2762_v46 }
 0x67c   : > { %3022 = vmatpush3.xpose.msk.msra.mxu1 %vm805_vm2, %v1696_v36  ;;  %3016 = vmatprep.subr.mxu0 %v3210_v2 }
 0x67d   : > { %3026 = vmatprep.subr.mxu1 %v3210_v2  ;;  %3017 = vmatpush3.msra.mxu0 %v2761_v47 }
 0x67e   : > { %3019 = vmatmul.mubr.msk.f32.vlgmr.msra.gmra.mxu0 %vm566_vm0, %v3389_v9  ;;  %3031 = vmatprep.subr.mxu0 %v3210_v2 }
 0x67f   : > { %3033 = vmatprep.mubr.msk.f32.mxu0 %vm3211_vm1, %v3210_v2  ;;  %3032 = vmatpush3.msra.mxu0 %v2772_v62 }
 0x680   : > { %3047 = vmatprep.subr.mxu0 %v3210_v2 }
 0x72e   : > { %v3608_v38 = vpop.f32.mrf.mxu0 }
 0x72f   : > { %v1530_v17 = vadd.f32 %v3591_v31, %v3608_v38  ;;  %v2788_v31 = vld [vmem:[%s3823_s8 + $0x60] sm:$0xff] }
 0x730   : > { %v2982_v39 = vpop.f32.mrf.mxu0 }
 0x736   : > { %v1612_v41 = vpop.f32.mrf.mxu0 }
 0x737   : > { %v1613_v42 = vadd.f32 %v2752_v40, %v1612_v41 }
 0x738   : > { %v2998_v43 = vpop.f32.mrf.mxu0 }
 0x739   : > { %3024 = vmatmul.mubr.msk.f32.vlgmr.msra.gmra.mxu1 %vm805_vm2, %v1613_v42  ;;  %v2799_v43 = vld [vmem:[%s3825_s10 + $0x18] sm:$0xff] }
 0x73a   : > { %3028 = vmatprep.mubr.msk.f32.mxu1 %vm3211_vm1, %v3210_v2 }
 0x73e   : > { %v1778_v59 = vpop.f32.mrf.mxu0 }
 0x73f   : > { %v1779_v60 = vadd.f32 %v2766_v58, %v1778_v59 }
 0x740   : > { %v3020_v61 = vpop.f32.mrf.mxu0 }
 0x741   : > { %3027 = vmatpush3.msra.mxu1 %v1779_v60 }
 0x742   : > { %3036 = vmatprep.subr.mxu1 %v3210_v2 }
 0x7f9   : > { %v1854_v48 = vpop.f32.mrf.mxu1 }
 0x7fa   : > { %v1858_v49 = vmul.f32 0.35355338, %v1854_v48 }
 0x7fb   : > { %v3025_v50 = vpop.f32.mrf.mxu1 }
 0x7fc   : > { %v1859_v51 = vsel %vm884_vm3, -1e+30, %v1858_v49  ;;  %v2801_v50 = vld [vmem:[%s3826_s11] ss:$0 sm:$0xff] }
 0x7fd   : > { %v1860_v52 = vsel %vm805_vm2, %v1859_v51, -inf }
 0x7fe   : > { %1861 = vmax.xlane.f32.xlu0 %v1860_v52 }
 0x887   : > { %v1862_v53 = vpop.xlane.xlu0 %1861 }
 0x888   : > { %v1863_v54 = vsub.f32 %v1859_v51, %v1862_v53 }
 0x88a   : > { %v1864_v55 = vmul.f32 1.442695, %v1863_v54 }
 0x88c   : > { %3138 = vpow2.f32 %v1864_v55 }
 0x899   : > { %v3139_v56 = vpop.eup %3138 }
 0x89a   : > { %v1866_v57 = vsel %vm805_vm2, %v3139_v56, 0.0 }
 0x89b   : > { %1867 = vadd.xlane.f32.xlu1 %v1866_v57  ;;  %v2550_v57 = vld [vmem:[%s547_s26] sm:$0xff] }
 0x924   : > { %v1868_v63 = vpop.xlane.xlu1 %1867 }
 0x925   : > { %3140 = vrcp.f32 %v1868_v63 }
 0x932   : > { %v3141_v0 = vpop.eup %3140 }
 0x933   : > { %v1870_v1 = vmul.f32 %v3141_v0, %v3139_v56  ;;  %v3212_v56 = vmov 0  }
 0x934   : > { %3129 = vset.pattern.permute.xlu0 %v3212_v56 }
 0x935   : > { %2770 = vst.msk [vmem:[%s3479_s30 + $0x10] sm:$0xff] %vm805_vm2, %v1870_v1  ;;  %3029 = vmatmul.mubr.msk.f32.vlgmr.msra.gmra.mxu1 %vm805_vm2, %v1870_v1 }
 0x936   : > { %3044 = vmatprep.mubr.msk.f32.mxu1 %vm3211_vm1, %v3210_v2  ;;  %3037 = vmatpush3.msra.mxu1 %v2777_v3 }
 0x937   : > { %3038 = vmatprep.subr.mxu1 %v3210_v2 }
 0x938   : > { %3039 = vmatpush3.msra.mxu1 %v2776_v4 }
 0x939   : > { %3040 = vmatprep.subr.mxu1 %v3210_v2 }
 0x93a   : > { %3041 = vmatpush3.msra.mxu1 %v2775_v5 }
 0x93b   : > { %3042 = vmatprep.subr.mxu1 %v3210_v2 }
 0x93c   : > { %3043 = vmatpush3.msra.mxu1 %v2774_v6 }
 0x93d   : > { %3045 = vmatmul.mubr.msk.f32.vlgmr.msra.gmra.mxu1 %vm566_vm0, %v3391_v10  ;;  %3058 = vmatprep.subr.mxu1 %v3210_v2 }
 0x93e   : > { %3066 = vmatprep.mubr.msk.f32.mxu1 %vm3211_vm1, %v3210_v2  ;;  %3059 = vmatpush3.msra.mxu1 %v2791_v28 }
 0x93f   : > { %3060 = vmatprep.subr.mxu1 %v3210_v2 }
 0x940   : > { %3061 = vmatpush3.msra.mxu1 %v2790_v29 }
 0x941   : > { %3062 = vmatprep.subr.mxu1 %v3210_v2 }
 0x942   : > { %3063 = vmatpush3.msra.mxu1 %v2789_v30 }
 0x943   : > { %3064 = vmatprep.subr.mxu1 %v3210_v2 }
 0x944   : > { %3065 = vmatpush3.msra.mxu1 %v2788_v31 }
 0x945   : > { %3067 = vmatmul.mubr.msk.f32.vlgmr.msra.gmra.mxu1 %vm566_vm0, %v3389_v9  ;;  %3079 = vmatprep.subr.mxu1 %v3210_v2 }
 0x946   : > { %3081 = vmatprep.mubr.msk.f32.mxu1 %vm3211_vm1, %v3210_v2  ;;  %3080 = vmatpush3.msra.mxu1 %v2799_v43 }
 0x9f5   : > { %v1942_v8 = vpop.f32.mrf.mxu1 }
 0x9f6   : > { %3034 = vmatmul.mubr.msk.f32.vlgmr.msra.gmra.mxu0 %vm805_vm2, %v1942_v8 }
 0x9f7   : > { %3048 = vmatpush3.msra.mxu0 %v2784_v7  ;;  %v3030_v12 = vpop.f32.mrf.mxu1  ;;  %3055 = vmatprep.mubr.msk.f32.mxu0 %vm3211_vm1, %v3210_v2 }
 0x9f8   : > { %3049 = vmatprep.subr.mxu0 %v3210_v2 }
 0x9f9   : > { %3050 = vmatpush3.msra.mxu0 %v2783_v11 }
 0x9fa   : > { %3051 = vmatprep.subr.mxu0 %v3210_v2 }
 0x9fb   : > { %3052 = vmatpush3.msra.mxu0 %v2782_v13 }
 0x9fc   : > { %3053 = vmatprep.subr.mxu0 %v3210_v2 }
 0x9fd   : > { %3054 = vmatpush3.msra.mxu0 %v2781_v14  ;;  %v2101_v15 = vpop.f32.mrf.mxu1 }
 0x9fe   : > { %3056 = vmatmul.mubr.msk.f32.vlgmr.msra.gmra.mxu0 %vm566_vm0, %v3389_v9  ;;  %3069 = vmatprep.subr.mxu0 %v3210_v2  ;;  %v2102_v26 = vadd.f32 %v2779_v22, %v2101_v15 }
 0x9ff   : > { %3071 = vmatprep.mubr.msk.f32.mxu0 %vm3211_vm1, %v3210_v2  ;;  %v3046_v16 = vpop.f32.mrf.mxu1 }
 0xa05   : > { %v2267_v41 = vpop.f32.mrf.mxu1 }
 0xa07   : > { %v3068_v23 = vpop.f32.mrf.mxu1 }
 0xab6   : > { %v2017_v18 = vpop.f32.mrf.mxu0 }
 0xab7   : > { %v2021_v19 = vadd.f32 %v2017_v18, %v1530_v17 }
 0xab8   : > { %v3035_v20 = vpop.f32.mrf.mxu0 }
 0xabe   : > { %v2184_v24 = vpop.f32.mrf.mxu0 }
 0xabf   : > { %v2185_v25 = vadd.f32 %v2786_v21, %v2184_v24 }
 0xac0   : > { %v3057_v27 = vpop.f32.mrf.mxu0 }
 0xac1   : > { %3070 = vmatpush3.xpose.msk.msra.mxu0 %vm805_vm2, %v2185_v25 }
 0xac2   : > { %3074 = vmatprep.subr.mxu0 %v3210_v2 }
 0xac4   : > { %3072 = vmatmul.mubr.msk.f32.vlgmr.msra.gmra.mxu0 %vm805_vm2, %v2102_v26 }
 0xac5   : > { %3076 = vmatprep.mubr.msk.f32.mxu0 %vm3211_vm1, %v3210_v2  ;;  %v2793_v2 = vld [vmem:[%s3824_s9 + $0x3] ss:$0 sm:$0xff] }
 0xac6   : > { %v2268_v42 = vadd.f32 %v2793_v2, %v2267_v41 }
 0xac8   : > { %3075 = vmatpush3.msra.mxu0 %v2268_v42 }
 0xb84   : > { %v2343_v32 = vpop.f32.mrf.mxu0 }
 0xb85   : > { %v2347_v33 = vmul.f32 0.35355338, %v2343_v32 }
 0xb86   : > { %v3073_v34 = vpop.f32.mrf.mxu0 }
 0xb87   : > { %v2348_v35 = vsel %vm884_vm3, -1e+30, %v2347_v33 }
 0xb88   : > { %v2349_v36 = vsel %vm805_vm2, %v2348_v35, -inf }
 0xb89   : > { %2350 = vmax.xlane.f32.xlu0 %v2349_v36 }
 0xc12   : > { %v2351_v37 = vpop.xlane.xlu0 %2350 }
 0xc13   : > { %v2352_v38 = vsub.f32 %v2348_v35, %v2351_v37 }
 0xc15   : > { %v2353_v39 = vmul.f32 1.442695, %v2352_v38 }
 0xc17   : > { %3142 = vpow2.f32 %v2353_v39 }
 0xc24   : > { %v3143_v9 = vpop.eup %3142 }
 0xc25   : > { %v2355_v40 = vsel %vm805_vm2, %v3143_v9, 0.0 }
 0xc26   : > { %2356 = vadd.xlane.f32.xlu1 %v2355_v40 }
 0xcaf   : > { %v2357_v44 = vpop.xlane.xlu1 %2356 }
 0xcb0   : > { %3144 = vrcp.f32 %v2357_v44 }
 0xcbd   : > { %v3145_v45 = vpop.eup %3144 }
 0xcbe   : > { %v2359_v46 = vmul.f32 %v3145_v45, %v3143_v9 }
 0xcc0   : > { %2797 = vst.msk [vmem:[%s3479_s30 + $0x18] sm:$0xff] %vm805_vm2, %v2359_v46  ;;  %3077 = vmatmul.mubr.msk.f32.vlgmr.msra.gmra.mxu0 %vm805_vm2, %v2359_v46  ;;  %s3152_s30 = sshll.u32 %s3213_s22, 4  ;;  %s3153_s30 = int_to_ptr.vmem [resolvable:$false] %s3152_s30 }
 0xcc1   : > { %s3154_s26 = scalar_lea.vmem %s3153_s30, 1024  ;;  %p3155_p0 = scmp.lt.s32.totalorder %s3760_s24, %s3153_s30 }
 0xcc2   : > { %p3156_p1 = scmp.lt.s32.totalorder %s3154_s26, %s3148_s27 }
 0xcc4   : > { %p3157_p2 = por %p3156_p1, %p3155_p0 }
 0xcc6   : > { %p3158_p3 = pnand %p3157_p2, %p3151_p13 }
 0xd80   : > { %v2431_v47 = vpop.f32.mrf.mxu0 }
 0xd81   : > { %3082 = vmatmul.mubr.msk.f32.vlgmr.msra.gmra.mxu1 %vm805_vm2, %v2431_v47 }
 0xd82   : > { %v3078_v48 = vpop.f32.mrf.mxu0 }
 0xe41   : > { %v2506_v49 = vpop.f32.mrf.mxu1 }
 0xe42   : > { %v2510_v51 = vadd.f32 %v2506_v49, %v2021_v19 }
 0xe43   : > { %v3083_v52 = vpop.f32.mrf.mxu1 }
 0xe44   : > { %v2518_v53 = vadd.f32 %v2801_v50, %v2510_v51 }
 0xe46   : > { %v2519_v54 = vadd.f32 %v2518_v53, %v3391_v10 }
 0xe48   : > { %v2520_v55 = vsel %vm566_vm0, %v2519_v54, 0.0 }
 0xe49   : > { %2521 = vadd.xlane.f32.xlu0 %v2520_v55 }
 0xe5f   : > { %2553 = vperm.xlu0 %3129, %v2550_v57  }
 0xed2   : > { %v2522_v58 = vpop.xlane.xlu0 %2521 }
 0xed3   : > { %v2524_v59 = vmul.f32 0.03125, %v2522_v58 }
 0xed5   : > { %v2525_v60 = vsub.f32 %v2519_v54, %v2524_v59 }
 0xed7   : > { %v2526_v61 = vmul.f32 %v2525_v60, %v2525_v60 }
 0xed9   : > { %v2527_v62 = vsel %vm566_vm0, %v2526_v61, 0.0 }
 0xeda   : > { %2528 = vadd.xlane.f32.xlu1 %v2527_v62 }
 0xedb   : > { %3161 = shalt.err (!%p3158_p3)
}
 0xedc   : > { %s3162_s16 = scalar_lea.hbm %s3758_s29, 512  ;;  %s3166_s18 = scalar_lea.hbm %s3830_s15, 1024 }
 0xedd   : > { %p3163_p4 = scmp.ne.s32.totalorder %s3758_s29, %s3162_s16  ;;  %p3167_p9 = scmp.lt.s32.totalorder %s3758_s29, %s3830_s15 }
 0xede   : > { %p3168_p10 = scmp.lt.s32.totalorder %s3166_s18, %s3162_s16 }
 0xedf   : > { %p3164_p7 = pnand %p3163_p4, %p3335_p5 }
 0xee0   : > { %p3169_p11 = por %p3168_p10, %p3167_p9 }
 0xee1   : > { %p3165_p8 = pneg %p3164_p7 }
 0xee3   : > { %p3170_p12 = pnand %p3169_p11, %p3165_p8 }
 0xee5   : > { %3173 = shalt.err (!%p3170_p12)
}
 0xee6   : > { %s3214_s27 = smov 128   ;;  %s3215_s30 = smov 256   ;;  %v2802_v3 = vld [vmem:[%s3827_s12] ss:$0 sm:$0xff]  ;;  %v2554_v7 = vpop.permute.xlu0 %2553 }
 0xee7   : > { %s3216_s26 = smov 8   ;;  %v2803_v5 = vld [vmem:[%s3828_s13] ss:$0 sm:$0xff] }
 0xee8   : > { %3084 = dma.vmem_to_hbm [thread:$0]  (%p3335_p5), %s3760_s24, 512, %s3758_s29, %s3764_s20, %s3214_s27, %s3215_s30, %s3216_s26  }
 0xee9   : > { %s551_s24 = scalar_lea.vmem %s3829_s14, %s3369_s25 }
 0xf63   : > { %v2529_v10 = vpop.xlane.xlu1 %2528 }
 0xf64   : > { %v2530_v63 = vmul.f32 0.03125, %v2529_v10 }
 0xf66   : > { %v2531_v0 = vadd.f32 1e-05, %v2530_v63 }
 0xf68   : > { %3146 = vrsqrt.f32 %v2531_v0 }
 0xf75   : > { %v3147_v1 = vpop.eup %3146 }
 0xf76   : > { %v2533_v4 = vmul.f32 %v3147_v1, %v2525_v60 }
 0xf78   : > { %v2541_v6 = vmul.f32 %v2802_v3, %v2533_v4 }
 0xf7a   : > { %v2549_v8 = vadd.f32 %v2803_v5, %v2541_v6 }
 0xf7c   : > { %v2556_v11 = vmul.f32 %v2554_v7, %v2549_v8 }
 0xf7e   : > { %2557 = vst.msk [vmem:[%s551_s24] sm:$0xff] %vm566_vm0, %v2556_v11 }
 0xf7f PF: > { %s3845_s29 = sld [smem:[#allocation5_spill]]  ;;  %p3090_p5 = scmp.ge.s32.totalorder %s3208_s21, 2 }
 0xf81   : > { %p3087_p13 = pnand %p3090_p5, %p3339_p6 }
 0xf83   : > { %p3088_p0 = pneg %p3087_p13 }
 0xf85   : > { %s2600_s22 = sand.u32 1, %s3845_s29  }
 0xf86   : > { %s2601_s27 = scalar_lea.sflag [#allocation3], %s2600_s22 }
 0xf87   : > { %3191 = dma.done.wait (%p3088_p0), %s2601_s27, 512  }
 0xf88   : > { %3193 = vsyncadd (%p3088_p0), %s2601_s27, 4294966784  ;;  %s3847_s21 = sld [smem:[#allocation7_spill]]  ;;  %s3850_s18 = smov %s3200_s19 }
 0xf89   : > { %s3848_s30 = sld [smem:[#allocation6_spill]] }
 0xf8a   : > { %s3849_s20 = sld [smem:[#allocation8_spill]] }
 0xf8e   : > { %p26_p1 = scmp.ge.s32.totalorder %s3847_s21, 4  }
 0xf8f   : > { %s3851_s19 = smov %s3848_s30 }
 0xf90   :  { %28 = sbr.rel (!%p26_p1) target bundleno = 5 (0x5), region = 156 }
 0xf95   :  { %2606 = vsyncpa [#allocation3], 1 }
 0xf96   :  { %2608 = vsyncpa [#allocation3 + $0x1], 1 }

// kernel: decoder_layer.4
= control target key start
LH: loop header
LB: loop body
LE: loop exit
PB: predicated region body
PF: predicated region fallthrough
CT: control target
= control target key end

     0   :  { %s3908_s0 = inlined_call_operand.vmem [shape: f32[2,8,32], index: 0, kind: input, shape index: {}]   ;;  %s3909_s1 = inlined_call_operand.vmem [shape: f32[2,16,32], index: 1, kind: input, shape index: {}]   ;;  %s3910_s2 = inlined_call_operand.vmem [shape: f32[2,8,16], index: 2, kind: input, shape index: {}]   ;;  %s3911_s3 = inlined_call_operand.vmem [shape: f32[2,8,1], index: 3, kind: input, shape index: {}]   ;;  %s3912_s4 = inlined_call_operand.vmem [shape: f32[4,32,8], index: 4, kind: input, shape index: {}]   ;;  %s3913_s5 = inlined_call_operand.vmem [shape: f32[4,1,8], index: 5, kind: input, shape index: {}]   ;;  %s3914_s6 = inlined_call_operand.vmem [shape: f32[4,32,8], index: 6, kind: input, shape index: {}]   ;;  %s3915_s7 = inlined_call_operand.vmem [shape: f32[4,1,8], index: 7, kind: input, shape index: {}]   ;;  %s3916_s8 = inlined_call_operand.vmem [shape: f32[4,32,8], index: 8, kind: input, shape index: {}]   ;;  %s3917_s9 = inlined_call_operand.vmem [shape: f32[4,1,8], index: 9, kind: input, shape index: {}]   ;;  %s3918_s10 = inlined_call_operand.vmem [shape: f32[4,8,32], index: 10, kind: input, shape index: {}]   ;;  %s3919_s11 = inlined_call_operand.vmem [shape: f32[1,32], index: 11, kind: input, shape index: {}]   ;;  %s3920_s12 = inlined_call_operand.vmem [shape: f32[1,32], index: 12, kind: input, shape index: {}]   ;;  %s3921_s13 = inlined_call_operand.vmem [shape: f32[1,32], index: 13, kind: input, shape index: {}]   ;;  %s3922_s14 = inlined_call_operand.vmem [shape: f32[2,8,32], index: 14, kind: output, shape index: {0}]   ;;  %s3923_s15 = inlined_call_operand.hbm [shape: f32[4,2,8,16], index: 15, kind: output, shape index: {1}]  }
   0x1   :  { %3929 = sst [smem:[#allocation10_spill]] %s3908_s0 }
   0x2   :  { %21 = vsyncpa [#allocation3], 0 }
   0x3   :  { %23 = vsyncpa [#allocation3 + $0x1], 0  ;;  %s3403_s18 = smov 0   ;;  %s3405_s19 = smov 0  }
   0x4   :  { %s3407_s20 = smov 0   ;;  %s3409_s21 = smov 0  }
   0x5 LB: > { %3930 = sst [smem:[#allocation5_spill]] %s3302_s18  ;;  %s3424_s22 = sadd.s32 4294967295, %s3314_s21   ;;  %s3314_s21 = sphi %s3409_s21, %s3940_s21   ;;  %s3310_s20 = sphi %s3407_s20, %s3942_s20   ;;  %s3306_s19 = sphi %s3405_s19, %s3944_s19   ;;  %s3302_s18 = sphi %s3403_s18, %s3943_s18  }
   0x6   : > { %3931 = sst [smem:[#allocation6_spill]] %s3310_s20  ;;  %s2760_s23 = sadd.s32 4294967294, %s3314_s21  }
   0x7   : > { %s3428_s24 = sadd.s32 1, %s3314_s21   ;;  %s376_s25 = sadd.s32 1, %s3310_s20 }
   0x8   : > { %3932 = sst [smem:[#allocation7_spill]] %s3428_s24  ;;  %s373_s26 = ssub.s32 %s3314_s21, %s3428_s24 }
   0x9   : > { %p386_p0 = scmp.ne.s32.totalorder %s3310_s20, %s3306_s19  ;;  %p374_p1 = scmp.eq.s32.totalorder %s373_s26, 0 }
   0xa   : > { %p387_p2 = scmp.eq.s32.totalorder %s3424_s22, 1  ;;  %p392_p3 = scmp.ne.s32.totalorder %s3306_s19, %s3302_s18 }
   0xb   : > { %p393_p4 = scmp.eq.s32.totalorder %s2760_s23, 1  ;;  %p2763_p7 = scmp.ge.s32.totalorder %s3314_s21, 1 }
   0xc   : > { %s3439_s27 = scalar_select %p374_p1, %s3310_s20, %s376_s25  }
   0xd   : > { %p3441_p5 = por %p387_p2, %p386_p0  ;;  %p3445_p6 = por %p393_p4, %p392_p3 }
   0xe   : > { %3933 = sst [smem:[#allocation8_spill]] %s3439_s27  ;;  %p470_p8 = scmp.lt.s32.totalorder %s3314_s21, 3 }
   0xf   : > { %s3935_s29 = scalar_select %p3445_p6, 1, 0 }
  0x10   : > { %p471_p9 = pnand %p2763_p7, %p470_p8 }
  0x11   : > { %3936 = sst [smem:[#allocation9_spill]] %s3935_s29  ;;  %p534_p10 = scmp.lt.s32.totalorder (!%p471_p9), %s3424_s22, 1 }
  0x12   : > { %474 = sbr.rel (%p471_p9) target bundleno = 3978 (0xf8a), region = 76  ;;  %s3937_s0 = sld [smem:[#allocation10_spill]] (!%p471_p9) }
  0x13   : > { %s531_s23 = sand.u32 (!%p471_p9), 1, %s3306_s19   ;;  %s2878_s16 = sshll.u32 (!%p471_p9), %s3424_s22, 7 }
  0x14   : > { %s3857_s26 = scalar_lea.sflag (!%p471_p9), [#allocation3], %s531_s23 }
  0x17   : > { %v647_v0 = vld [vmem:[%s3914_s6 + $0x18] sm:$0xff]  ;;  %v646_v1 = vld [vmem:[%s3914_s6 + $0x10] sm:$0xff]  ;;  %v3316_v2 = vmov 0.0   ;;  %v645_v5 = vld [vmem:[%s3914_s6 + $0x8] sm:$0xff]  ;;  %s535_s17 = scalar_select %p534_p10, %s3424_s22, 1  ;;  %vm570_vm0 = vcmask 261120  }
  0x18   : > { %2993 = vmatprep.subr.mxu1 %v647_v0  ;;  %2982 = vmatprep.subr.mxu0 %v3316_v2  ;;  %v562_v3 = vld [vmem:[%s3912_s4 + $0x18] sm:$0xff]  ;;  %v561_v4 = vld [vmem:[%s3912_s4 + $0x10] sm:$0xff]  ;;  %v560_v6 = vld [vmem:[%s3912_s4 + $0x8] sm:$0xff]  ;;  %vm3317_vm1 = vmmov 0   ;;  %vm822_vm2 = vcmask 64512   ;;  %vm906_vm4 = vcmask 130048  }
  0x19   : > { %2994 = vmatpush3.msra.mxu1 %v647_v0  ;;  %2983 = vmatpush3.msra.mxu0 %v562_v3  ;;  %v644_v7 = vld [vmem:[%s3914_s6] sm:$0xff]  ;;  %s2881_s20 = sshll.u32 %s535_s17, 4  ;;  %s3476_s27 = sshll.u32 %s535_s17, 3  ;;  %v739_v21 = vld [vmem:[%s3916_s8 + $0x18] sm:$0xff]  ;;  %v738_v22 = vld [vmem:[%s3916_s8 + $0x10] sm:$0xff] }
  0x1a   : > { %2995 = vmatprep.subr.mxu1 %v646_v1  ;;  %2984 = vmatprep.subr.mxu0 %v3316_v2  ;;  %s542_s29 = scalar_lea.vmem %s3909_s1, %s2881_s20  ;;  %s537_s18 = scalar_lea.vmem %s3937_s0, %s3476_s27  ;;  %v559_v10 = vld [vmem:[%s3912_s4] sm:$0xff]  ;;  %v737_v23 = vld [vmem:[%s3916_s8 + $0x8] sm:$0xff]  ;;  %v2793_v41 = vld [vmem:[%s3914_s6 + $0x38] sm:$0xff] }
  0x1b   : > { %2996 = vmatpush3.msra.mxu1 %v646_v1  ;;  %2985 = vmatpush3.msra.mxu0 %v561_v4  ;;  %v3486_v8 = vld [vmem:[%s542_s29] sm:$0xff]  ;;  %v3488_v9 = vld [vmem:[%s542_s29 + $0x8] sm:$0xff]  ;;  %s546_s30 = scalar_lea.vmem %s3910_s2, %s3476_s27  ;;  %v2786_v42 = vld [vmem:[%s3912_s4 + $0x38] sm:$0xff]  ;;  %s2764_s17 = sshll.u32 %s531_s23, 5 }
  0x1c   : > { %2997 = vmatprep.subr.mxu1 %v645_v5  ;;  %2986 = vmatprep.subr.mxu0 %v3316_v2  ;;  %v3496_v11 = vld [vmem:[%s537_s18] sm:$0xff]  ;;  %v2785_v43 = vld [vmem:[%s3912_s4 + $0x30] sm:$0xff]  ;;  %v2784_v44 = vld [vmem:[%s3912_s4 + $0x28] sm:$0xff]  ;;  %s3582_s29 = scalar_lea.vmem [#allocation2], %s2764_s17  ;;  %s3851_s18 = scalar_lea.hbm %s3923_s15, %s2878_s16 }
  0x1d   : > { %2998 = vmatpush3.msra.mxu1 %v645_v5  ;;  %2987 = vmatpush3.msra.mxu0 %v560_v6  ;;  %v2773_v12 = vld [vmem:[%s3915_s7] ss:$0 sm:$0xff]  ;;  %v2792_v49 = vld [vmem:[%s3914_s6 + $0x30] sm:$0xff]  ;;  %v2791_v50 = vld [vmem:[%s3914_s6 + $0x28] sm:$0xff]  ;;  %s2638_s24 = sshll.u32 %s3582_s29, 4  ;;  %s3319_s22 = smov [#allocation2]   ;;  %s3853_s24 = int_to_ptr.vmem [resolvable:$true] %s2638_s24 }
  0x1e   : > { %2999 = vmatprep.subr.mxu1 %v644_v7  ;;  %3001 = vmatprep.mubr.msk.f32.mxu1 %vm570_vm0, %v3486_v8  ;;  %v2771_v17 = vld [vmem:[%s3913_s5] ss:$0 sm:$0xff]  ;;  %v2795_v56 = vld [vmem:[%s3915_s7 + $0x1] ss:$0 sm:$0xff]  ;;  %v2801_v63 = vld [vmem:[%s3916_s8 + $0x38] sm:$0xff]  ;;  %s3254_s20 = scalar_lea.vmem %s3853_s24, 512 }
  0x1f   : > { %3000 = vmatpush3.msra.mxu1 %v644_v7  ;;  %2988 = vmatprep.subr.mxu0 %v3316_v2  ;;  %v736_v24 = vld [vmem:[%s3916_s8] sm:$0xff]  ;;  %v2800_v0 = vld [vmem:[%s3916_s8 + $0x30] sm:$0xff]  ;;  %v2799_v1 = vld [vmem:[%s3916_s8 + $0x28] sm:$0xff]  ;;  %p3255_p11 = scmp.ne.s32.totalorder %s3853_s24, %s3254_s20 }
  0x20   : > { %3002 = vmatmul.mubr.msk.f32.vlgmr.msra.gmra.mxu1 %vm570_vm0, %v3488_v9  ;;  %2989 = vmatpush3.msra.mxu0 %v559_v10  ;;  %v3543_v25 = vld [vmem:[%s546_s30] sm:$0xff]  ;;  %s550_s30 = scalar_lea.vmem %s3911_s3, %s3476_s27 }
  0x21   : > { %2990 = vmatprep.mubr.msk.f32.mxu0 %vm3317_vm1, %v3316_v2  ;;  %3015 = vmatprep.subr.mxu1 %v3316_v2  ;;  %vm904_vm3 = vcmp.gt.f32.partialorder %v3543_v25, 0.0  ;;  %v2776_v37 = vld [vmem:[%s3917_s9] ss:$0 sm:$0xff]  ;;  %v2788_v60 = vld [vmem:[%s3913_s5 + $0x1] ss:$0 sm:$0xff]  ;;  %p3256_p12 = pnand %p3255_p11, %p3441_p5 }
  0x22   : > { %2991 = vmatmul.mubr.msk.f32.vlgmr.msra.gmra.mxu0 %vm570_vm0, %v3496_v11  ;;  %3019 = vmatprep.mubr.msk.f32.mxu1 %vm3317_vm1, %v3316_v2  ;;  %v2783_v45 = vld [vmem:[%s3912_s4 + $0x20] sm:$0xff] }
  0x23   : > { %3012 = vmatprep.mubr.msk.f32.mxu0 %vm570_vm0, %v3486_v8  ;;  %3004 = vmatprep.subr.mxu0 %v739_v21  ;;  %v2790_v51 = vld [vmem:[%s3914_s6 + $0x20] sm:$0xff]  ;;  %p3257_p13 = pneg %p3256_p12 }
  0x24   : > { %3005 = vmatpush3.msra.mxu0 %v739_v21  ;;  %v2798_v3 = vld [vmem:[%s3916_s8 + $0x20] sm:$0xff] }
  0x25   : > { %3006 = vmatprep.subr.mxu0 %v738_v22 }
  0x26   : > { %3007 = vmatpush3.msra.mxu0 %v738_v22  ;;  %v2811_v22 = vld [vmem:[%s3918_s10 + $0x8] sm:$0xff] }
  0x27   : > { %3008 = vmatprep.subr.mxu0 %v737_v23 }
  0x28   : > { %3009 = vmatpush3.msra.mxu0 %v737_v23 }
  0x29   : > { %3010 = vmatprep.subr.mxu0 %v736_v24 }
  0x2a   : > { %3011 = vmatpush3.msra.mxu0 %v736_v24 }
  0x2b   : > { %3013 = vmatmul.mubr.msk.f32.vlgmr.msra.gmra.mxu0 %vm570_vm0, %v3488_v9  ;;  %3022 = vmatprep.subr.mxu0 %v3316_v2 }
  0x2c   : > { %3026 = vmatprep.mubr.msk.f32.mxu0 %vm3317_vm1, %v3316_v2 }
  0xe0   : > { %v3003_v13 = vpop.f32.mrf.mxu1 }
  0xe1   : > { %v733_v14 = vadd.f32 %v3003_v13, %v2773_v12 }
  0xe2   : > { %v727_v15 = vpop.f32.mrf.mxu1  ;;  %v640_v16 = vpop.f32.mrf.mxu0 }
  0xe3   : > { %3016 = vmatpush3.xpose.msk.msra.mxu1 %vm822_vm2, %v733_v14  ;;  %v728_v19 = vadd.f32 %v2773_v12, %v727_v15  ;;  %v641_v20 = vadd.f32 %v2771_v17, %v640_v16 }
  0xe4   : > { %3017 = vmatprep.subr.mxu1 %v3316_v2  ;;  %v2992_v18 = vpop.f32.mrf.mxu0 }
  0xe5   : > { %v2803_v18 = vld [vmem:[%s3917_s9 + $0x1] ss:$0 sm:$0xff] }
  0xe7   : > { %3018 = vmatpush3.xpose.msk.msra.mxu1 %vm822_vm2, %v728_v19 }
  0xe8   : > { %3029 = vmatprep.subr.mxu1 %v3316_v2 }
  0xea   : > { %3020 = vmatmul.mubr.msk.f32.vlgmr.msra.gmra.mxu1 %vm822_vm2, %v641_v20 }
  0xeb   : > { %3037 = vmatprep.mubr.msk.f32.mxu1 %vm3317_vm1, %v3316_v2  ;;  %v3014_v36 = vpop.f32.mrf.mxu0  ;;  %3030 = vmatpush3.msra.mxu1 %v2786_v42 }
  0xec   : > { %v819_v38 = vadd.f32 %v3014_v36, %v2776_v37  ;;  %3031 = vmatprep.subr.mxu1 %v3316_v2  ;;  %v2815_v36 = vld [vmem:[%s3912_s4 + $0x48] sm:$0xff] }
  0xed   : > { %v813_v39 = vpop.f32.mrf.mxu0  ;;  %3032 = vmatpush3.msra.mxu1 %v2785_v43 }
  0xee   : > { %v814_v40 = vadd.f32 %v2776_v37, %v813_v39  ;;  %3023 = vmatpush3.msra.mxu0 %v819_v38  ;;  %3033 = vmatprep.subr.mxu1 %v3316_v2  ;;  %v2814_v38 = vld [vmem:[%s3912_s4 + $0x40] sm:$0xff] }
  0xef   : > { %3024 = vmatprep.subr.mxu0 %v3316_v2  ;;  %3034 = vmatpush3.msra.mxu1 %v2784_v44 }
  0xf0   : > { %3025 = vmatpush3.msra.mxu0 %v814_v40  ;;  %3035 = vmatprep.subr.mxu1 %v3316_v2  ;;  %v2826_v40 = vld [vmem:[%s3915_s7 + $0x2] ss:$0 sm:$0xff] }
  0xf1   : > { %3040 = vmatprep.subr.mxu0 %v2793_v41  ;;  %3036 = vmatpush3.msra.mxu1 %v2783_v45 }
  0xf2   : > { %3038 = vmatmul.mubr.msk.f32.vlgmr.msra.gmra.mxu1 %vm570_vm0, %v3496_v11  ;;  %3051 = vmatprep.subr.mxu1 %v2801_v63 }
  0xf3   : > { %3059 = vmatprep.mubr.msk.f32.mxu1 %vm570_vm0, %v3486_v8  ;;  %3052 = vmatpush3.msra.mxu1 %v2801_v63 }
  0xf4   : > { %3053 = vmatprep.subr.mxu1 %v2800_v0 }
  0xf5   : > { %3054 = vmatpush3.msra.mxu1 %v2800_v0 }
  0xf6   : > { %3055 = vmatprep.subr.mxu1 %v2799_v1 }
  0xf7   : > { %3056 = vmatpush3.msra.mxu1 %v2799_v1 }
  0xf8   : > { %3057 = vmatprep.subr.mxu1 %v2798_v3 }
  0xf9   : > { %3058 = vmatpush3.msra.mxu1 %v2798_v3  ;;  %v2834_v3 = vld [vmem:[%s3917_s9 + $0x2] ss:$0 sm:$0xff] }
  0xfa   : > { %3060 = vmatmul.mubr.msk.f32.vlgmr.msra.gmra.mxu1 %vm570_vm0, %v3488_v9  ;;  %3069 = vmatprep.subr.mxu1 %v3316_v2 }
  0xfb   : > { %3073 = vmatprep.mubr.msk.f32.mxu1 %vm3317_vm1, %v3316_v2 }
 0x1aa   : > { %v898_v26 = vpop.f32.mrf.mxu1 }
 0x1ab   : > { %v903_v27 = vmul.f32 0.35355338, %v898_v26 }
 0x1ac   : > { %v3021_v28 = vpop.f32.mrf.mxu1 }
 0x1ad   : > { %v905_v29 = vsel %vm904_vm3, -1e+30, %v903_v27  ;;  %v992_v27 = vld [vmem:[%s3918_s10] sm:$0xff]  ;;  %v2824_v28 = vld [vmem:[%s3914_s6 + $0x58] sm:$0xff] }
 0x1ae   : > { %v907_v30 = vsel %vm906_vm4, %v905_v29, -inf }
 0x1af   : > { %908 = vmax.xlane.f32.xlu0 %v907_v30  ;;  %v2822_v30 = vld [vmem:[%s3914_s6 + $0x48] sm:$0xff] }
 0x1b2   : > { %v1072_v52 = vpop.f32.mrf.mxu1 }
 0x1b3   : > { %v1073_v62 = vadd.f32 %v2788_v60, %v1072_v52  ;;  %v2831_v52 = vld [vmem:[%s3916_s8 + $0x50] sm:$0xff] }
 0x1b4   : > { %v3039_v53 = vpop.f32.mrf.mxu1 }
 0x1b5   : > { %v2830_v53 = vld [vmem:[%s3916_s8 + $0x48] sm:$0xff] }
 0x1ba   : > { %v3061_v17 = vpop.f32.mrf.mxu1 }
 0x1bb   : > { %v1249_v19 = vadd.f32 %v3061_v17, %v2803_v18  ;;  %v2845_v17 = vld [vmem:[%s3912_s4 + $0x68] sm:$0xff] }
 0x1bc   : > { %v1243_v20 = vpop.f32.mrf.mxu1 }
 0x1bd   : > { %v1244_v21 = vadd.f32 %v2803_v18, %v1243_v20  ;;  %3070 = vmatpush3.msra.mxu1 %v1249_v19  ;;  %v2844_v18 = vld [vmem:[%s3912_s4 + $0x60] sm:$0xff]  ;;  %v2853_v20 = vld [vmem:[%s3914_s6 + $0x70] sm:$0xff] }
 0x1be   : > { %3071 = vmatprep.subr.mxu1 %v3316_v2 }
 0x1bf   : > { %3072 = vmatpush3.msra.mxu1 %v1244_v21 }
 0x1c0   : > { %3081 = vmatprep.subr.mxu1 %v3316_v2 }
 0x238   : > { %v909_v31 = vpop.xlane.xlu0 %908 }
 0x239   : > { %v910_v32 = vsub.f32 %v905_v29, %v909_v31  ;;  %v2823_v29 = vld [vmem:[%s3914_s6 + $0x50] sm:$0xff]  ;;  %v2821_v31 = vld [vmem:[%s3914_s6 + $0x40] sm:$0xff] }
 0x23b   : > { %v911_v33 = vmul.f32 1.442695, %v910_v32  ;;  %v2817_v32 = vld [vmem:[%s3912_s4 + $0x58] sm:$0xff] }
 0x23d   : > { %3236 = vpow2.f32 %v911_v33 }
 0x24a   : > { %v3237_v34 = vpop.eup %3236 }
 0x24b   : > { %v913_v35 = vsel %vm906_vm4, %v3237_v34, 0.0 }
 0x24c   : > { %914 = vadd.xlane.f32.xlu0 %v913_v35 }
 0x2d5   : > { %v915_v46 = vpop.xlane.xlu0 %914 }
 0x2d6   : > { %3238 = vrcp.f32 %v915_v46 }
 0x2e3   : > { %v3239_v47 = vpop.eup %3238 }
 0x2e4   : > { %v917_v48 = vmul.f32 %v3239_v47, %v3237_v34  ;;  %v2816_v34 = vld [vmem:[%s3912_s4 + $0x50] sm:$0xff]  ;;  %v2819_v47 = vld [vmem:[%s3913_s5 + $0x2] ss:$0 sm:$0xff] }
 0x2e6   : > { %918 = vst.msk [vmem:[%s3582_s29] sm:$0xff] %vm906_vm4, %v917_v48  ;;  %3027 = vmatmul.mubr.msk.f32.vlgmr.msra.gmra.mxu0 %vm906_vm4, %v917_v48 }
 0x2e7   : > { %3041 = vmatpush3.msra.mxu0 %v2793_v41  ;;  %3048 = vmatprep.mubr.msk.f32.mxu0 %vm570_vm0, %v3486_v8 }
 0x2e8   : > { %3042 = vmatprep.subr.mxu0 %v2792_v49 }
 0x2e9   : > { %3043 = vmatpush3.msra.mxu0 %v2792_v49 }
 0x2ea   : > { %3044 = vmatprep.subr.mxu0 %v2791_v50 }
 0x2eb   : > { %3045 = vmatpush3.msra.mxu0 %v2791_v50 }
 0x2ec   : > { %3046 = vmatprep.subr.mxu0 %v2790_v51 }
 0x2ed   : > { %3047 = vmatpush3.msra.mxu0 %v2790_v51  ;;  %v2832_v51 = vld [vmem:[%s3916_s8 + $0x58] sm:$0xff] }
 0x2ee   : > { %3049 = vmatmul.mubr.msk.f32.vlgmr.msra.gmra.mxu0 %vm570_vm0, %v3488_v9  ;;  %3062 = vmatprep.subr.mxu0 %v3316_v2 }
 0x2ef   : > { %3066 = vmatprep.mubr.msk.f32.mxu0 %vm3317_vm1, %v3316_v2 }
 0x3a6   : > { %v3600_v54 = vpop.f32.mrf.mxu0 }
 0x3a8   : > { %v3028_v55 = vpop.f32.mrf.mxu0 }
 0x3ae   : > { %v3050_v57 = vpop.f32.mrf.mxu0 }
 0x3af   : > { %v1161_v58 = vadd.f32 %v3050_v57, %v2795_v56 }
 0x3b0   : > { %v1155_v59 = vpop.f32.mrf.mxu0 }
 0x3b1   : > { %3063 = vmatpush3.xpose.msk.msra.mxu0 %vm822_vm2, %v1161_v58  ;;  %v1156_v61 = vadd.f32 %v2795_v56, %v1155_v59 }
 0x3b2   : > { %3064 = vmatprep.subr.mxu0 %v3316_v2 }
 0x3b5   : > { %3065 = vmatpush3.xpose.msk.msra.mxu0 %vm822_vm2, %v1156_v61 }
 0x3b6   : > { %3076 = vmatprep.subr.mxu0 %v3316_v2 }
 0x3b8   : > { %3067 = vmatmul.mubr.msk.f32.vlgmr.msra.gmra.mxu0 %vm822_vm2, %v1073_v62 }
 0x3b9   : > { %3078 = vmatprep.mubr.msk.f32.mxu0 %vm3317_vm1, %v3316_v2  ;;  %3077 = vmatpush3.msra.mxu0 %v2811_v22  ;;  %v2852_v22 = vld [vmem:[%s3914_s6 + $0x68] sm:$0xff] }
 0x3ba   : > { %3086 = vmatprep.subr.mxu0 %v3316_v2 }
 0x478   : > { %v1327_v4 = vpop.f32.mrf.mxu0 }
 0x479   : > { %v1331_v5 = vmul.f32 0.35355338, %v1327_v4 }
 0x47a   : > { %v3068_v6 = vpop.f32.mrf.mxu0 }
 0x47b   : > { %v1332_v7 = vsel %vm904_vm3, -1e+30, %v1331_v5 }
 0x47c   : > { %v1333_v10 = vsel %vm906_vm4, %v1332_v7, -inf }
 0x47d   : > { %1334 = vmax.xlane.f32.xlu1 %v1333_v10 }
 0x506   : > { %v1335_v12 = vpop.xlane.xlu1 %1334 }
 0x507   : > { %v1336_v13 = vsub.f32 %v1332_v7, %v1335_v12  ;;  %v2842_v7 = vld [vmem:[%s3918_s10 + $0x10] sm:$0xff] }
 0x509   : > { %v1337_v14 = vmul.f32 1.442695, %v1336_v13 }
 0x50b   : > { %3240 = vpow2.f32 %v1337_v14  ;;  %v2854_v14 = vld [vmem:[%s3914_s6 + $0x78] sm:$0xff] }
 0x518   : > { %v3241_v15 = vpop.eup %3240 }
 0x519   : > { %v1339_v16 = vsel %vm906_vm4, %v3241_v15, 0.0 }
 0x51a   : > { %1340 = vadd.xlane.f32.xlu1 %v1339_v16  ;;  %v2846_v16 = vld [vmem:[%s3912_s4 + $0x70] sm:$0xff] }
 0x5a3   : > { %v1341_v23 = vpop.xlane.xlu1 %1340 }
 0x5a4   : > { %3242 = vrcp.f32 %v1341_v23  ;;  %v2851_v23 = vld [vmem:[%s3914_s6 + $0x60] sm:$0xff] }
 0x5b1   : > { %v3243_v24 = vpop.eup %3242 }
 0x5b2   : > { %v1343_v26 = vmul.f32 %v3243_v24, %v3241_v15  ;;  %v2847_v15 = vld [vmem:[%s3912_s4 + $0x78] sm:$0xff] }
 0x5b4   : > { %2809 = vst.msk [vmem:[%s3582_s29 + $0x8] sm:$0xff] %vm906_vm4, %v1343_v26  ;;  %3074 = vmatmul.mubr.msk.f32.vlgmr.msra.gmra.mxu1 %vm906_vm4, %v1343_v26 }
 0x5b5   : > { %3082 = vmatpush3.msra.mxu1 %v992_v27  ;;  %3083 = vmatprep.mubr.msk.f32.mxu1 %vm3317_vm1, %v3316_v2 }
 0x5b6   : > { %3097 = vmatprep.subr.mxu1 %v2824_v28 }
 0x5b8   : > { %3084 = vmatmul.mubr.msk.f32.vlgmr.msra.gmra.mxu1 %vm822_vm2, %v3600_v54  ;;  %v2829_v54 = vld [vmem:[%s3916_s8 + $0x40] sm:$0xff] }
 0x5b9   : > { %3098 = vmatpush3.msra.mxu1 %v2824_v28  ;;  %3105 = vmatprep.mubr.msk.f32.mxu1 %vm570_vm0, %v3486_v8 }
 0x5ba   : > { %3099 = vmatprep.subr.mxu1 %v2823_v29 }
 0x5bb   : > { %3100 = vmatpush3.msra.mxu1 %v2823_v29 }
 0x5bc   : > { %3101 = vmatprep.subr.mxu1 %v2822_v30 }
 0x5bd   : > { %3102 = vmatpush3.msra.mxu1 %v2822_v30  ;;  %v2856_v30 = vld [vmem:[%s3915_s7 + $0x3] ss:$0 sm:$0xff] }
 0x5be   : > { %3103 = vmatprep.subr.mxu1 %v2821_v31 }
 0x5bf   : > { %3104 = vmatpush3.msra.mxu1 %v2821_v31 }
 0x5c0   : > { %3106 = vmatmul.mubr.msk.f32.vlgmr.msra.gmra.mxu1 %vm570_vm0, %v3488_v9  ;;  %3119 = vmatprep.subr.mxu1 %v3316_v2 }
 0x5c1   : > { %3123 = vmatprep.mubr.msk.f32.mxu1 %vm3317_vm1, %v3316_v2 }
 0x674   : > { %v1415_v33 = vpop.f32.mrf.mxu1 }
 0x675   : > { %3079 = vmatmul.mubr.msk.f32.vlgmr.msra.gmra.mxu0 %vm822_vm2, %v1415_v33 }
 0x676   : > { %3087 = vmatpush3.msra.mxu0 %v2817_v32  ;;  %v3075_v35 = vpop.f32.mrf.mxu1  ;;  %3094 = vmatprep.mubr.msk.f32.mxu0 %vm3317_vm1, %v3316_v2 }
 0x677   : > { %3088 = vmatprep.subr.mxu0 %v3316_v2 }
 0x678   : > { %3089 = vmatpush3.msra.mxu0 %v2816_v34  ;;  %v3687_v37 = vpop.f32.mrf.mxu1  ;;  %v2849_v34 = vld [vmem:[%s3913_s5 + $0x3] ss:$0 sm:$0xff] }
 0x679   : > { %3090 = vmatprep.subr.mxu0 %v3316_v2 }
 0x67a   : > { %3091 = vmatpush3.msra.mxu0 %v2815_v36  ;;  %v3085_v39 = vpop.f32.mrf.mxu1 }
 0x67b   : > { %3092 = vmatprep.subr.mxu0 %v3316_v2  ;;  %v2860_v39 = vld [vmem:[%s3916_s8 + $0x68] sm:$0xff] }
 0x67c   : > { %3093 = vmatpush3.msra.mxu0 %v2814_v38  ;;  %v2861_v38 = vld [vmem:[%s3916_s8 + $0x70] sm:$0xff] }
 0x67d   : > { %3095 = vmatmul.mubr.msk.f32.vlgmr.msra.gmra.mxu0 %vm570_vm0, %v3496_v11  ;;  %3108 = vmatprep.subr.mxu0 %v2832_v51 }
 0x67e   : > { %3116 = vmatprep.mubr.msk.f32.mxu0 %vm570_vm0, %v3486_v8  ;;  %3109 = vmatpush3.msra.mxu0 %v2832_v51  ;;  %v2864_v51 = vld [vmem:[%s3917_s9 + $0x3] ss:$0 sm:$0xff] }
 0x67f   : > { %3110 = vmatprep.subr.mxu0 %v2831_v52 }
 0x680   : > { %v3107_v41 = vpop.f32.mrf.mxu1  ;;  %3111 = vmatpush3.msra.mxu0 %v2831_v52 }
 0x681   : > { %v1735_v42 = vadd.f32 %v3107_v41, %v2826_v40  ;;  %3112 = vmatprep.subr.mxu0 %v2830_v53 }
 0x682   : > { %v1729_v43 = vpop.f32.mrf.mxu1  ;;  %3113 = vmatpush3.msra.mxu0 %v2830_v53 }
 0x683   : > { %3120 = vmatpush3.xpose.msk.msra.mxu1 %vm822_vm2, %v1735_v42  ;;  %v1730_v44 = vadd.f32 %v2826_v40, %v1729_v43  ;;  %3114 = vmatprep.subr.mxu0 %v2829_v54  ;;  %v2859_v40 = vld [vmem:[%s3916_s8 + $0x60] sm:$0xff] }
 0x684   : > { %3121 = vmatprep.subr.mxu1 %v3316_v2  ;;  %3115 = vmatpush3.msra.mxu0 %v2829_v54  ;;  %v2872_v54 = vld [vmem:[%s3918_s10 + $0x18] sm:$0xff] }
 0x685   : > { %3117 = vmatmul.mubr.msk.f32.vlgmr.msra.gmra.mxu0 %vm570_vm0, %v3488_v9  ;;  %3126 = vmatprep.subr.mxu0 %v3316_v2 }
 0x686   : > { %3130 = vmatprep.mubr.msk.f32.mxu0 %vm3317_vm1, %v3316_v2 }
 0x687   : > { %3122 = vmatpush3.xpose.msk.msra.mxu1 %vm822_vm2, %v1730_v44 }
 0x688   : > { %3133 = vmatprep.subr.mxu1 %v3316_v2 }
 0x735   : > { %v3705_v45 = vpop.f32.mrf.mxu0 }
 0x736   : > { %v1564_v26 = vadd.f32 %v3687_v37, %v3705_v45  ;;  %v2862_v37 = vld [vmem:[%s3916_s8 + $0x78] sm:$0xff] }
 0x737   : > { %v3080_v46 = vpop.f32.mrf.mxu0 }
 0x73d   : > { %v1646_v48 = vpop.f32.mrf.mxu0 }
 0x73e   : > { %v1647_v49 = vadd.f32 %v2819_v47, %v1646_v48 }
 0x73f   : > { %v3096_v50 = vpop.f32.mrf.mxu0 }
 0x740   : > { %3124 = vmatmul.mubr.msk.f32.vlgmr.msra.gmra.mxu1 %vm822_vm2, %v1647_v49 }
 0x741   : > { %3135 = vmatprep.mubr.msk.f32.mxu1 %vm3317_vm1, %v3316_v2  ;;  %3134 = vmatpush3.msra.mxu1 %v2842_v7 }
 0x742   : > { %3149 = vmatprep.subr.mxu1 %v2854_v14 }
 0x745   : > { %v3118_v1 = vpop.f32.mrf.mxu0 }
 0x746   : > { %v1823_v4 = vadd.f32 %v3118_v1, %v2834_v3 }
 0x747   : > { %v1817_v5 = vpop.f32.mrf.mxu0 }
 0x748   : > { %v1818_v6 = vadd.f32 %v2834_v3, %v1817_v5  ;;  %3127 = vmatpush3.msra.mxu0 %v1823_v4  ;;  %v3318_v3 = vmov 0   ;;  %v2610_v4 = vld [vmem:[%s550_s30] sm:$0xff] }
 0x749   : > { %3128 = vmatprep.subr.mxu0 %v3316_v2  ;;  %3235 = vset.pattern.permute.xlu0 %v3318_v3 }
 0x74a   : > { %3129 = vmatpush3.msra.mxu0 %v1818_v6 }
 0x74b   : > { %3138 = vmatprep.subr.mxu0 %v3316_v2 }
 0x800   : > { %v1901_v55 = vpop.f32.mrf.mxu1 }
 0x801   : > { %v1905_v56 = vmul.f32 0.35355338, %v1901_v55 }
 0x802   : > { %v3125_v57 = vpop.f32.mrf.mxu1 }
 0x803   : > { %v1906_v58 = vsel %vm904_vm3, -1e+30, %v1905_v56 }
 0x804   : > { %v1907_v59 = vsel %vm906_vm4, %v1906_v58, -inf }
 0x805   : > { %1908 = vmax.xlane.f32.xlu0 %v1907_v59 }
 0x88e   : > { %v1909_v60 = vpop.xlane.xlu0 %1908 }
 0x88f   : > { %v1910_v61 = vsub.f32 %v1906_v58, %v1909_v60  ;;  %v2874_v60 = vld [vmem:[%s3919_s11] ss:$0 sm:$0xff] }
 0x891   : > { %v1911_v62 = vmul.f32 1.442695, %v1910_v61 }
 0x893   : > { %3244 = vpow2.f32 %v1911_v62 }
 0x8a0   : > { %v3245_v63 = vpop.eup %3244 }
 0x8a1   : > { %v1913_v0 = vsel %vm906_vm4, %v3245_v63, 0.0 }
 0x8a2   : > { %1914 = vadd.xlane.f32.xlu1 %v1913_v0 }
 0x92b   : > { %v1915_v10 = vpop.xlane.xlu1 %1914 }
 0x92c   : > { %3246 = vrcp.f32 %v1915_v10 }
 0x939   : > { %v3247_v12 = vpop.eup %3246 }
 0x93a   : > { %v1917_v13 = vmul.f32 %v3247_v12, %v3245_v63 }
 0x93c   : > { %2840 = vst.msk [vmem:[%s3582_s29 + $0x10] sm:$0xff] %vm906_vm4, %v1917_v13  ;;  %3131 = vmatmul.mubr.msk.f32.vlgmr.msra.gmra.mxu0 %vm906_vm4, %v1917_v13 }
 0x93d   : > { %3146 = vmatprep.mubr.msk.f32.mxu0 %vm3317_vm1, %v3316_v2  ;;  %3139 = vmatpush3.msra.mxu0 %v2847_v15 }
 0x93e   : > { %3140 = vmatprep.subr.mxu0 %v3316_v2 }
 0x93f   : > { %3141 = vmatpush3.msra.mxu0 %v2846_v16 }
 0x940   : > { %3142 = vmatprep.subr.mxu0 %v3316_v2 }
 0x941   : > { %3143 = vmatpush3.msra.mxu0 %v2845_v17 }
 0x942   : > { %3144 = vmatprep.subr.mxu0 %v3316_v2 }
 0x943   : > { %3145 = vmatpush3.msra.mxu0 %v2844_v18 }
 0x944   : > { %3147 = vmatmul.mubr.msk.f32.vlgmr.msra.gmra.mxu0 %vm570_vm0, %v3496_v11  ;;  %3160 = vmatprep.subr.mxu0 %v2862_v37 }
 0x945   : > { %3168 = vmatprep.mubr.msk.f32.mxu0 %vm570_vm0, %v3486_v8  ;;  %3161 = vmatpush3.msra.mxu0 %v2862_v37 }
 0x946   : > { %3162 = vmatprep.subr.mxu0 %v2861_v38 }
 0x947   : > { %3163 = vmatpush3.msra.mxu0 %v2861_v38 }
 0x948   : > { %3164 = vmatprep.subr.mxu0 %v2860_v39 }
 0x949   : > { %3165 = vmatpush3.msra.mxu0 %v2860_v39 }
 0x94a   : > { %3166 = vmatprep.subr.mxu0 %v2859_v40 }
 0x94b   : > { %3167 = vmatpush3.msra.mxu0 %v2859_v40 }
 0x94c   : > { %3169 = vmatmul.mubr.msk.f32.vlgmr.msra.gmra.mxu0 %vm570_vm0, %v3488_v9  ;;  %3178 = vmatprep.subr.mxu0 %v3316_v2 }
 0x94d   : > { %3182 = vmatprep.mubr.msk.f32.mxu0 %vm3317_vm1, %v3316_v2 }
 0x9fc   : > { %v1989_v19 = vpop.f32.mrf.mxu0 }
 0x9fd   : > { %3136 = vmatmul.mubr.msk.f32.vlgmr.msra.gmra.mxu1 %vm822_vm2, %v1989_v19 }
 0x9fe   : > { %3150 = vmatpush3.msra.mxu1 %v2854_v14  ;;  %v3132_v21 = vpop.f32.mrf.mxu0  ;;  %3157 = vmatprep.mubr.msk.f32.mxu1 %vm570_vm0, %v3486_v8 }
 0x9ff   : > { %3151 = vmatprep.subr.mxu1 %v2853_v20 }
 0xa00   : > { %3152 = vmatpush3.msra.mxu1 %v2853_v20 }
 0xa01   : > { %3153 = vmatprep.subr.mxu1 %v2852_v22 }
 0xa02   : > { %3154 = vmatpush3.msra.mxu1 %v2852_v22 }
 0xa03   : > { %3155 = vmatprep.subr.mxu1 %v2851_v23 }
 0xa04   : > { %3156 = vmatpush3.msra.mxu1 %v2851_v23  ;;  %v2148_v24 = vpop.f32.mrf.mxu0 }
 0xa05   : > { %3158 = vmatmul.mubr.msk.f32.vlgmr.msra.gmra.mxu1 %vm570_vm0, %v3488_v9  ;;  %3171 = vmatprep.subr.mxu1 %v3316_v2  ;;  %v2149_v36 = vadd.f32 %v2849_v34, %v2148_v24 }
 0xa06   : > { %3175 = vmatprep.mubr.msk.f32.mxu1 %vm3317_vm1, %v3316_v2  ;;  %v3148_v8 = vpop.f32.mrf.mxu0 }
 0xa0c   : > { %v3170_v50 = vpop.f32.mrf.mxu0 }
 0xa0d   : > { %v2325_v52 = vadd.f32 %v3170_v50, %v2864_v51 }
 0xa0e   : > { %v2319_v25 = vpop.f32.mrf.mxu0 }
 0xa0f   : > { %v2320_v53 = vadd.f32 %v2864_v51, %v2319_v25  ;;  %3179 = vmatpush3.msra.mxu0 %v2325_v52 }
 0xa10   : > { %3180 = vmatprep.subr.mxu0 %v3316_v2 }
 0xa11   : > { %3181 = vmatpush3.msra.mxu0 %v2320_v53 }
 0xabd   : > { %v2064_v27 = vpop.f32.mrf.mxu1 }
 0xabe   : > { %v3788_v28 = vadd.f32 %v2064_v27, %v1564_v26 }
 0xabf   : > { %v3137_v29 = vpop.f32.mrf.mxu1 }
 0xac5   : > { %v3159_v31 = vpop.f32.mrf.mxu1 }
 0xac6   : > { %v2237_v32 = vadd.f32 %v3159_v31, %v2856_v30 }
 0xac7   : > { %v2231_v33 = vpop.f32.mrf.mxu1 }
 0xac8   : > { %3172 = vmatpush3.xpose.msk.msra.mxu1 %vm822_vm2, %v2237_v32  ;;  %v2232_v35 = vadd.f32 %v2856_v30, %v2231_v33 }
 0xac9   : > { %3173 = vmatprep.subr.mxu1 %v3316_v2 }
 0xacc   : > { %3174 = vmatpush3.xpose.msk.msra.mxu1 %vm822_vm2, %v2232_v35 }
 0xacd   : > { %3185 = vmatprep.subr.mxu1 %v3316_v2 }
 0xacf   : > { %3176 = vmatmul.mubr.msk.f32.vlgmr.msra.gmra.mxu1 %vm822_vm2, %v2149_v36 }
 0xad0   : > { %3187 = vmatprep.mubr.msk.f32.mxu1 %vm3317_vm1, %v3316_v2  ;;  %3186 = vmatpush3.msra.mxu1 %v2872_v54 }
 0xb8f   : > { %v2403_v41 = vpop.f32.mrf.mxu1 }
 0xb90   : > { %v2407_v42 = vmul.f32 0.35355338, %v2403_v41 }
 0xb91   : > { %v3177_v43 = vpop.f32.mrf.mxu1 }
 0xb92   : > { %v2408_v44 = vsel %vm904_vm3, -1e+30, %v2407_v42 }
 0xb93   : > { %v2409_v45 = vsel %vm906_vm4, %v2408_v44, -inf }
 0xb94   : > { %2410 = vmax.xlane.f32.xlu0 %v2409_v45 }
 0xc1d   : > { %v2411_v46 = vpop.xlane.xlu0 %2410 }
 0xc1e   : > { %v2412_v47 = vsub.f32 %v2408_v44, %v2411_v46 }
 0xc20   : > { %v2413_v48 = vmul.f32 1.442695, %v2412_v47 }
 0xc22   : > { %3248 = vpow2.f32 %v2413_v48 }
 0xc2f   : > { %v3249_v49 = vpop.eup %3248 }
 0xc30   : > { %v2415_v9 = vsel %vm906_vm4, %v3249_v49, 0.0 }
 0xc31   : > { %2416 = vadd.xlane.f32.xlu1 %v2415_v9 }
 0xcba   : > { %v2417_v55 = vpop.xlane.xlu1 %2416 }
 0xcbb   : > { %3250 = vrcp.f32 %v2417_v55 }
 0xcc8   : > { %v3251_v56 = vpop.eup %3250 }
 0xcc9   : > { %v2419_v57 = vmul.f32 %v3251_v56, %v3249_v49 }
 0xccb   : > { %2870 = vst.msk [vmem:[%s3582_s29 + $0x18] sm:$0xff] %vm906_vm4, %v2419_v57  ;;  %3183 = vmatmul.mubr.msk.f32.vlgmr.msra.gmra.mxu0 %vm906_vm4, %v2419_v57  ;;  %s3258_s29 = sshll.u32 %s3319_s22, 4  ;;  %s3259_s29 = int_to_ptr.vmem [resolvable:$false] %s3258_s29 }
 0xccc   : > { %s3260_s30 = scalar_lea.vmem %s3259_s29, 1024  ;;  %p3261_p0 = scmp.lt.s32.totalorder %s3853_s24, %s3259_s29 }
 0xccd   : > { %p3262_p1 = scmp.lt.s32.totalorder %s3260_s30, %s3254_s20 }
 0xccf   : > { %p3263_p2 = por %p3262_p1, %p3261_p0 }
 0xcd1   : > { %p3264_p3 = pnand %p3263_p2, %p3257_p13 }
 0xd8b   : > { %v2491_v58 = vpop.f32.mrf.mxu0 }
 0xd8c   : > { %3188 = vmatmul.mubr.msk.f32.vlgmr.msra.gmra.mxu1 %vm822_vm2, %v2491_v58 }
 0xd8d   : > { %v3184_v59 = vpop.f32.mrf.mxu0 }
 0xe4c   : > { %v2566_v2 = vpop.f32.mrf.mxu1 }
 0xe4d   : > { %v2570_v61 = vadd.f32 %v2566_v2, %v3788_v28 }
 0xe4e   : > { %v3189_v62 = vpop.f32.mrf.mxu1 }
 0xe4f   : > { %v2578_v63 = vadd.f32 %v2874_v60, %v2570_v61 }
 0xe51   : > { %v2579_v0 = vadd.f32 %v2578_v63, %v3496_v11 }
 0xe53   : > { %v2580_v1 = vsel %vm570_vm0, %v2579_v0, 0.0 }
 0xe54   : > { %2581 = vadd.xlane.f32.xlu0 %v2580_v1 }
 0xe6a   : > { %2613 = vperm.xlu0 %3235, %v2610_v4  }
 0xedd   : > { %v2582_v5 = vpop.xlane.xlu0 %2581 }
 0xede   : > { %v2584_v6 = vmul.f32 0.03125, %v2582_v5 }
 0xee0   : > { %v2585_v7 = vsub.f32 %v2579_v0, %v2584_v6 }
 0xee2   : > { %v2586_v10 = vmul.f32 %v2585_v7, %v2585_v7 }
 0xee4   : > { %v2587_v12 = vsel %vm570_vm0, %v2586_v10, 0.0 }
 0xee5   : > { %2588 = vadd.xlane.f32.xlu1 %v2587_v12 }
 0xee6   : > { %3267 = shalt.err (!%p3264_p3)
}
 0xee7   : > { %s3268_s23 = scalar_lea.hbm %s3851_s18, 512  ;;  %s3272_s25 = scalar_lea.hbm %s3923_s15, 1024 }
 0xee8   : > { %p3269_p4 = scmp.ne.s32.totalorder %s3851_s18, %s3268_s23  ;;  %p3273_p9 = scmp.lt.s32.totalorder %s3851_s18, %s3923_s15 }
 0xee9   : > { %p3274_p10 = scmp.lt.s32.totalorder %s3272_s25, %s3268_s23 }
 0xeea   : > { %p3270_p7 = pnand %p3269_p4, %p3441_p5 }
 0xeeb   : > { %p3275_p11 = por %p3274_p10, %p3273_p9 }
 0xeec   : > { %p3271_p8 = pneg %p3270_p7 }
 0xeee   : > { %p3276_p12 = pnand %p3275_p11, %p3271_p8 }
 0xef0   : > { %3279 = shalt.err (!%p3276_p12)
}
 0xef1   : > { %s3320_s20 = smov 128   ;;  %s3321_s29 = smov 256   ;;  %v2875_v16 = vld [vmem:[%s3920_s12] ss:$0 sm:$0xff]  ;;  %v2614_v20 = vpop.permute.xlu0 %2613 }
 0xef2   : > { %s3322_s30 = smov 8   ;;  %v2876_v18 = vld [vmem:[%s3921_s13] ss:$0 sm:$0xff] }
 0xef3   : > { %3190 = dma.vmem_to_hbm [thread:$0]  (%p3441_p5), %s3853_s24, 512, %s3851_s18, %s3857_s26, %s3320_s20, %s3321_s29, %s3322_s30  }
 0xef4   : > { %s554_s24 = scalar_lea.vmem %s3922_s14, %s3476_s27 }
 0xf6e   : > { %v2589_v11 = vpop.xlane.xlu1 %2588 }
 0xf6f   : > { %v2590_v13 = vmul.f32 0.03125, %v2589_v11 }
 0xf71   : > { %v2591_v14 = vadd.f32 1e-05, %v2590_v13 }
 0xf73   : > { %3252 = vrsqrt.f32 %v2591_v14 }
 0xf80   : > { %v3253_v15 = vpop.eup %3252 }
 0xf81   : > { %v2593_v17 = vmul.f32 %v3253_v15, %v2585_v7 }
 0xf83   : > { %v2601_v19 = vmul.f32 %v2875_v16, %v2593_v17 }
 0xf85   : > { %v2609_v21 = vadd.f32 %v2876_v18, %v2601_v19 }
 0xf87   : > { %v2616_v22 = vmul.f32 %v2614_v20, %v2609_v21 }
 0xf89   : > { %2617 = vst.msk [vmem:[%s554_s24] sm:$0xff] %vm570_vm0, %v2616_v22 }
 0xf8a PF: > { %s3938_s18 = sld [smem:[#allocation5_spill]]  ;;  %p3196_p5 = scmp.ge.s32.totalorder %s3314_s21, 2 }
 0xf8c   : > { %p3193_p13 = pnand %p3196_p5, %p3445_p6 }
 0xf8e   : > { %p3194_p0 = pneg %p3193_p13 }
 0xf90   : > { %s2660_s22 = sand.u32 1, %s3938_s18  }
 0xf91   : > { %s2661_s20 = scalar_lea.sflag [#allocation3], %s2660_s22 }
 0xf92   : > { %3297 = dma.done.wait (%p3194_p0), %s2661_s20, 512  }
 0xf93   : > { %3299 = vsyncadd (%p3194_p0), %s2661_s20, 4294966784  ;;  %s3940_s21 = sld [smem:[#allocation7_spill]]  ;;  %s3943_s18 = smov %s3306_s19 }
 0xf94   : > { %s3941_s29 = sld [smem:[#allocation6_spill]] }
 0xf95   : > { %s3942_s20 = sld [smem:[#allocation8_spill]] }
 0xf99   : > { %p26_p1 = scmp.ge.s32.totalorder %s3940_s21, 4  }
 0xf9a   : > { %s3944_s19 = smov %s3941_s29 }
 0xf9b   :  { %28 = sbr.rel (!%p26_p1) target bundleno = 5 (0x5), region = 156 }
 0xfa0   :  { %2666 = vsyncpa [#allocation3], 1 }
 0xfa1   :  { %2668 = vsyncpa [#allocation3 + $0x1], 1 }

</bundles_post_ra>
